<compile_context>
chip_gen: v7x
topology: tpu7x:2x2x1
jax: 0.10.0
libtpu: 0.0.40
codegen_flags: <defaults>
</compile_context>

<pallas_src>
import jax
import jax.numpy as jnp
import numpy as np
from jax.experimental import pallas as pl
from jax.experimental.pallas import tpu as pltpu

D_FEAT = 768            # CHANNELS['ViT-L/14']
D_HID = 512             # GCN hidden
D_OUT = 50              # GCN output
D_OUT_PAD = 128         # lane-padded GCN output width
NUM_CLASSES = 1
NCLS_PAD = 128          # lane-padded logits width


# ----------------------------------------------------------------------------
# helpers
# ----------------------------------------------------------------------------
def _round_up(x, m):
    return ((x + m - 1) // m) * m


def _pad_to(a, axis, size):
    pad = size - a.shape[axis]
    if pad <= 0:
        return a
    widths = [(0, 0)] * a.ndim
    widths[axis] = (0, pad)
    return jnp.pad(a, widths)


def _is_v7x():
    try:
        kind = jax.devices()[0].device_kind.lower()
    except Exception:
        return False
    return ("v7" in kind) or ("tpu7" in kind)


def _default_max_tile_k():
    # v7x has 64 MiB VMEM per TensorCore -> cap the streamed weight block
    # lower than on v5e/v6e (128 MiB VMEM).
    return 4096 if _is_v7x() else 8192


def _num_feature_blocks():
    # v7x has 2 TensorCores per chip: split the 768 output features in two so
    # both cores' DMA engines stream disjoint halves of w_enc.
    return 2 if _is_v7x() else 1


def _pick_k_tiling(K, max_tile_k):
    """Largest 256-multiple K tile (<= max_tile_k) dividing the padded K."""
    Kp = _round_up(K, 256)
    if Kp <= max_tile_k:
        return Kp, Kp
    for m in range(max_tile_k // 256, 7, -1):      # candidate tiles >= 2048
        t = 256 * m
        if Kp % t == 0:
            return t, Kp
    # Awkward factorization: pad K up to a multiple of max_tile_k (bounded
    # extra zero-row streaming, <= max_tile_k - 256 rows).
    return max_tile_k, _round_up(K, max_tile_k)


def _vmem_limit_bytes(stream_bytes, resident_bytes):
    """Derive the VMEM request from actual block sizes (double-buffered) plus
    margin for Mosaic scratch, capped at v7x's 64 MiB physical VMEM."""
    total = 2 * stream_bytes + 2 * resident_bytes
    total = int(total * 1.5) + (8 << 20)
    return max(16 << 20, min(total, 64 << 20))


def _const_spec(shape):
    """Full-array block whose index never changes (1-D grid)."""
    nd = len(shape)
    # TODO(synk): pipeline_mode=pl.Buffered(1) would drop the redundant second
    # buffer for these never-changing blocks; skipped since the VMEM budget
    # does not need the ~2.5 MiB it would free.
    return pl.BlockSpec(shape, lambda k, _nd=nd: (0,) * _nd)


# ----------------------------------------------------------------------------
# shared graph-head math (similarity / threshold / edges + 2 GCN layers + fc)
# ----------------------------------------------------------------------------
def _graph_head(f, lab_c, lab_r, w1, b1, w2, b2, wfc1, wfc2, bfc):
    n = f.shape[0]

    # similarity_matrix = f @ f.T
    sim = jax.lax.dot_general(f, f, (((1,), (1,)), ((), ())),
                              preferred_element_type=jnp.float32)      # (N, N)

    same = lab_c == lab_r                                              # (N, N)
    diff_f = jnp.logical_not(same).astype(jnp.float32)

    # threshold = mean similarity over cross-label pairs (0 if none).
    # Exact divide: the threshold feeds a discrete comparison, so the approx
    # reciprocal could flip borderline edges.
    s_sum = jnp.sum(jnp.sum(sim * diff_f, axis=1, keepdims=True),
                    axis=0, keepdims=True)                             # (1, 1)
    cnt = jnp.sum(jnp.sum(diff_f, axis=1, keepdims=True),
                  axis=0, keepdims=True)                               # (1, 1)
    thresh = jnp.where(cnt > 0.0, s_sum / jnp.maximum(cnt, 1.0), 0.0)

    row_i = jax.lax.broadcasted_iota(jnp.int32, (n, n), 0)
    col_i = jax.lax.broadcasted_iota(jnp.int32, (n, n), 1)
    is_diag = row_i == col_i

    # edge (i,j): i != j, labels equal, similarity <= threshold (symmetric)
    edge = jnp.logical_and(same, jnp.logical_not(is_diag))
    edge = jnp.logical_and(edge, sim <= thresh)
    edge_f = edge.astype(jnp.float32)

    # PyG-style GCN normalization: A_hat = A + I ; D^{-1/2} A_hat D^{-1/2}
    a_hat = edge_f + is_diag.astype(jnp.float32)
    deg_r = jnp.sum(a_hat, axis=1, keepdims=True)                      # (N, 1)
    deg_c = jnp.sum(a_hat, axis=0, keepdims=True)                      # (1, N)
    a_norm = jax.lax.rsqrt(deg_r) * a_hat * jax.lax.rsqrt(deg_c)

    # GCNConv 1 + ReLU
    h = jnp.dot(f, w1, preferred_element_type=jnp.float32)
    h = jnp.dot(a_norm, h, preferred_element_type=jnp.float32) + b1
    h = jnp.maximum(h, 0.0)

    # GCNConv 2 (lane-padded to D_OUT_PAD; padded columns stay zero)
    g = jnp.dot(h, w2, preferred_element_type=jnp.float32)
    g = jnp.dot(a_norm, g, preferred_element_type=jnp.float32) + b2

    # fc(concat([f, g])) computed as a split dot (avoids in-kernel relayout)
    logits = (jnp.dot(f, wfc1, preferred_element_type=jnp.float32)
              + jnp.dot(g, wfc2, preferred_element_type=jnp.float32)
              + bfc)
    return logits, g, edge_f


# ----------------------------------------------------------------------------
# Kernel 1: encoder (also the dual-TensorCore path on v7x).
#   grid = (n_feature_blocks, K // tile_k); the output feature block is the
#   resident f32 accumulator, initialized with the bias under k == 0.
# ----------------------------------------------------------------------------
def encode_kernel(x_ref, w_ref, b_ref, f1_ref):
    k = pl.program_id(1)

    @pl.when(k == 0)
    def _init():
        f1_ref[...] = jnp.broadcast_to(b_ref[...], f1_ref.shape)

    f1_ref[...] += jnp.dot(x_ref[...], w_ref[...],
                           preferred_element_type=jnp.float32)


def encode_image(x_bf16, w_bf16, b_enc, *, tile_k, n_fb):
    N, Kp = x_bf16.shape
    D = w_bf16.shape[1]
    nk = Kp // tile_k
    d_blk = D // n_fb
    stream = tile_k * d_blk * 2 + N * tile_k * 2
    resident = b_enc.size * 4 + N * d_blk * 4
    return pl.pallas_call(
        encode_kernel,
        out_shape=jax.ShapeDtypeStruct((N, D), jnp.float32),
        grid=(n_fb, nk),
        in_specs=[
            pl.BlockSpec((N, tile_k), lambda f, k: (0, k)),
            pl.BlockSpec((tile_k, d_blk), lambda f, k: (k, f)),
            pl.BlockSpec((1, d_blk), lambda f, k: (0, f)),
        ],
        out_specs=pl.BlockSpec((N, d_blk), lambda f, k: (0, f)),
        compiler_params=pltpu.CompilerParams(
            dimension_semantics=("parallel", "arbitrary"),
            vmem_limit_bytes=_vmem_limit_bytes(stream, resident)),
    )(x_bf16, w_bf16, b_enc)


# ----------------------------------------------------------------------------
# Kernel 2: fused encoder + graph head (single TensorCore path).
# ----------------------------------------------------------------------------
def fused_kernel(x_ref, w_ref, b_ref, lab_c_ref, lab_r_ref,
                 w1_ref, b1_ref, w2_ref, b2_ref, wfc1_ref, wfc2_ref, bfc_ref,
                 f1_ref, out_ref, fg_ref, edge_ref):
    k = pl.program_id(0)
    nk = pl.num_programs(0)

    # ---- encoder accumulation (bf16 operands, f32 accumulation) ----
    @pl.when(k == 0)
    def _init():
        f1_ref[...] = jnp.broadcast_to(b_ref[...], f1_ref.shape)

    f1_ref[...] += jnp.dot(x_ref[...], w_ref[...],
                           preferred_element_type=jnp.float32)

    # ---- graph head epilogue (runs once, on the last K step) ----
    @pl.when(k == nk - 1)
    def _head():
        f = f1_ref[...]
        logits, g, edge_f = _graph_head(
            f, lab_c_ref[...], lab_r_ref[...],
            w1_ref[...], b1_ref[...], w2_ref[...], b2_ref[...],
            wfc1_ref[...], wfc2_ref[...], bfc_ref[...])
        edge_ref[...] = edge_f
        fg_ref[:, :D_FEAT] = f
        fg_ref[:, D_FEAT:] = g
        out_ref[...] = logits


def clip_gcn_fused(x_bf16, w_bf16, b_enc, lab_col, lab_row, prep, *, tile_k):
    N, Kp = x_bf16.shape
    D = w_bf16.shape[1]
    nk = Kp // tile_k

    consts = (b_enc, lab_col, lab_row, prep["w1"], prep["b1"], prep["w2p"],
              prep["b2p"], prep["wfc1p"], prep["wfc2p"], prep["bfcp"])

    out_shapes = (
        jax.ShapeDtypeStruct((N, D), jnp.float32),                  # f_g1
        jax.ShapeDtypeStruct((N, NCLS_PAD), jnp.float32),           # logits pad
        jax.ShapeDtypeStruct((N, D_FEAT + D_OUT_PAD), jnp.float32), # f_g pad
        jax.ShapeDtypeStruct((N, N), jnp.float32),                  # edge mask
    )

    stream = tile_k * D * 2 + N * tile_k * 2
    resident = (sum(a.size * a.dtype.itemsize for a in consts)
                + sum(int(np.prod(s.shape)) * 4 for s in out_shapes))

    in_specs = ([pl.BlockSpec((N, tile_k), lambda k: (0, k)),
                 pl.BlockSpec((tile_k, D), lambda k: (k, 0))]
                + [_const_spec(a.shape) for a in consts])
    out_specs = tuple(_const_spec(s.shape) for s in out_shapes)

    return pl.pallas_call(
        fused_kernel,
        out_shape=out_shapes,
        grid=(nk,),
        in_specs=in_specs,
        out_specs=out_specs,
        compiler_params=pltpu.CompilerParams(
            dimension_semantics=("arbitrary",),
            vmem_limit_bytes=_vmem_limit_bytes(stream, resident)),
    )(x_bf16, w_bf16, *consts)


# ----------------------------------------------------------------------------
# Kernel 3: standalone graph head (used by the dual-TensorCore split path).
# ----------------------------------------------------------------------------
def head_kernel(f_ref, lab_c_ref, lab_r_ref,
                w1_ref, b1_ref, w2_ref, b2_ref, wfc1_ref, wfc2_ref, bfc_ref,
                out_ref, fg_ref, edge_ref):
    f = f_ref[...]
    logits, g, edge_f = _graph_head(
        f, lab_c_ref[...], lab_r_ref[...],
        w1_ref[...], b1_ref[...], w2_ref[...], b2_ref[...],
        wfc1_ref[...], wfc2_ref[...], bfc_ref[...])
    edge_ref[...] = edge_f
    fg_ref[:, :D_FEAT] = f
    fg_ref[:, D_FEAT:] = g
    out_ref[...] = logits


def graph_head_call(f_g1, lab_col, lab_row, prep):
    N = f_g1.shape[0]
    ins = (f_g1, lab_col, lab_row, prep["w1"], prep["b1"], prep["w2p"],
           prep["b2p"], prep["wfc1p"], prep["wfc2p"], prep["bfcp"])
    out_shapes = (
        jax.ShapeDtypeStruct((N, NCLS_PAD), jnp.float32),
        jax.ShapeDtypeStruct((N, D_FEAT + D_OUT_PAD), jnp.float32),
        jax.ShapeDtypeStruct((N, N), jnp.float32),
    )
    resident = (sum(a.size * a.dtype.itemsize for a in ins)
                + sum(int(np.prod(s.shape)) * 4 for s in out_shapes))
    return pl.pallas_call(
        head_kernel,
        out_shape=out_shapes,
        grid=(1,),
        in_specs=[_const_spec(a.shape) for a in ins],
        out_specs=tuple(_const_spec(s.shape) for s in out_shapes),
        compiler_params=pltpu.CompilerParams(
            dimension_semantics=("arbitrary",),
            vmem_limit_bytes=_vmem_limit_bytes(0, resident)),
    )(*ins)


# ----------------------------------------------------------------------------
# Parameter preparation (ONE TIME, not per forward) and the forward wrapper.
# ----------------------------------------------------------------------------
def init_params(key, in_dim):
    ks = jax.random.split(key, 4)
    return {
        "w_enc": jax.random.normal(ks[0], (in_dim, D_FEAT), jnp.float32) * 0.02,
        "b_enc": jnp.zeros((1, D_FEAT), jnp.float32),
        "w1": jax.random.normal(ks[1], (D_FEAT, D_HID), jnp.float32)
        * (1.0 / np.sqrt(D_FEAT)),
        "b1": jnp.zeros((1, D_HID), jnp.float32),
        "w2": jax.random.normal(ks[2], (D_HID, D_OUT), jnp.float32)
        * (1.0 / np.sqrt(D_HID)),
        "b2": jnp.zeros((1, D_OUT), jnp.float32),
        "wfc": jax.random.normal(ks[3], (D_FEAT + D_OUT, NUM_CLASSES), jnp.float32)
        * (1.0 / np.sqrt(D_FEAT + D_OUT)),
        "bfc": jnp.zeros((1, NUM_CLASSES), jnp.float32),
    }


def prepare_params(params, max_tile_k=None):
    """One-time prep: bf16 cast + K padding of w_enc, lane padding / splitting
    of the head params.  Call once; do NOT redo this per forward."""
    if max_tile_k is None:
        max_tile_k = _default_max_tile_k()
    K = params["w_enc"].shape[0]
    tile_k, Kp = _pick_k_tiling(K, max_tile_k)

    wfc = params["wfc"].astype(jnp.float32)
    return {
        "K": K, "Kp": Kp, "tile_k": tile_k,
        "wb": _pad_to(params["w_enc"].astype(jnp.float32), 0, Kp)
              .astype(jnp.bfloat16),
        "b_enc": params["b_enc"].astype(jnp.float32),
        "w1": params["w1"].astype(jnp.float32),
        "b1": params["b1"].astype(jnp.float32),
        "w2p": _pad_to(params["w2"].astype(jnp.float32), 1, D_OUT_PAD),
        "b2p": _pad_to(params["b2"].astype(jnp.float32), 1, D_OUT_PAD),
        "wfc1p": _pad_to(wfc[:D_FEAT], 1, NCLS_PAD),
        "wfc2p": _pad_to(_pad_to(wfc[D_FEAT:], 0, D_OUT_PAD), 1, NCLS_PAD),
        "bfcp": _pad_to(params["bfc"].astype(jnp.float32), 1, NCLS_PAD),
    }


def clip_model_forward(x, label, prep, return_feature=False,
                       n_feature_blocks=None):
    if n_feature_blocks is None:
        n_feature_blocks = _num_feature_blocks()
    assert D_FEAT % n_feature_blocks == 0

    N = x.shape[0]
    x_flat = x.reshape(N, -1).astype(jnp.float32)                # NCHW flattened
    assert x_flat.shape[1] == prep["K"]
    xb = _pad_to(x_flat, 1, prep["Kp"]).astype(jnp.bfloat16)     # per-call (tiny)
    tile_k = prep["tile_k"]

    if return_feature:
        return encode_image(xb, prep["wb"], prep["b_enc"],
                            tile_k=tile_k, n_fb=n_feature_blocks)

    lab_col = label.reshape(N, 1).astype(jnp.int32)
    lab_row = label.reshape(1, N).astype(jnp.int32)

    if n_feature_blocks > 1:
        # v7x: both TensorCores stream disjoint halves of w_enc; the tiny
        # graph head runs as a separate single-shot call on the full feature.
        f_g1 = encode_image(xb, prep["wb"], prep["b_enc"],
                            tile_k=tile_k, n_fb=n_feature_blocks)
        out_p, fg_p, edge_mask = graph_head_call(f_g1, lab_col, lab_row, prep)
    else:
        f_g1, out_p, fg_p, edge_mask = clip_gcn_fused(
            xb, prep["wb"], prep["b_enc"], lab_col, lab_row, prep,
            tile_k=tile_k)

    output = out_p[:, :NUM_CLASSES]
    f_g = fg_p[:, :D_FEAT + D_OUT]
    # (output, f_g, loss_index->dense edge mask, f_g1)
    return output, f_g, edge_mask, f_g1


# ----------------------------------------------------------------------------
# host-side checks
# ----------------------------------------------------------------------------
def _check_forward(output, f_g, edge_mask, f_g1, x, label, prep, params):
    N = output.shape[0]
    out = np.asarray(output)
    fg = np.asarray(f_g)
    em = np.asarray(edge_mask)
    f1 = np.asarray(f_g1).astype(np.float32)
    lab = np.asarray(label)

    # encoder vs host reference (same bf16 operand rounding, f32 accumulation)
    xh = np.asarray(x.reshape(N, -1).astype(jnp.bfloat16).astype(jnp.float32))
    wh = np.asarray(params["w_enc"].astype(jnp.bfloat16).astype(jnp.float32))
    f_ref = xh @ wh + np.asarray(params["b_enc"], np.float32)
    np.testing.assert_allclose(f1, f_ref, rtol=2e-3, atol=2e-3)

    # structural checks
    assert output.shape == (N, NUM_CLASSES)
    assert f_g.shape == (N, D_FEAT + D_OUT)
    assert edge_mask.shape == (N, N)
    assert np.all(np.isfinite(out))
    assert np.array_equal(em, em.T)
    assert np.all(np.diag(em) == 0.0)
    assert np.all(em[lab[:, None] != lab[None, :]] == 0.0)
    np.testing.assert_allclose(fg[:, :D_FEAT], f1, rtol=1e-6, atol=1e-6)

    # edge rule check (skip pairs numerically on the threshold boundary)
    sim = f1 @ f1.T
    diff = lab[:, None] != lab[None, :]
    cnt = int(diff.sum())
    thr = float(sim[diff].sum() / cnt) if cnt > 0 else 0.0
    expect = ((lab[:, None] == lab[None, :]) & (~np.eye(N, dtype=bool))
              & (sim <= thr)).astype(np.float32)
    clear = np.abs(sim - thr) > 5e-3 * (1.0 + abs(thr))
    assert np.array_equal(em[clear], expect[clear])

    # GCN + fc reference built from the kernel's own edge mask
    a_hat = em + np.eye(N, dtype=np.float32)
    dinv = 1.0 / np.sqrt(a_hat.sum(1))
    a_norm = dinv[:, None] * a_hat * dinv[None, :]
    w1 = np.asarray(prep["w1"]); b1 = np.asarray(prep["b1"])
    w2 = np.asarray(prep["w2p"])[:, :D_OUT]
    b2 = np.asarray(prep["b2p"])[:, :D_OUT]
    h = np.maximum(a_norm @ (f1 @ w1) + b1, 0.0)
    g = a_norm @ (h @ w2) + b2
    np.testing.assert_allclose(fg[:, D_FEAT:], g, rtol=2e-3, atol=2e-3)

    wfc = np.asarray(params["wfc"], np.float32)
    bfc = np.asarray(params["bfc"], np.float32)
    out_ref = np.concatenate([f1, g], axis=1) @ wfc + bfc
    np.testing.assert_allclose(out, out_ref, rtol=2e-3, atol=2e-3)


if __name__ == "__main__":
    key = jax.random.PRNGKey(0)
    kx, kl, kp, kx2 = jax.random.split(key, 4)

    # --- small image batch: N=8, C=3, H=W=16 -> K=768 (single K step) ---
    N, C, H, W = 8, 3, 16, 16
    x = jax.random.normal(kx, (N, C, H, W), jnp.float32)
    label = jax.random.randint(kl, (N,), 0, 2, jnp.int32)
    params = init_params(kp, C * H * W)
    prep = prepare_params(params)          # one-time bf16 cast / padding

    f_g1_last = None
    for n_fb in (1, 2):   # fused single-call path and dual-TensorCore split path
        output, f_g, edge_mask, f_g1 = clip_model_forward(
            x, label, prep, n_feature_blocks=n_fb)
        jax.block_until_ready((output, f_g, edge_mask, f_g1))
        _check_forward(output, f_g, edge_mask, f_g1, x, label, prep, params)
        f_g1_last = f_g1

    # return_feature=True path (auto core split)
    f_only = clip_model_forward(x, label, prep, return_feature=True)
    jax.block_until_ready(f_only)
    np.testing.assert_allclose(np.asarray(f_only), np.asarray(f_g1_last),
                               rtol=1e-5, atol=1e-5)

    # --- larger flattened input: K=5000 -> padded to 5120, multi-step K grid ---
    N2 = 8
    x2 = jax.random.normal(kx2, (N2, 2, 50, 50), jnp.float32)
    params2 = init_params(jax.random.fold_in(kp, 1), 2 * 50 * 50)
    prep2 = prepare_params(params2, max_tile_k=2560)   # forces 2 K steps
    out2 = clip_model_forward(x2, label, prep2)
    jax.block_until_ready(out2)
    _check_forward(*out2, x2, label, prep2, params2)

    print("KERNEL_OK")
</pallas_src>

<mosaic_0001>
module attributes {stable_mosaic.version = 11 : i64} {
  func.func @fused_kernel(%arg0: i32, %arg1: memref<8x768xbf16, #tpu.memory_space<vmem>>, %arg2: memref<768x768xbf16, #tpu.memory_space<vmem>>, %arg3: memref<1x768xf32, #tpu.memory_space<vmem>>, %arg4: memref<8x1xi32, #tpu.memory_space<vmem>>, %arg5: memref<1x8xi32, #tpu.memory_space<vmem>>, %arg6: memref<768x512xf32, #tpu.memory_space<vmem>>, %arg7: memref<1x512xf32, #tpu.memory_space<vmem>>, %arg8: memref<512x128xf32, #tpu.memory_space<vmem>>, %arg9: memref<1x128xf32, #tpu.memory_space<vmem>>, %arg10: memref<768x128xf32, #tpu.memory_space<vmem>>, %arg11: memref<128x128xf32, #tpu.memory_space<vmem>>, %arg12: memref<1x128xf32, #tpu.memory_space<vmem>>, %arg13: memref<8x768xf32, #tpu.memory_space<vmem>>, %arg14: memref<8x128xf32, #tpu.memory_space<vmem>>, %arg15: memref<8x896xf32, #tpu.memory_space<vmem>>, %arg16: memref<8x8xf32, #tpu.memory_space<vmem>>) attributes {dimension_semantics = [#tpu.dimension_semantics<arbitrary>], iteration_bounds = array<i64: 1>, scalar_prefetch = 0 : i64, scratch_operands = 0 : i64, tpu.core_type = #tpu.core_type<tc>, window_params = [{transform_indices = @transform_0, window_bounds = array<i64: 8, 768>}, {transform_indices = @transform_1, window_bounds = array<i64: 768, 768>}, {pipeline_mode = #tpu.pipeline_mode<synchronous>, transform_indices = @transform_2, window_bounds = array<i64: 1, 768>}, {pipeline_mode = #tpu.pipeline_mode<synchronous>, transform_indices = @transform_3, window_bounds = array<i64: 8, 1>}, {pipeline_mode = #tpu.pipeline_mode<synchronous>, transform_indices = @transform_4, window_bounds = array<i64: 1, 8>}, {pipeline_mode = #tpu.pipeline_mode<synchronous>, transform_indices = @transform_5, window_bounds = array<i64: 768, 512>}, {pipeline_mode = #tpu.pipeline_mode<synchronous>, transform_indices = @transform_6, window_bounds = array<i64: 1, 512>}, {pipeline_mode = #tpu.pipeline_mode<synchronous>, transform_indices = @transform_7, window_bounds = array<i64: 512, 128>}, {pipeline_mode = #tpu.pipeline_mode<synchronous>, transform_indices = @transform_8, window_bounds = array<i64: 1, 128>}, {pipeline_mode = #tpu.pipeline_mode<synchronous>, transform_indices = @transform_9, window_bounds = array<i64: 768, 128>}, {pipeline_mode = #tpu.pipeline_mode<synchronous>, transform_indices = @transform_10, window_bounds = array<i64: 128, 128>}, {pipeline_mode = #tpu.pipeline_mode<synchronous>, transform_indices = @transform_11, window_bounds = array<i64: 1, 128>}, {pipeline_mode = #tpu.pipeline_mode<synchronous>, transform_indices = @transform_12, window_bounds = array<i64: 8, 768>}, {pipeline_mode = #tpu.pipeline_mode<synchronous>, transform_indices = @transform_13, window_bounds = array<i64: 8, 128>}, {pipeline_mode = #tpu.pipeline_mode<synchronous>, transform_indices = @transform_14, window_bounds = array<i64: 8, 896>}, {pipeline_mode = #tpu.pipeline_mode<synchronous>, transform_indices = @transform_15, window_bounds = array<i64: 8, 8>}]} {
    %c0_i32 = arith.constant 0 : i32
    %0 = arith.cmpi eq, %arg0, %c0_i32 : i32
    %1 = arith.extui %0 : i1 to i32
    %c0_i32_0 = arith.constant 0 : i32
    %2 = arith.cmpi ne, %1, %c0_i32_0 : i32
    scf.if %2 {
      %c0_10 = arith.constant 0 : index
      %c0_11 = arith.constant 0 : index
      %12 = vector.load %arg3[%c0_10, %c0_11] : memref<1x768xf32, #tpu.memory_space<vmem>>, vector<1x768xf32>
      %13 = vector.shape_cast %12 : vector<1x768xf32> to vector<1x768xf32>
      %14 = vector.broadcast %13 : vector<1x768xf32> to vector<8x768xf32>
      %c0_12 = arith.constant 0 : index
      %c0_13 = arith.constant 0 : index
      %15 = vector.load %arg13[%c0_12, %c0_13] : memref<8x768xf32, #tpu.memory_space<vmem>>, vector<8x768xf32>
      tpu.vector_store %arg13[%c0_12, %c0_13], %14 {strides = array<i32>} : memref<8x768xf32, #tpu.memory_space<vmem>>, vector<8x768xf32>,
    } else {
    }
    %c0 = arith.constant 0 : index
    %c0_1 = arith.constant 0 : index
    %3 = vector.load %arg13[%c0, %c0_1] : memref<8x768xf32, #tpu.memory_space<vmem>>, vector<8x768xf32>
    %c0_2 = arith.constant 0 : index
    %c0_3 = arith.constant 0 : index
    %4 = vector.load %arg1[%c0_2, %c0_3] : memref<8x768xbf16, #tpu.memory_space<vmem>>, vector<8x768xbf16>
    %c0_4 = arith.constant 0 : index
    %c0_5 = arith.constant 0 : index
    %5 = vector.load %arg2[%c0_4, %c0_5] : memref<768x768xbf16, #tpu.memory_space<vmem>>, vector<768x768xbf16>
    %cst = arith.constant dense<0.000000e+00> : vector<8x768xf32>
    %6 = tpu.matmul %4, %5, %cst {dimension_numbers = #tpu.dot_dimension_numbers<[1], [0], [0], [1], [0, 0, 1, 1], [], []>} : vector<8x768xbf16>, vector<768x768xbf16>, vector<8x768xf32> -> vector<8x768xf32>
    %7 = arith.addf %3, %6 : vector<8x768xf32>
    %c0_6 = arith.constant 0 : index
    %c0_7 = arith.constant 0 : index
    %8 = vector.load %arg13[%c0_6, %c0_7] : memref<8x768xf32, #tpu.memory_space<vmem>>, vector<8x768xf32>
    tpu.vector_store %arg13[%c0_6, %c0_7], %7 {strides = array<i32>} : memref<8x768xf32, #tpu.memory_space<vmem>>, vector<8x768xf32>,
    %c0_i32_8 = arith.constant 0 : i32
    %9 = arith.cmpi eq, %arg0, %c0_i32_8 : i32
    %10 = arith.extui %9 : i1 to i32
    %c0_i32_9 = arith.constant 0 : i32
    %11 = arith.cmpi ne, %10, %c0_i32_9 : i32
    scf.if %11 {
      %c0_10 = arith.constant 0 : index
      %c0_11 = arith.constant 0 : index
      %12 = vector.load %arg13[%c0_10, %c0_11] : memref<8x768xf32, #tpu.memory_space<vmem>>, vector<8x768xf32>
      %c0_12 = arith.constant 0 : index
      %c0_13 = arith.constant 0 : index
      %13 = vector.load %arg4[%c0_12, %c0_13] : memref<8x1xi32, #tpu.memory_space<vmem>>, vector<8x1xi32>
      %c0_14 = arith.constant 0 : index
      %c0_15 = arith.constant 0 : index
      %14 = vector.load %arg5[%c0_14, %c0_15] : memref<1x8xi32, #tpu.memory_space<vmem>>, vector<1x8xi32>
      %c0_16 = arith.constant 0 : index
      %c0_17 = arith.constant 0 : index
      %15 = vector.load %arg6[%c0_16, %c0_17] : memref<768x512xf32, #tpu.memory_space<vmem>>, vector<768x512xf32>
      %c0_18 = arith.constant 0 : index
      %c0_19 = arith.constant 0 : index
      %16 = vector.load %arg7[%c0_18, %c0_19] : memref<1x512xf32, #tpu.memory_space<vmem>>, vector<1x512xf32>
      %c0_20 = arith.constant 0 : index
      %c0_21 = arith.constant 0 : index
      %17 = vector.load %arg8[%c0_20, %c0_21] : memref<512x128xf32, #tpu.memory_space<vmem>>, vector<512x128xf32>
      %c0_22 = arith.constant 0 : index
      %c0_23 = arith.constant 0 : index
      %18 = vector.load %arg9[%c0_22, %c0_23] : memref<1x128xf32, #tpu.memory_space<vmem>>, vector<1x128xf32>
      %c0_24 = arith.constant 0 : index
      %c0_25 = arith.constant 0 : index
      %19 = vector.load %arg10[%c0_24, %c0_25] : memref<768x128xf32, #tpu.memory_space<vmem>>, vector<768x128xf32>
      %c0_26 = arith.constant 0 : index
      %c0_27 = arith.constant 0 : index
      %20 = vector.load %arg11[%c0_26, %c0_27] : memref<128x128xf32, #tpu.memory_space<vmem>>, vector<128x128xf32>
      %c0_28 = arith.constant 0 : index
      %c0_29 = arith.constant 0 : index
      %21 = vector.load %arg12[%c0_28, %c0_29] : memref<1x128xf32, #tpu.memory_space<vmem>>, vector<1x128xf32>
      %cst_30 = arith.constant dense<0.000000e+00> : vector<8x8xf32>
      %22 = tpu.matmul %12, %12, %cst_30 {dimension_numbers = #tpu.dot_dimension_numbers<[1], [1], [0], [0], [0, 0, 1, 0], [], []>} : vector<8x768xf32>, vector<8x768xf32>, vector<8x8xf32> -> vector<8x8xf32>
      %23 = vector.broadcast %13 : vector<8x1xi32> to vector<8x8xi32>
      %24 = vector.broadcast %14 : vector<1x8xi32> to vector<8x8xi32>
      %25 = arith.cmpi eq, %23, %24 : vector<8x8xi32>
      %cst_31 = arith.constant dense<true> : vector<8x8xi1>
      %26 = arith.xori %25, %cst_31 : vector<8x8xi1>
      %27 = arith.extui %26 : vector<8x8xi1> to vector<8x8xi32>
      %28 = arith.sitofp %27 : vector<8x8xi32> to vector<8x8xf32>
      %29 = arith.mulf %22, %28 : vector<8x8xf32>
      %cst_32 = arith.constant dense<0.000000e+00> : vector<8xf32>
      %30 = vector.multi_reduction <add>, %29, %cst_32 [1] : vector<8x8xf32> to vector<8xf32>
      %31 = vector.shape_cast %30 : vector<8xf32> to vector<8x1xf32>
      %cst_33 = arith.constant dense<0.000000e+00> : vector<1xf32>
      %32 = vector.multi_reduction <add>, %31, %cst_33 [0] : vector<8x1xf32> to vector<1xf32>
      %33 = vector.shape_cast %32 : vector<1xf32> to vector<1x1xf32>
      %cst_34 = arith.constant dense<0.000000e+00> : vector<8xf32>
      %34 = vector.multi_reduction <add>, %28, %cst_34 [1] : vector<8x8xf32> to vector<8xf32>
      %35 = vector.shape_cast %34 : vector<8xf32> to vector<8x1xf32>
      %cst_35 = arith.constant dense<0.000000e+00> : vector<1xf32>
      %36 = vector.multi_reduction <add>, %35, %cst_35 [0] : vector<8x1xf32> to vector<1xf32>
      %37 = vector.shape_cast %36 : vector<1xf32> to vector<1x1xf32>
      %cst_36 = arith.constant 0.000000e+00 : f32
      %38 = vector.broadcast %cst_36 : f32 to vector<1x1xf32>
      %39 = arith.cmpf ogt, %37, %38 : vector<1x1xf32>
      %cst_37 = arith.constant 1.000000e+00 : f32
      %40 = vector.broadcast %cst_37 : f32 to vector<1x1xf32>
      %41 = arith.maximumf %37, %40 : vector<1x1xf32>
      %42 = arith.divf %33, %41 : vector<1x1xf32>
      %cst_38 = arith.constant 0.000000e+00 : f32
      %43 = vector.broadcast %cst_38 : f32 to vector<1x1xf32>
      %44 = arith.select %39, %42, %43 : vector<1x1xi1>, vector<1x1xf32>
      %45 = tpu.iota {dimensions = array<i32: 0>} : vector<8x8xi32>
      %46 = tpu.iota {dimensions = array<i32: 1>} : vector<8x8xi32>
      %47 = arith.cmpi eq, %45, %46 : vector<8x8xi32>
      %cst_39 = arith.constant dense<true> : vector<8x8xi1>
      %48 = arith.xori %47, %cst_39 : vector<8x8xi1>
      %49 = arith.andi %25, %48 : vector<8x8xi1>
      %50 = vector.broadcast %44 : vector<1x1xf32> to vector<8x8xf32>
      %51 = arith.cmpf ole, %22, %50 : vector<8x8xf32>
      %52 = arith.andi %49, %51 : vector<8x8xi1>
      %53 = arith.extui %52 : vector<8x8xi1> to vector<8x8xi32>
      %54 = arith.sitofp %53 : vector<8x8xi32> to vector<8x8xf32>
      %55 = arith.extui %47 : vector<8x8xi1> to vector<8x8xi32>
      %56 = arith.sitofp %55 : vector<8x8xi32> to vector<8x8xf32>
      %57 = arith.addf %54, %56 : vector<8x8xf32>
      %cst_40 = arith.constant dense<0.000000e+00> : vector<8xf32>
      %58 = vector.multi_reduction <add>, %57, %cst_40 [1] : vector<8x8xf32> to vector<8xf32>
      %59 = vector.shape_cast %58 : vector<8xf32> to vector<8x1xf32>
      %cst_41 = arith.constant dense<0.000000e+00> : vector<8xf32>
      %60 = vector.multi_reduction <add>, %57, %cst_41 [0] : vector<8x8xf32> to vector<8xf32>
      %61 = vector.shape_cast %60 : vector<8xf32> to vector<1x8xf32>
      %62 = math.rsqrt %59 : vector<8x1xf32>
      %63 = vector.broadcast %62 : vector<8x1xf32> to vector<8x8xf32>
      %64 = arith.mulf %63, %57 : vector<8x8xf32>
      %65 = math.rsqrt %61 : vector<1x8xf32>
      %66 = vector.broadcast %65 : vector<1x8xf32> to vector<8x8xf32>
      %67 = arith.mulf %64, %66 : vector<8x8xf32>
      %cst_42 = arith.constant dense<0.000000e+00> : vector<8x512xf32>
      %68 = tpu.matmul %12, %15, %cst_42 {dimension_numbers = #tpu.dot_dimension_numbers<[1], [0], [0], [1], [0, 0, 1, 1], [], []>} : vector<8x768xf32>, vector<768x512xf32>, vector<8x512xf32> -> vector<8x512xf32>
      %cst_43 = arith.constant dense<0.000000e+00> : vector<8x512xf32>
      %69 = tpu.matmul %67, %68, %cst_43 {dimension_numbers = #tpu.dot_dimension_numbers<[1], [0], [0], [1], [0, 0, 1, 1], [], []>} : vector<8x8xf32>, vector<8x512xf32>, vector<8x512xf32> -> vector<8x512xf32>
      %70 = vector.broadcast %16 : vector<1x512xf32> to vector<8x512xf32>
      %71 = arith.addf %69, %70 : vector<8x512xf32>
      %cst_44 = arith.constant 0.000000e+00 : f32
      %72 = vector.broadcast %cst_44 : f32 to vector<8x512xf32>
      %73 = arith.maximumf %71, %72 : vector<8x512xf32>
      %cst_45 = arith.constant dense<0.000000e+00> : vector<8x128xf32>
      %74 = tpu.matmul %73, %17, %cst_45 {dimension_numbers = #tpu.dot_dimension_numbers<[1], [0], [0], [1], [0, 0, 1, 1], [], []>} : vector<8x512xf32>, vector<512x128xf32>, vector<8x128xf32> -> vector<8x128xf32>
      %cst_46 = arith.constant dense<0.000000e+00> : vector<8x128xf32>
      %75 = tpu.matmul %67, %74, %cst_46 {dimension_numbers = #tpu.dot_dimension_numbers<[1], [0], [0], [1], [0, 0, 1, 1], [], []>} : vector<8x8xf32>, vector<8x128xf32>, vector<8x128xf32> -> vector<8x128xf32>
      %76 = vector.broadcast %18 : vector<1x128xf32> to vector<8x128xf32>
      %77 = arith.addf %75, %76 : vector<8x128xf32>
      %cst_47 = arith.constant dense<0.000000e+00> : vector<8x128xf32>
      %78 = tpu.matmul %12, %19, %cst_47 {dimension_numbers = #tpu.dot_dimension_numbers<[1], [0], [0], [1], [0, 0, 1, 1], [], []>} : vector<8x768xf32>, vector<768x128xf32>, vector<8x128xf32> -> vector<8x128xf32>
      %cst_48 = arith.constant dense<0.000000e+00> : vector<8x128xf32>
      %79 = tpu.matmul %77, %20, %cst_48 {dimension_numbers = #tpu.dot_dimension_numbers<[1], [0], [0], [1], [0, 0, 1, 1], [], []>} : vector<8x128xf32>, vector<128x128xf32>, vector<8x128xf32> -> vector<8x128xf32>
      %80 = arith.addf %78, %79 : vector<8x128xf32>
      %81 = vector.broadcast %21 : vector<1x128xf32> to vector<8x128xf32>
      %82 = arith.addf %80, %81 : vector<8x128xf32>
      %c0_49 = arith.constant 0 : index
      %c0_50 = arith.constant 0 : index
      %83 = vector.load %arg16[%c0_49, %c0_50] : memref<8x8xf32, #tpu.memory_space<vmem>>, vector<8x8xf32>
      tpu.vector_store %arg16[%c0_49, %c0_50], %54 {strides = array<i32>} : memref<8x8xf32, #tpu.memory_space<vmem>>, vector<8x8xf32>,
      %c0_51 = arith.constant 0 : index
      %c0_52 = arith.constant 0 : index
      %84 = vector.load %arg15[%c0_51, %c0_52] : memref<8x896xf32, #tpu.memory_space<vmem>>, vector<8x768xf32>
      tpu.vector_store %arg15[%c0_51, %c0_52], %12 {strides = array<i32>} : memref<8x896xf32, #tpu.memory_space<vmem>>, vector<8x768xf32>,
      %c0_53 = arith.constant 0 : index
      %c768 = arith.constant 768 : index
      %85 = vector.load %arg15[%c0_53, %c768] : memref<8x896xf32, #tpu.memory_space<vmem>>, vector<8x128xf32>
      tpu.vector_store %arg15[%c0_53, %c768], %77 {strides = array<i32>} : memref<8x896xf32, #tpu.memory_space<vmem>>, vector<8x128xf32>,
      %c0_54 = arith.constant 0 : index
      %c0_55 = arith.constant 0 : index
      %86 = vector.load %arg14[%c0_54, %c0_55] : memref<8x128xf32, #tpu.memory_space<vmem>>, vector<8x128xf32>
      tpu.vector_store %arg14[%c0_54, %c0_55], %82 {strides = array<i32>} : memref<8x128xf32, #tpu.memory_space<vmem>>, vector<8x128xf32>,
    } else {
    }
    return
  }
  func.func @transform_0(%arg0: i32) -> (i32, i32) {
    %c0_i32 = arith.constant 0 : i32
    %c0_i32_0 = arith.constant 0 : i32
    return %c0_i32, %arg0 : i32, i32
  }
  func.func @transform_1(%arg0: i32) -> (i32, i32) {
    %c0_i32 = arith.constant 0 : i32
    %c0_i32_0 = arith.constant 0 : i32
    return %arg0, %c0_i32 : i32, i32
  }
  func.func @transform_2(%arg0: i32) -> (i32, i32) {
    %c0_i32 = arith.constant 0 : i32
    %c0_i32_0 = arith.constant 0 : i32
    %c0_i32_1 = arith.constant 0 : i32
    return %c0_i32, %c0_i32_0 : i32, i32
  }
  func.func @transform_3(%arg0: i32) -> (i32, i32) {
    %c0_i32 = arith.constant 0 : i32
    %c0_i32_0 = arith.constant 0 : i32
    %c0_i32_1 = arith.constant 0 : i32
    return %c0_i32, %c0_i32_0 : i32, i32
  }
  func.func @transform_4(%arg0: i32) -> (i32, i32) {
    %c0_i32 = arith.constant 0 : i32
    %c0_i32_0 = arith.constant 0 : i32
    %c0_i32_1 = arith.constant 0 : i32
    return %c0_i32, %c0_i32_0 : i32, i32
  }
  func.func @transform_5(%arg0: i32) -> (i32, i32) {
    %c0_i32 = arith.constant 0 : i32
    %c0_i32_0 = arith.constant 0 : i32
    %c0_i32_1 = arith.constant 0 : i32
    return %c0_i32, %c0_i32_0 : i32, i32
  }
  func.func @transform_6(%arg0: i32) -> (i32, i32) {
    %c0_i32 = arith.constant 0 : i32
    %c0_i32_0 = arith.constant 0 : i32
    %c0_i32_1 = arith.constant 0 : i32
    return %c0_i32, %c0_i32_0 : i32, i32
  }
  func.func @transform_7(%arg0: i32) -> (i32, i32) {
    %c0_i32 = arith.constant 0 : i32
    %c0_i32_0 = arith.constant 0 : i32
    %c0_i32_1 = arith.constant 0 : i32
    return %c0_i32, %c0_i32_0 : i32, i32
  }
  func.func @transform_8(%arg0: i32) -> (i32, i32) {
    %c0_i32 = arith.constant 0 : i32
    %c0_i32_0 = arith.constant 0 : i32
    %c0_i32_1 = arith.constant 0 : i32
    return %c0_i32, %c0_i32_0 : i32, i32
  }
  func.func @transform_9(%arg0: i32) -> (i32, i32) {
    %c0_i32 = arith.constant 0 : i32
    %c0_i32_0 = arith.constant 0 : i32
    %c0_i32_1 = arith.constant 0 : i32
    return %c0_i32, %c0_i32_0 : i32, i32
  }
  func.func @transform_10(%arg0: i32) -> (i32, i32) {
    %c0_i32 = arith.constant 0 : i32
    %c0_i32_0 = arith.constant 0 : i32
    %c0_i32_1 = arith.constant 0 : i32
    return %c0_i32, %c0_i32_0 : i32, i32
  }
  func.func @transform_11(%arg0: i32) -> (i32, i32) {
    %c0_i32 = arith.constant 0 : i32
    %c0_i32_0 = arith.constant 0 : i32
    %c0_i32_1 = arith.constant 0 : i32
    return %c0_i32, %c0_i32_0 : i32, i32
  }
  func.func @transform_12(%arg0: i32) -> (i32, i32) {
    %c0_i32 = arith.constant 0 : i32
    %c0_i32_0 = arith.constant 0 : i32
    %c0_i32_1 = arith.constant 0 : i32
    return %c0_i32, %c0_i32_0 : i32, i32
  }
  func.func @transform_13(%arg0: i32) -> (i32, i32) {
    %c0_i32 = arith.constant 0 : i32
    %c0_i32_0 = arith.constant 0 : i32
    %c0_i32_1 = arith.constant 0 : i32
    return %c0_i32, %c0_i32_0 : i32, i32
  }
  func.func @transform_14(%arg0: i32) -> (i32, i32) {
    %c0_i32 = arith.constant 0 : i32
    %c0_i32_0 = arith.constant 0 : i32
    %c0_i32_1 = arith.constant 0 : i32
    return %c0_i32, %c0_i32_0 : i32, i32
  }
  func.func @transform_15(%arg0: i32) -> (i32, i32) {
    %c0_i32 = arith.constant 0 : i32
    %c0_i32_0 = arith.constant 0 : i32
    %c0_i32_1 = arith.constant 0 : i32
    return %c0_i32, %c0_i32_0 : i32, i32
  }
}

</mosaic_0001>

<bundles_post_ra>
// kernel: tpu_custom_call.1
= control target key start
LH: loop header
LB: loop body
LE: loop exit
PB: predicated region body
PF: predicated region fallthrough
CT: control target
= control target key end

     0   :  { %s6822_s0 = inlined_call_operand.hbm [shape: bf16[8,768], index: 0, kind: input, shape index: {}]   ;;  %s6823_s1 = inlined_call_operand.hbm [shape: bf16[768,768], index: 1, kind: input, shape index: {}]   ;;  %s6824_s2 = inlined_call_operand.hbm [shape: f32[1,768], index: 2, kind: input, shape index: {}]   ;;  %s6825_s3 = inlined_call_operand.vmem [shape: s32[8,1], index: 3, kind: input, shape index: {}]   ;;  %s6826_s4 = inlined_call_operand.hbm [shape: s32[1,8], index: 4, kind: input, shape index: {}]   ;;  %s6827_s5 = inlined_call_operand.hbm [shape: f32[768,512], index: 5, kind: input, shape index: {}]   ;;  %s6828_s6 = inlined_call_operand.hbm [shape: f32[1,512], index: 6, kind: input, shape index: {}]   ;;  %s6829_s7 = inlined_call_operand.hbm [shape: f32[512,128], index: 7, kind: input, shape index: {}]   ;;  %s6830_s8 = inlined_call_operand.hbm [shape: f32[1,128], index: 8, kind: input, shape index: {}]   ;;  %s6831_s9 = inlined_call_operand.hbm [shape: f32[768,128], index: 9, kind: input, shape index: {}]   ;;  %s6832_s10 = inlined_call_operand.hbm [shape: f32[128,128], index: 10, kind: input, shape index: {}]   ;;  %s6833_s11 = inlined_call_operand.hbm [shape: f32[1,128], index: 11, kind: input, shape index: {}]   ;;  %s6834_s12 = inlined_call_operand.hbm [shape: f32[8,768], index: 12, kind: output, shape index: {0}]   ;;  %s6835_s13 = inlined_call_operand.hbm [shape: f32[8,128], index: 13, kind: output, shape index: {1}]   ;;  %s6836_s14 = inlined_call_operand.hbm [shape: f32[8,896], index: 14, kind: output, shape index: {2}]   ;;  %s6837_s15 = inlined_call_operand.hbm [shape: f32[8,8], index: 15, kind: output, shape index: {3}]  }
   0x1   :  { %6839 = sst [smem:[#allocation35_spill]] %s6836_s14 }
   0x2   :  { %21 = vsyncpa [#allocation3], 0 }
   0x3   :  { %22 = vsyncpa [#allocation6], 0 }
   0x4   :  { %23 = vsyncpa [#allocation9], 0 }
   0x5   :  { %24 = vsyncpa [#allocation12], 0 }
   0x6   :  { %25 = vsyncpa [#allocation15], 0 }
   0x7   :  { %26 = vsyncpa [#allocation18], 0 }
   0x8   :  { %27 = vsyncpa [#allocation4], 0 }
   0x9   :  { %28 = vsyncpa [#allocation22], 0 }
   0xa   :  { %29 = vsyncpa [#allocation25], 0  ;;  %s6326_s18 = smov [#allocation5]   ;;  %s5978_s22 = scalar_lea.hbm %s6823_s1, 36864 }
   0xb   :  { %s45_s19 = sshll.u32 %s6326_s18, 4  ;;  %p5979_p0 = scmp.ne.s32.totalorder %s6823_s1, %s5978_s22  ;;  %s46_s19 = int_to_ptr.vmem [resolvable:$true] %s45_s19 }
   0xc   :  { %p5982_p1 = scmp.lt.u32.totalorder %s5978_s22, %s6823_s1 }
   0xe   :  { %p5984_p2 = pnand %p5982_p1, %p5979_p0 }
  0x10   :  { %5987 = shalt.err (!%p5984_p2)
}
  0x11   :  { %s5988_s27 = scalar_lea.vmem %s46_s19, 36864  ;;  %p5993_p4 = scmp.lt.s32.totalorder %s46_s19, %s46_s19 }
  0x12   :  { %p5989_p3 = scmp.ne.s32.totalorder %s46_s19, %s5988_s27  ;;  %p5994_p5 = scmp.lt.s32.totalorder %s5988_s27, %s5988_s27 }
  0x14   :  { %p5995_p6 = por %p5994_p5, %p5993_p4 }
  0x16   :  { %p5996_p7 = pnand %p5995_p6, %p5989_p3 }
  0x18   :  { %5999 = shalt.err (!%p5996_p7)
}
  0x19   :  { %s6327_s28 = smov 384   ;;  %s6328_s29 = smov 24  }
  0x1a   :  { %51 = dma.hbm_to_vmem [thread:$0]  %s6823_s1, 36864, %s46_s19, [#allocation6], %s6327_s28, %s6327_s28, %s6328_s29  }
  0x1b   :  { %s6329_s17 = smov [#allocation8]   ;;  %s6330_s20 = smov [#allocation11]  }
  0x1c   :  { %s70_s18 = sshll.u32 %s6329_s17, 4  ;;  %s92_s21 = sshll.u32 %s6330_s20, 4  ;;  %s71_s18 = int_to_ptr.vmem [resolvable:$true] %s70_s18  ;;  %s93_s21 = int_to_ptr.vmem [resolvable:$true] %s92_s21 }
  0x1d   :  { %s6000_s24 = scalar_lea.hbm %s6826_s4, 16 }
  0x1e   :  { %p6001_p8 = scmp.ne.s32.totalorder %s6826_s4, %s6000_s24  ;;  %p6004_p9 = scmp.lt.u32.totalorder %s6000_s24, %s6826_s4 }
  0x20   :  { %p6006_p10 = pnand %p6004_p9, %p6001_p8 }
  0x22   :  { %6009 = shalt.err (!%p6006_p10)
}
  0x23   :  { %s6010_s1 = scalar_lea.vmem %s71_s18, 16  ;;  %s6014_s19 = scalar_lea.vmem %s71_s18, 32 }
  0x24   :  { %p6011_p11 = scmp.ne.s32.totalorder %s71_s18, %s6010_s1  ;;  %p6015_p12 = scmp.lt.s32.totalorder %s71_s18, %s71_s18 }
  0x25   :  { %p6016_p13 = scmp.lt.s32.totalorder %s6014_s19, %s6010_s1 }
  0x27   :  { %p6017_p0 = por %p6016_p13, %p6015_p12 }
  0x29   :  { %p6018_p1 = pnand %p6017_p0, %p6011_p11 }
  0x2b   :  { %6021 = shalt.err (!%p6018_p1)
}
  0x2c   :  { %73 = dma.hbm_to_vmem [thread:$0]  %s6826_s4, 16, %s71_s18, [#allocation9]  }
  0x2d   :  { %s6022_s14 = scalar_lea.hbm %s6828_s6, 64 }
  0x2e   :  { %p6023_p2 = scmp.ne.s32.totalorder %s6828_s6, %s6022_s14  ;;  %p6026_p3 = scmp.lt.u32.totalorder %s6022_s14, %s6828_s6 }
  0x30   :  { %p6028_p4 = pnand %p6026_p3, %p6023_p2 }
  0x32   :  { %6031 = shalt.err (!%p6028_p4)
}
  0x33   :  { %s6032_s24 = scalar_lea.vmem %s93_s21, 64  ;;  %p6037_p6 = scmp.lt.s32.totalorder %s93_s21, %s93_s21 }
  0x34   :  { %p6033_p5 = scmp.ne.s32.totalorder %s93_s21, %s6032_s24  ;;  %p6038_p7 = scmp.lt.s32.totalorder %s6032_s24, %s6032_s24 }
  0x36   :  { %p6039_p8 = por %p6038_p7, %p6037_p6 }
  0x38   :  { %p6040_p9 = pnand %p6039_p8, %p6033_p5 }
  0x3a   :  { %6043 = shalt.err (!%p6040_p9)
}
  0x3b   :  { %95 = dma.hbm_to_vmem [thread:$0]  %s6828_s6, 64, %s93_s21, [#allocation12]  }
  0x3c   :  { %s6331_s25 = smov [#allocation14]   ;;  %s6044_s19 = scalar_lea.hbm %s6830_s8, 16 }
  0x3d   :  { %s114_s26 = sshll.u32 %s6331_s25, 4  ;;  %p6045_p10 = scmp.ne.s32.totalorder %s6830_s8, %s6044_s19  ;;  %s115_s26 = int_to_ptr.vmem [resolvable:$true] %s114_s26 }
  0x3e   :  { %p6048_p11 = scmp.lt.u32.totalorder %s6044_s19, %s6830_s8 }
  0x40   :  { %p6050_p12 = pnand %p6048_p11, %p6045_p10 }
  0x42   :  { %6053 = shalt.err (!%p6050_p12)
}
  0x43   :  { %s6054_s14 = scalar_lea.vmem %s115_s26, 16  ;;  %s6058_s6 = scalar_lea.vmem %s115_s26, 32 }
  0x44   :  { %p6055_p13 = scmp.ne.s32.totalorder %s115_s26, %s6054_s14  ;;  %p6059_p0 = scmp.lt.s32.totalorder %s115_s26, %s115_s26 }
  0x45   :  { %p6060_p1 = scmp.lt.s32.totalorder %s6058_s6, %s6054_s14 }
  0x47   :  { %p6061_p2 = por %p6060_p1, %p6059_p0 }
  0x49   :  { %p6062_p3 = pnand %p6061_p2, %p6055_p13 }
  0x4b   :  { %6065 = shalt.err (!%p6062_p3)
}
  0x4c   :  { %117 = dma.hbm_to_vmem [thread:$0]  %s6830_s8, 16, %s115_s26, [#allocation15]  }
  0x4d   :  { %s6332_s20 = smov [#allocation17]   ;;  %s6333_s23 = smov [#allocation2]  }
  0x4e   :  { %s135_s22 = sshll.u32 %s6332_s20, 4  ;;  %s36_s24 = sshll.u32 %s6333_s23, 4  ;;  %s136_s22 = int_to_ptr.vmem [resolvable:$true] %s135_s22  ;;  %s37_s24 = int_to_ptr.vmem [resolvable:$true] %s36_s24 }
  0x4f   :  { %s6066_s25 = scalar_lea.hbm %s6832_s10, 2048 }
  0x50   :  { %p6067_p4 = scmp.ne.s32.totalorder %s6832_s10, %s6066_s25  ;;  %p6070_p5 = scmp.lt.u32.totalorder %s6066_s25, %s6832_s10 }
  0x52   :  { %p6072_p6 = pnand %p6070_p5, %p6067_p4 }
  0x54   :  { %6075 = shalt.err (!%p6072_p6)
}
  0x55   :  { %s6076_s8 = scalar_lea.vmem %s136_s22, 2048  ;;  %p6081_p8 = scmp.lt.s32.totalorder %s136_s22, %s136_s22 }
  0x56   :  { %p6077_p7 = scmp.ne.s32.totalorder %s136_s22, %s6076_s8  ;;  %p6082_p9 = scmp.lt.s32.totalorder %s6076_s8, %s6076_s8 }
  0x58   :  { %p6083_p10 = por %p6082_p9, %p6081_p8 }
  0x5a   :  { %p6084_p11 = pnand %p6083_p10, %p6077_p7 }
  0x5c   :  { %6087 = shalt.err (!%p6084_p11)
}
  0x5d   :  { %s6334_s26 = smov 128   ;;  %s6335_s29 = smov 8  }
  0x5e   :  { %141 = dma.hbm_to_vmem [thread:$0]  %s6832_s10, 2048, %s136_s22, [#allocation18], %s6334_s26, %s6334_s26, %s6335_s29  }
  0x5f   :  { %s6088_s21 = scalar_lea.hbm %s6822_s0, 384 }
  0x60   :  { %p6089_p12 = scmp.ne.s32.totalorder %s6822_s0, %s6088_s21  ;;  %p6092_p13 = scmp.lt.u32.totalorder %s6088_s21, %s6822_s0 }
  0x62   :  { %p6094_p0 = pnand %p6092_p13, %p6089_p12 }
  0x64   :  { %6097 = shalt.err (!%p6094_p0)
}
  0x65   :  { %s6098_s18 = scalar_lea.vmem %s37_s24, 384  ;;  %p6103_p2 = scmp.lt.s32.totalorder %s37_s24, %s37_s24 }
  0x66   :  { %p6099_p1 = scmp.ne.s32.totalorder %s37_s24, %s6098_s18  ;;  %p6104_p3 = scmp.lt.s32.totalorder %s6098_s18, %s6098_s18 }
  0x68   :  { %p6105_p4 = por %p6104_p3, %p6103_p2 }
  0x6a   :  { %p6106_p5 = pnand %p6105_p4, %p6099_p1 }
  0x6c   :  { %6109 = shalt.err (!%p6106_p5)
}
  0x6d   :  { %39 = dma.hbm_to_vmem [thread:$0]  %s6822_s0, 384, %s37_s24, [#allocation3]  }
  0x6e   :  { %s6336_s25 = smov [#allocation7]   ;;  %s6337_s1 = smov [#allocation10]  }
  0x6f   :  { %s58_s27 = sshll.u32 %s6336_s25, 4  ;;  %s79_s19 = sshll.u32 %s6337_s1, 4  ;;  %s59_s27 = int_to_ptr.vmem [resolvable:$true] %s58_s27  ;;  %s6507_s19 = int_to_ptr.vmem [resolvable:$true] %s79_s19 }
  0x70   :  { %s6110_s30 = scalar_lea.hbm %s6824_s2, 96 }
  0x71   :  { %p6111_p6 = scmp.ne.s32.totalorder %s6824_s2, %s6110_s30  ;;  %p6114_p7 = scmp.lt.u32.totalorder %s6110_s30, %s6824_s2 }
  0x73   :  { %p6116_p8 = pnand %p6114_p7, %p6111_p6 }
  0x75   :  { %6119 = shalt.err (!%p6116_p8)
}
  0x76   :  { %s6120_s0 = scalar_lea.vmem %s59_s27, 96  ;;  %p6125_p10 = scmp.lt.s32.totalorder %s59_s27, %s59_s27 }
  0x77   :  { %p6121_p9 = scmp.ne.s32.totalorder %s59_s27, %s6120_s0  ;;  %p6126_p11 = scmp.lt.s32.totalorder %s6120_s0, %s6120_s0 }
  0x79   :  { %p6127_p12 = por %p6126_p11, %p6125_p10 }
  0x7b   :  { %p6128_p13 = pnand %p6127_p12, %p6121_p9 }
  0x7d   :  { %6131 = shalt.err (!%p6128_p13)
}
  0x7e   :  { %61 = dma.hbm_to_vmem [thread:$0]  %s6824_s2, 96, %s59_s27, [#allocation6]  }
  0x7f   :  { %s6132_s4 = scalar_lea.hbm %s6827_s5, 49152 }
  0x80   :  { %p6133_p0 = scmp.ne.s32.totalorder %s6827_s5, %s6132_s4  ;;  %p6136_p1 = scmp.lt.u32.totalorder %s6132_s4, %s6827_s5 }
  0x82   :  { %p6138_p2 = pnand %p6136_p1, %p6133_p0 }
  0x84   :  { %6141 = shalt.err (!%p6138_p2)
}
  0x85   :  { %s6142_s1 = scalar_lea.vmem %s6507_s19, 49152  ;;  %p6147_p4 = scmp.lt.s32.totalorder %s6507_s19, %s6507_s19 }
  0x86   :  { %p6143_p3 = scmp.ne.s32.totalorder %s6507_s19, %s6142_s1  ;;  %p6148_p5 = scmp.lt.s32.totalorder %s6142_s1, %s6142_s1 }
  0x88   :  { %p6149_p6 = por %p6148_p5, %p6147_p4 }
  0x8a   :  { %p6150_p7 = pnand %p6149_p6, %p6143_p3 }
  0x8c   :  { %6153 = shalt.err (!%p6150_p7)
}
  0x8d   :  { %s6338_s2 = smov 512   ;;  %s6339_s27 = smov 32  }
  0x8e   :  { %85 = dma.hbm_to_vmem [thread:$0]  %s6827_s5, 49152, %s6507_s19, [#allocation9], %s6338_s2, %s6338_s2, %s6339_s27  }
  0x8f   :  { %s6340_s30 = smov [#allocation13]   ;;  %s6341_s14 = smov [#allocation16]  }
  0x90   :  { %s101_s16 = sshll.u32 %s6340_s30, 4  ;;  %s123_s6 = sshll.u32 %s6341_s14, 4  ;;  %s102_s16 = int_to_ptr.vmem [resolvable:$true] %s101_s16  ;;  %s6538_s6 = int_to_ptr.vmem [resolvable:$true] %s123_s6 }
  0x91   :  { %s6154_s24 = scalar_lea.hbm %s6829_s7, 8192 }
  0x92   :  { %p6155_p8 = scmp.ne.s32.totalorder %s6829_s7, %s6154_s24  ;;  %p6158_p9 = scmp.lt.u32.totalorder %s6154_s24, %s6829_s7 }
  0x94   :  { %p6160_p10 = pnand %p6158_p9, %p6155_p8 }
  0x96   :  { %6163 = shalt.err (!%p6160_p10)
}
  0x97   :  { %s6164_s5 = scalar_lea.vmem %s102_s16, 8192  ;;  %p6169_p12 = scmp.lt.s32.totalorder %s102_s16, %s102_s16 }
  0x98   :  { %p6165_p11 = scmp.ne.s32.totalorder %s102_s16, %s6164_s5  ;;  %p6170_p13 = scmp.lt.s32.totalorder %s6164_s5, %s6164_s5 }
  0x9a   :  { %p6171_p0 = por %p6170_p13, %p6169_p12 }
  0x9c   :  { %p6172_p1 = pnand %p6171_p0, %p6165_p11 }
  0x9e   :  { %6175 = shalt.err (!%p6172_p1)
}
  0x9f   :  { %107 = dma.hbm_to_vmem [thread:$0]  %s6829_s7, 8192, %s102_s16, [#allocation12], %s6334_s26, %s6334_s26, %s6335_s29  }
  0xa0   :  { %s6176_s25 = scalar_lea.hbm %s6831_s9, 12288 }
  0xa1   :  { %p6177_p2 = scmp.ne.s32.totalorder %s6831_s9, %s6176_s25  ;;  %p6180_p3 = scmp.lt.u32.totalorder %s6176_s25, %s6831_s9 }
  0xa3   :  { %p6182_p4 = pnand %p6180_p3, %p6177_p2 }
  0xa5   :  { %6185 = shalt.err (!%p6182_p4)
}
  0xa6   :  { %s6186_s8 = scalar_lea.vmem %s6538_s6, 12288  ;;  %p6191_p6 = scmp.lt.s32.totalorder %s6538_s6, %s6538_s6 }
  0xa7   :  { %p6187_p5 = scmp.ne.s32.totalorder %s6538_s6, %s6186_s8  ;;  %p6192_p7 = scmp.lt.s32.totalorder %s6186_s8, %s6186_s8 }
  0xa9   :  { %p6193_p8 = por %p6192_p7, %p6191_p6 }
  0xab   :  { %p6194_p9 = pnand %p6193_p8, %p6187_p5 }
  0xad   :  { %6197 = shalt.err (!%p6194_p9)
}
  0xae   :  { %129 = dma.hbm_to_vmem [thread:$0]  %s6831_s9, 12288, %s6538_s6, [#allocation15], %s6334_s26, %s6334_s26, %s6335_s29  }
  0xaf   :  { %s6342_s16 = smov [#allocation19]   ;;  %s6198_s24 = scalar_lea.hbm %s6833_s11, 16 }
  0xb0   :  { %s148_s14 = sshll.u32 %s6342_s16, 4  ;;  %p6199_p10 = scmp.ne.s32.totalorder %s6833_s11, %s6198_s24  ;;  %s149_s14 = int_to_ptr.vmem [resolvable:$true] %s148_s14 }
  0xb1   :  { %p6202_p11 = scmp.lt.u32.totalorder %s6198_s24, %s6833_s11 }
  0xb3   :  { %p6204_p12 = pnand %p6202_p11, %p6199_p10 }
  0xb5   :  { %6207 = shalt.err (!%p6204_p12)
}
  0xb6   :  { %s6208_s5 = scalar_lea.vmem %s149_s14, 16  ;;  %s6212_s9 = scalar_lea.vmem %s149_s14, 32 }
  0xb7   :  { %p6209_p13 = scmp.ne.s32.totalorder %s149_s14, %s6208_s5  ;;  %p6213_p0 = scmp.lt.s32.totalorder %s149_s14, %s149_s14 }
  0xb8   :  { %p6214_p1 = scmp.lt.s32.totalorder %s6212_s9, %s6208_s5 }
  0xba   :  { %p6215_p2 = por %p6214_p1, %p6213_p0 }
  0xbc   :  { %p6216_p3 = pnand %p6215_p2, %p6209_p13 }
  0xbe   :  { %6219 = shalt.err (!%p6216_p3)
}
  0xbf   :  { %151 = dma.hbm_to_vmem [thread:$0]  %s6833_s11, 16, %s149_s14, [#allocation18]  }
  0xc0   :  { %6308 = dma.done.wait [#allocation3], 384  }
  0xc1   :  { %6309 = vsyncadd [#allocation3], 4294966912 }
  0xc2   :  { %6310 = dma.done.wait [#allocation6], 36960  }
  0xc3   :  { %6311 = vsyncadd [#allocation6], 4294930336 }
  0xc4   :  { %6312 = dma.done.wait [#allocation9], 49168  }
  0xc5   :  { %6313 = vsyncadd [#allocation9], 4294918128 }
  0xc6   :  { %6314 = dma.done.wait [#allocation12], 8256  }
  0xc7   :  { %6315 = vsyncadd [#allocation12], 4294959040 }
  0xc8   :  { %6316 = dma.done.wait [#allocation15], 12304  }
  0xc9   :  { %6317 = vsyncadd [#allocation15], 4294954992 }
  0xca   :  { %6318 = dma.done.wait [#allocation18], 2064  }
  0xcb   :  { %6319 = vsyncadd [#allocation18], 4294965232  ;;  %v5525_v0 = vld [vmem:[#allocation5 + $0x4] ss:$24 sps:$4 sm:$0xff]   ;;  %v5529_v2 = vld [vmem:[#allocation5] ss:$24 sps:$4 sm:$0xff]  }
  0xcc   :  { %v5527_v1 = vld [vmem:[#allocation5 + $0x304] ss:$24 sps:$4 sm:$0xff]   ;;  %1985 = vmatprep.subr.bf16.mxu0 %v5525_v0  ;;  %v5530_v3 = vld [vmem:[#allocation5 + $0x300] ss:$24 sps:$4 sm:$0xff]   ;;  %v5531_v4 = vld [vmem:[#allocation5 + $0x34] ss:$24 sps:$4 sm:$0xff]  }
  0xcd   :  { %2026 = vmatprep.subr.bf16.mxu1 %v5527_v1  ;;  %1986 = vmatpush1.bf16.msra.mxu0 %v5529_v2  ;;  %v5533_v5 = vld [vmem:[#allocation5 + $0x334] ss:$24 sps:$4 sm:$0xff]   ;;  %v5535_v6 = vld [vmem:[#allocation5 + $0x30] ss:$24 sps:$4 sm:$0xff]   ;;  %v5537_v8 = vld [vmem:[#allocation5 + $0x64] ss:$24 sps:$4 sm:$0xff]  }
  0xce   :  { %2027 = vmatpush1.bf16.msra.mxu1 %v5530_v3  ;;  %1987 = vmatprep.subr.bf16.mxu0 %v5531_v4  ;;  %v5536_v7 = vld [vmem:[#allocation5 + $0x330] ss:$24 sps:$4 sm:$0xff]   ;;  %v5539_v9 = vld [vmem:[#allocation5 + $0x364] ss:$24 sps:$4 sm:$0xff]   ;;  %v5541_v10 = vld [vmem:[#allocation5 + $0x60] ss:$24 sps:$4 sm:$0xff]  }
  0xcf   :  { %2028 = vmatprep.subr.bf16.mxu1 %v5533_v5  ;;  %v5542_v11 = vld [vmem:[#allocation5 + $0x360] ss:$24 sps:$4 sm:$0xff]   ;;  %v5543_v12 = vld [vmem:[#allocation5 + $0x94] ss:$24 sps:$4 sm:$0xff]   ;;  %v5547_v14 = vld [vmem:[#allocation5 + $0x90] ss:$24 sps:$4 sm:$0xff]  }
  0xd0   :  { %v5545_v13 = vld [vmem:[#allocation5 + $0x394] ss:$24 sps:$4 sm:$0xff]   ;;  %v5548_v15 = vld [vmem:[#allocation5 + $0x390] ss:$24 sps:$4 sm:$0xff]   ;;  %v5549_v16 = vld [vmem:[#allocation5 + $0xc4] ss:$24 sps:$4 sm:$0xff]  }
  0xd1   :  { %1988 = vmatpush1.bf16.msra.mxu0 %v5535_v6  ;;  %v5551_v17 = vld [vmem:[#allocation5 + $0x3c4] ss:$24 sps:$4 sm:$0xff]   ;;  %v5553_v18 = vld [vmem:[#allocation5 + $0xc0] ss:$24 sps:$4 sm:$0xff]   ;;  %v5555_v20 = vld [vmem:[#allocation5 + $0xf4] ss:$24 sps:$4 sm:$0xff]  }
  0xd2   :  { %2029 = vmatpush1.bf16.msra.mxu1 %v5536_v7  ;;  %1989 = vmatprep.subr.bf16.mxu0 %v5537_v8  ;;  %v5554_v19 = vld [vmem:[#allocation5 + $0x3c0] ss:$24 sps:$4 sm:$0xff]   ;;  %v5557_v21 = vld [vmem:[#allocation5 + $0x3f4] ss:$24 sps:$4 sm:$0xff]   ;;  %v5559_v22 = vld [vmem:[#allocation5 + $0xf0] ss:$24 sps:$4 sm:$0xff]  }
  0xd3   :  { %2030 = vmatprep.subr.bf16.mxu1 %v5539_v9  ;;  %v5560_v23 = vld [vmem:[#allocation5 + $0x3f0] ss:$24 sps:$4 sm:$0xff]   ;;  %v5561_v24 = vld [vmem:[#allocation5 + $0x124] ss:$24 sps:$4 sm:$0xff]   ;;  %v5565_v26 = vld [vmem:[#allocation5 + $0x120] ss:$24 sps:$4 sm:$0xff]  }
  0xd4   :  { %v5563_v25 = vld [vmem:[#allocation5 + $0x424] ss:$24 sps:$4 sm:$0xff]   ;;  %v5566_v27 = vld [vmem:[#allocation5 + $0x420] ss:$24 sps:$4 sm:$0xff]   ;;  %v5567_v28 = vld [vmem:[#allocation5 + $0x154] ss:$24 sps:$4 sm:$0xff]  }
  0xd5   :  { %1990 = vmatpush1.bf16.msra.mxu0 %v5541_v10  ;;  %v5569_v29 = vld [vmem:[#allocation5 + $0x454] ss:$24 sps:$4 sm:$0xff]   ;;  %v5571_v30 = vld [vmem:[#allocation5 + $0x150] ss:$24 sps:$4 sm:$0xff]   ;;  %v5573_v32 = vld [vmem:[#allocation5 + $0x184] ss:$24 sps:$4 sm:$0xff]  }
  0xd6   :  { %2031 = vmatpush1.bf16.msra.mxu1 %v5542_v11  ;;  %1991 = vmatprep.subr.bf16.mxu0 %v5543_v12  ;;  %v5572_v31 = vld [vmem:[#allocation5 + $0x450] ss:$24 sps:$4 sm:$0xff]   ;;  %v5575_v33 = vld [vmem:[#allocation5 + $0x484] ss:$24 sps:$4 sm:$0xff]   ;;  %v5577_v34 = vld [vmem:[#allocation5 + $0x180] ss:$24 sps:$4 sm:$0xff]  }
  0xd7   :  { %2032 = vmatprep.subr.bf16.mxu1 %v5545_v13  ;;  %v5578_v35 = vld [vmem:[#allocation5 + $0x480] ss:$24 sps:$4 sm:$0xff]   ;;  %v5579_v36 = vld [vmem:[#allocation5 + $0x1b4] ss:$24 sps:$4 sm:$0xff]   ;;  %v5583_v38 = vld [vmem:[#allocation5 + $0x1b0] ss:$24 sps:$4 sm:$0xff]  }
  0xd8   :  { %v5581_v37 = vld [vmem:[#allocation5 + $0x4b4] ss:$24 sps:$4 sm:$0xff]   ;;  %v5584_v39 = vld [vmem:[#allocation5 + $0x4b0] ss:$24 sps:$4 sm:$0xff]   ;;  %v5585_v40 = vld [vmem:[#allocation5 + $0x1e4] ss:$24 sps:$4 sm:$0xff]  }
  0xd9   :  { %1992 = vmatpush1.bf16.msra.mxu0 %v5547_v14  ;;  %v5587_v41 = vld [vmem:[#allocation5 + $0x4e4] ss:$24 sps:$4 sm:$0xff]   ;;  %v5589_v42 = vld [vmem:[#allocation5 + $0x1e0] ss:$24 sps:$4 sm:$0xff]   ;;  %v5591_v44 = vld [vmem:[#allocation5 + $0x214] ss:$24 sps:$4 sm:$0xff]  }
  0xda   :  { %2033 = vmatpush1.bf16.msra.mxu1 %v5548_v15  ;;  %1993 = vmatprep.subr.bf16.mxu0 %v5549_v16  ;;  %v5590_v43 = vld [vmem:[#allocation5 + $0x4e0] ss:$24 sps:$4 sm:$0xff]   ;;  %v5593_v45 = vld [vmem:[#allocation5 + $0x514] ss:$24 sps:$4 sm:$0xff]   ;;  %v5595_v49 = vld [vmem:[#allocation5 + $0x210] ss:$24 sps:$4 sm:$0xff]  }
  0xdb   :  { %2034 = vmatprep.subr.bf16.mxu1 %v5551_v17  ;;  %v233_v46 = vld [vmem:[#allocation2] sm:$0xff]  ;;  %v234_v48 = vld [vmem:[#allocation2 + $0x8] sm:$0xff]  ;;  %v5597_v52 = vld [vmem:[#allocation5 + $0x244] ss:$24 sps:$4 sm:$0xff]   ;;  %vm6344_vm2 = vmmov 1   ;;  %vm3162_vm4 = vcmask 64512  }
  0xdc   :  { %v6587_v47 = vcombine.high %v233_v46, %v233_v46  ;;  %v5596_v50 = vld [vmem:[#allocation5 + $0x510] ss:$24 sps:$4 sm:$0xff]   ;;  %v6589_v51 = vcombine.high %v234_v48, %v234_v48  ;;  %v5599_v53 = vld [vmem:[#allocation5 + $0x544] ss:$24 sps:$4 sm:$0xff]   ;;  %v5601_v54 = vld [vmem:[#allocation5 + $0x240] ss:$24 sps:$4 sm:$0xff]   ;;  %v6593_v6 = vcombine.low %v233_v46, %v233_v46  ;;  %v6595_v7 = vcombine.low %v234_v48, %v234_v48 }
  0xdd   :  { %1994 = vmatpush1.bf16.msra.mxu0 %v5553_v18  ;;  %v5602_v55 = vld [vmem:[#allocation5 + $0x540] ss:$24 sps:$4 sm:$0xff]   ;;  %v5603_v56 = vld [vmem:[#allocation5 + $0x274] ss:$24 sps:$4 sm:$0xff]   ;;  %v5607_v58 = vld [vmem:[#allocation5 + $0x270] ss:$24 sps:$4 sm:$0xff]  }
  0xde   :  { %2035 = vmatpush1.bf16.msra.mxu1 %v5554_v19  ;;  %1995 = vmatprep.subr.bf16.mxu0 %v5555_v20  ;;  %v5605_v57 = vld [vmem:[#allocation5 + $0x574] ss:$24 sps:$4 sm:$0xff]   ;;  %v5608_v59 = vld [vmem:[#allocation5 + $0x570] ss:$24 sps:$4 sm:$0xff]   ;;  %v5609_v60 = vld [vmem:[#allocation5 + $0x2a4] ss:$24 sps:$4 sm:$0xff]  }
  0xdf   :  { %2036 = vmatprep.subr.bf16.mxu1 %v5557_v21  ;;  %2017 = vmatprep.mubr.bf16.mxu0 %v6587_v47  ;;  %v5611_v61 = vld [vmem:[#allocation5 + $0x5a4] ss:$24 sps:$4 sm:$0xff]   ;;  %v5613_v62 = vld [vmem:[#allocation5 + $0x2a0] ss:$24 sps:$4 sm:$0xff]   ;;  %v5615_v0 = vld [vmem:[#allocation5 + $0x2d4] ss:$24 sps:$4 sm:$0xff]  }
  0xe0   :  { %2058 = vmatprep.mubr.bf16.mxu1 %v6589_v51  ;;  %v5614_v63 = vld [vmem:[#allocation5 + $0x5a0] ss:$24 sps:$4 sm:$0xff]   ;;  %v5617_v1 = vld [vmem:[#allocation5 + $0x5d4] ss:$24 sps:$4 sm:$0xff]   ;;  %v5619_v2 = vld [vmem:[#allocation5 + $0x2d0] ss:$24 sps:$4 sm:$0xff]  }
  0xe1   :  { %1996 = vmatpush1.bf16.msra.mxu0 %v5559_v22  ;;  %v5620_v3 = vld [vmem:[#allocation5 + $0x5d0] ss:$24 sps:$4 sm:$0xff]   ;;  %v5627_v4 = vld [vmem:[#allocation5 + $0x604] ss:$24 sps:$4 sm:$0xff]   ;;  %v5625_v8 = vld [vmem:[#allocation5 + $0x600] ss:$24 sps:$4 sm:$0xff]  }
  0xe2   :  { %2037 = vmatpush1.bf16.msra.mxu1 %v5560_v23  ;;  %1997 = vmatprep.subr.bf16.mxu0 %v5561_v24  ;;  %v5630_v5 = vld [vmem:[#allocation5 + $0xc] ss:$24 sps:$4 sm:$0xff]   ;;  %v5628_v9 = vld [vmem:[#allocation5 + $0x8] ss:$24 sps:$4 sm:$0xff]   ;;  %v5636_v11 = vld [vmem:[#allocation5 + $0x3c] ss:$24 sps:$4 sm:$0xff]  }
  0xe3   :  { %2038 = vmatprep.subr.bf16.mxu1 %v5563_v25  ;;  %v5633_v10 = vld [vmem:[#allocation5 + $0x634] ss:$24 sps:$4 sm:$0xff]   ;;  %v5631_v12 = vld [vmem:[#allocation5 + $0x630] ss:$24 sps:$4 sm:$0xff]   ;;  %v5639_v14 = vld [vmem:[#allocation5 + $0x664] ss:$24 sps:$4 sm:$0xff]  }
  0xe4   :  { %v5634_v13 = vld [vmem:[#allocation5 + $0x38] ss:$24 sps:$4 sm:$0xff]   ;;  %v5642_v15 = vld [vmem:[#allocation5 + $0x6c] ss:$24 sps:$4 sm:$0xff]   ;;  %v5640_v17 = vld [vmem:[#allocation5 + $0x68] ss:$24 sps:$4 sm:$0xff]  }
  0xe5   :  { %1998 = vmatpush1.bf16.msra.mxu0 %v5565_v26  ;;  %v5637_v16 = vld [vmem:[#allocation5 + $0x660] ss:$24 sps:$4 sm:$0xff]   ;;  %v5645_v18 = vld [vmem:[#allocation5 + $0x694] ss:$24 sps:$4 sm:$0xff]   ;;  %v5643_v20 = vld [vmem:[#allocation5 + $0x690] ss:$24 sps:$4 sm:$0xff]  }
  0xe6   :  { %2039 = vmatpush1.bf16.msra.mxu1 %v5566_v27  ;;  %1999 = vmatprep.subr.bf16.mxu0 %v5567_v28  ;;  %v5648_v19 = vld [vmem:[#allocation5 + $0x9c] ss:$24 sps:$4 sm:$0xff]   ;;  %v5646_v21 = vld [vmem:[#allocation5 + $0x98] ss:$24 sps:$4 sm:$0xff]   ;;  %v5654_v23 = vld [vmem:[#allocation5 + $0xcc] ss:$24 sps:$4 sm:$0xff]  }
  0xe7   :  { %2040 = vmatprep.subr.bf16.mxu1 %v5569_v29  ;;  %v5651_v22 = vld [vmem:[#allocation5 + $0x6c4] ss:$24 sps:$4 sm:$0xff]   ;;  %v5649_v24 = vld [vmem:[#allocation5 + $0x6c0] ss:$24 sps:$4 sm:$0xff]   ;;  %v5657_v26 = vld [vmem:[#allocation5 + $0x6f4] ss:$24 sps:$4 sm:$0xff]  }
  0xe8   :  { %v5652_v25 = vld [vmem:[#allocation5 + $0xc8] ss:$24 sps:$4 sm:$0xff]   ;;  %v5660_v27 = vld [vmem:[#allocation5 + $0xfc] ss:$24 sps:$4 sm:$0xff]   ;;  %v5658_v29 = vld [vmem:[#allocation5 + $0xf8] ss:$24 sps:$4 sm:$0xff]  }
  0xe9   :  { %2000 = vmatpush1.bf16.msra.mxu0 %v5571_v30  ;;  %v5655_v28 = vld [vmem:[#allocation5 + $0x6f0] ss:$24 sps:$4 sm:$0xff]   ;;  %v5663_v30 = vld [vmem:[#allocation5 + $0x724] ss:$24 sps:$4 sm:$0xff]   ;;  %vm6346_vm10 = vmmov 0  }
  0xea   :  { %2041 = vmatpush1.bf16.msra.mxu1 %v5572_v31  ;;  %2001 = vmatprep.subr.bf16.mxu0 %v5573_v32  ;;  %v5666_v31 = vld [vmem:[#allocation5 + $0x12c] ss:$24 sps:$4 sm:$0xff]   ;;  %v6600_v32 = vld [vmem:[#allocation2 + $0x10] sm:$0xff]  ;;  %v5679_v46 = vld [vmem:[#allocation5 + $0x7b0] ss:$24 sps:$4 sm:$0xff]  }
  0xeb   :  { %2042 = vmatprep.subr.bf16.mxu1 %v5575_v33  ;;  %v5661_v33 = vld [vmem:[#allocation5 + $0x720] ss:$24 sps:$4 sm:$0xff]  }
  0xec   :  { %v5682_v48 = vld [vmem:[#allocation5 + $0x1b8] ss:$24 sps:$4 sm:$0xff]  }
  0xed   :  { %2002 = vmatpush1.bf16.msra.mxu0 %v5577_v34  ;;  %v6604_v34 = vcombine.high %v6600_v32, %v6600_v32 }
  0xee   :  { %2043 = vmatpush1.bf16.msra.mxu1 %v5578_v35  ;;  %2003 = vmatprep.subr.bf16.mxu0 %v5579_v36  ;;  %v5664_v35 = vld [vmem:[#allocation5 + $0x128] ss:$24 sps:$4 sm:$0xff]   ;;  %v5669_v36 = vld [vmem:[#allocation5 + $0x754] ss:$24 sps:$4 sm:$0xff]  }
  0xef   :  { %2044 = vmatprep.subr.bf16.mxu1 %v5581_v37  ;;  %v5672_v37 = vld [vmem:[#allocation5 + $0x15c] ss:$24 sps:$4 sm:$0xff]  }
  0xf1   :  { %2004 = vmatpush1.bf16.msra.mxu0 %v5583_v38  ;;  %v5667_v38 = vld [vmem:[#allocation5 + $0x750] ss:$24 sps:$4 sm:$0xff]  }
  0xf2   :  { %2045 = vmatpush1.bf16.msra.mxu1 %v5584_v39  ;;  %2005 = vmatprep.subr.bf16.mxu0 %v5585_v40  ;;  %v5670_v39 = vld [vmem:[#allocation5 + $0x158] ss:$24 sps:$4 sm:$0xff]   ;;  %v5675_v40 = vld [vmem:[#allocation5 + $0x784] ss:$24 sps:$4 sm:$0xff]  }
  0xf3   :  { %2046 = vmatprep.subr.bf16.mxu1 %v5587_v41  ;;  %v5678_v41 = vld [vmem:[#allocation5 + $0x18c] ss:$24 sps:$4 sm:$0xff]  }
  0xf5   :  { %2006 = vmatpush1.bf16.msra.mxu0 %v5589_v42  ;;  %v5673_v42 = vld [vmem:[#allocation5 + $0x780] ss:$24 sps:$4 sm:$0xff]  }
  0xf6   :  { %2047 = vmatpush1.bf16.msra.mxu1 %v5590_v43  ;;  %2007 = vmatprep.subr.bf16.mxu0 %v5591_v44  ;;  %v5676_v43 = vld [vmem:[#allocation5 + $0x188] ss:$24 sps:$4 sm:$0xff]   ;;  %v5681_v44 = vld [vmem:[#allocation5 + $0x7b4] ss:$24 sps:$4 sm:$0xff]  }
  0xf7   :  { %2048 = vmatprep.subr.bf16.mxu1 %v5593_v45  ;;  %v5684_v45 = vld [vmem:[#allocation5 + $0x1bc] ss:$24 sps:$4 sm:$0xff]  }
  0xf9   :  { %2008 = vmatpush1.bf16.msra.mxu0 %v5595_v49  ;;  %v5687_v49 = vld [vmem:[#allocation5 + $0x7e4] ss:$24 sps:$4 sm:$0xff]  }
  0xfa   :  { %2049 = vmatpush1.bf16.msra.mxu1 %v5596_v50  ;;  %2009 = vmatprep.subr.bf16.mxu0 %v5597_v52  ;;  %v5690_v50 = vld [vmem:[#allocation5 + $0x1ec] ss:$24 sps:$4 sm:$0xff]   ;;  %v5685_v52 = vld [vmem:[#allocation5 + $0x7e0] ss:$24 sps:$4 sm:$0xff]  }
  0xfb   :  { %2050 = vmatprep.subr.bf16.mxu1 %v5599_v53  ;;  %v5688_v53 = vld [vmem:[#allocation5 + $0x1e8] ss:$24 sps:$4 sm:$0xff]  }
  0xfd   :  { %2010 = vmatpush1.bf16.msra.mxu0 %v5601_v54  ;;  %v5693_v54 = vld [vmem:[#allocation5 + $0x814] ss:$24 sps:$4 sm:$0xff]  }
  0xfe   :  { %2051 = vmatpush1.bf16.msra.mxu1 %v5602_v55  ;;  %2011 = vmatprep.subr.bf16.mxu0 %v5603_v56  ;;  %v5696_v55 = vld [vmem:[#allocation5 + $0x21c] ss:$24 sps:$4 sm:$0xff]   ;;  %v5691_v56 = vld [vmem:[#allocation5 + $0x810] ss:$24 sps:$4 sm:$0xff]  }
  0xff   :  { %2052 = vmatprep.subr.bf16.mxu1 %v5605_v57  ;;  %v5694_v57 = vld [vmem:[#allocation5 + $0x218] ss:$24 sps:$4 sm:$0xff]  }
 0x101   :  { %2012 = vmatpush1.bf16.msra.mxu0 %v5607_v58  ;;  %v5699_v58 = vld [vmem:[#allocation5 + $0x844] ss:$24 sps:$4 sm:$0xff]  }
 0x102   :  { %2053 = vmatpush1.bf16.msra.mxu1 %v5608_v59  ;;  %2013 = vmatprep.subr.bf16.mxu0 %v5609_v60  ;;  %v5702_v59 = vld [vmem:[#allocation5 + $0x24c] ss:$24 sps:$4 sm:$0xff]   ;;  %v5697_v60 = vld [vmem:[#allocation5 + $0x840] ss:$24 sps:$4 sm:$0xff]  }
 0x103   :  { %2054 = vmatprep.subr.bf16.mxu1 %v5611_v61  ;;  %v5700_v61 = vld [vmem:[#allocation5 + $0x248] ss:$24 sps:$4 sm:$0xff]  }
 0x105   :  { %2014 = vmatpush1.bf16.msra.mxu0 %v5613_v62  ;;  %v5705_v62 = vld [vmem:[#allocation5 + $0x874] ss:$24 sps:$4 sm:$0xff]  }
 0x106   :  { %2055 = vmatpush1.bf16.msra.mxu1 %v5614_v63  ;;  %2015 = vmatprep.subr.bf16.mxu0 %v5615_v0  ;;  %v5708_v63 = vld [vmem:[#allocation5 + $0x27c] ss:$24 sps:$4 sm:$0xff]   ;;  %v5703_v0 = vld [vmem:[#allocation5 + $0x870] ss:$24 sps:$4 sm:$0xff]  }
 0x107   :  { %2056 = vmatprep.subr.bf16.mxu1 %v5617_v1  ;;  %v5706_v1 = vld [vmem:[#allocation5 + $0x278] ss:$24 sps:$4 sm:$0xff]  }
 0x109   :  { %2016 = vmatpush1.bf16.msra.mxu0 %v5619_v2  ;;  %v5711_v2 = vld [vmem:[#allocation5 + $0x8a4] ss:$24 sps:$4 sm:$0xff]  }
 0x10a   :  { %2057 = vmatpush1.bf16.msra.mxu1 %v5620_v3  ;;  %2067 = vmatprep.subr.bf16.mxu0 %v5627_v4  ;;  %v5714_v3 = vld [vmem:[#allocation5 + $0x2ac] ss:$24 sps:$4 sm:$0xff]   ;;  %v5709_v4 = vld [vmem:[#allocation5 + $0x8a0] ss:$24 sps:$4 sm:$0xff]  }
 0x10b   :  { %2108 = vmatprep.subr.bf16.mxu1 %v5630_v5  ;;  %v5712_v5 = vld [vmem:[#allocation5 + $0x2a8] ss:$24 sps:$4 sm:$0xff]  }
 0x10c   :  { %2018 = vmatmul.mubr.bf16.vlgmr.msra.gmra.mrb[0].mxu0 %v6593_v6 }
 0x10d   :  { %2059 = vmatmul.mubr.bf16.vlgmr.msra.gmra.mrb[0].mxu1 %v6595_v7  ;;  %2068 = vmatpush1.bf16.msra.mxu0 %v5625_v8  ;;  %v5717_v8 = vld [vmem:[#allocation5 + $0x8d4] ss:$24 sps:$4 sm:$0xff]  }
 0x10e   :  { %2109 = vmatpush1.bf16.msra.mxu1 %v5628_v9  ;;  %2069 = vmatprep.subr.bf16.mxu0 %v5633_v10  ;;  %v5720_v9 = vld [vmem:[#allocation5 + $0x2dc] ss:$24 sps:$4 sm:$0xff]   ;;  %v5715_v10 = vld [vmem:[#allocation5 + $0x8d0] ss:$24 sps:$4 sm:$0xff]  }
 0x10f   :  { %2110 = vmatprep.subr.bf16.mxu1 %v5636_v11  ;;  %2140 = vmatprep.mubr.bf16.mxu1 %v6587_v47  ;;  %v5718_v11 = vld [vmem:[#allocation5 + $0x2d8] ss:$24 sps:$4 sm:$0xff]  }
 0x110   :  { %2099 = vmatprep.mubr.bf16.mxu0 %v6604_v34 }
 0x111   :  { %2070 = vmatpush1.bf16.msra.mxu0 %v5631_v12  ;;  %v5725_v12 = vld [vmem:[#allocation5 + $0x30c] ss:$24 sps:$4 sm:$0xff]  }
 0x112   :  { %2111 = vmatpush1.bf16.msra.mxu1 %v5634_v13  ;;  %2071 = vmatprep.subr.bf16.mxu0 %v5639_v14  ;;  %v5728_v13 = vld [vmem:[#allocation5 + $0x60c] ss:$24 sps:$4 sm:$0xff]   ;;  %v6609_v14 = vcombine.low %v6600_v32, %v6600_v32  ;;  %v5750_v32 = vld [vmem:[#allocation5 + $0x6c8] ss:$24 sps:$4 sm:$0xff]  }
 0x113   :  { %2112 = vmatprep.subr.bf16.mxu1 %v5642_v15  ;;  %v5723_v15 = vld [vmem:[#allocation5 + $0x308] ss:$24 sps:$4 sm:$0xff]  }
 0x115   :  { %2072 = vmatpush1.bf16.msra.mxu0 %v5637_v16  ;;  %v5726_v16 = vld [vmem:[#allocation5 + $0x608] ss:$24 sps:$4 sm:$0xff]  }
 0x116   :  { %2113 = vmatpush1.bf16.msra.mxu1 %v5640_v17  ;;  %2073 = vmatprep.subr.bf16.mxu0 %v5645_v18  ;;  %v5731_v17 = vld [vmem:[#allocation5 + $0x33c] ss:$24 sps:$4 sm:$0xff]  }
 0x117   :  { %2114 = vmatprep.subr.bf16.mxu1 %v5648_v19  ;;  %v5734_v18 = vld [vmem:[#allocation5 + $0x63c] ss:$24 sps:$4 sm:$0xff]   ;;  %v5729_v19 = vld [vmem:[#allocation5 + $0x338] ss:$24 sps:$4 sm:$0xff]  }
 0x119   :  { %2074 = vmatpush1.bf16.msra.mxu0 %v5643_v20  ;;  %v5732_v20 = vld [vmem:[#allocation5 + $0x638] ss:$24 sps:$4 sm:$0xff]  }
 0x11a   :  { %2115 = vmatpush1.bf16.msra.mxu1 %v5646_v21  ;;  %2075 = vmatprep.subr.bf16.mxu0 %v5651_v22  ;;  %v5737_v21 = vld [vmem:[#allocation5 + $0x36c] ss:$24 sps:$4 sm:$0xff]  }
 0x11b   :  { %2116 = vmatprep.subr.bf16.mxu1 %v5654_v23  ;;  %v5740_v22 = vld [vmem:[#allocation5 + $0x66c] ss:$24 sps:$4 sm:$0xff]   ;;  %v5735_v23 = vld [vmem:[#allocation5 + $0x368] ss:$24 sps:$4 sm:$0xff]  }
 0x11d   :  { %2076 = vmatpush1.bf16.msra.mxu0 %v5649_v24  ;;  %v5738_v24 = vld [vmem:[#allocation5 + $0x668] ss:$24 sps:$4 sm:$0xff]  }
 0x11e   :  { %2117 = vmatpush1.bf16.msra.mxu1 %v5652_v25  ;;  %2077 = vmatprep.subr.bf16.mxu0 %v5657_v26  ;;  %v5743_v25 = vld [vmem:[#allocation5 + $0x39c] ss:$24 sps:$4 sm:$0xff]  }
 0x11f   :  { %2118 = vmatprep.subr.bf16.mxu1 %v5660_v27  ;;  %v5746_v26 = vld [vmem:[#allocation5 + $0x69c] ss:$24 sps:$4 sm:$0xff]   ;;  %v5741_v27 = vld [vmem:[#allocation5 + $0x398] ss:$24 sps:$4 sm:$0xff]  }
 0x121   :  { %2078 = vmatpush1.bf16.msra.mxu0 %v5655_v28  ;;  %v5744_v28 = vld [vmem:[#allocation5 + $0x698] ss:$24 sps:$4 sm:$0xff]  }
 0x122   :  { %2119 = vmatpush1.bf16.msra.mxu1 %v5658_v29  ;;  %2079 = vmatprep.subr.bf16.mxu0 %v5663_v30  ;;  %v5749_v29 = vld [vmem:[#allocation5 + $0x3cc] ss:$24 sps:$4 sm:$0xff]  }
 0x123   :  { %2120 = vmatprep.subr.bf16.mxu1 %v5666_v31  ;;  %v5752_v30 = vld [vmem:[#allocation5 + $0x6cc] ss:$24 sps:$4 sm:$0xff]   ;;  %v5747_v31 = vld [vmem:[#allocation5 + $0x3c8] ss:$24 sps:$4 sm:$0xff]  }
 0x125   :  { %2080 = vmatpush1.bf16.msra.mxu0 %v5661_v33  ;;  %v5755_v33 = vld [vmem:[#allocation5 + $0x3fc] ss:$24 sps:$4 sm:$0xff]  }
 0x126   :  { %2121 = vmatpush1.bf16.msra.mxu1 %v5664_v35  ;;  %2081 = vmatprep.subr.bf16.mxu0 %v5669_v36  ;;  %v5758_v35 = vld [vmem:[#allocation5 + $0x6fc] ss:$24 sps:$4 sm:$0xff]   ;;  %v5753_v36 = vld [vmem:[#allocation5 + $0x3f8] ss:$24 sps:$4 sm:$0xff]  }
 0x127   :  { %2122 = vmatprep.subr.bf16.mxu1 %v5672_v37  ;;  %v5756_v37 = vld [vmem:[#allocation5 + $0x6f8] ss:$24 sps:$4 sm:$0xff]  }
 0x129   :  { %2082 = vmatpush1.bf16.msra.mxu0 %v5667_v38  ;;  %v5761_v38 = vld [vmem:[#allocation5 + $0x42c] ss:$24 sps:$4 sm:$0xff]  }
 0x12a   :  { %2123 = vmatpush1.bf16.msra.mxu1 %v5670_v39  ;;  %2083 = vmatprep.subr.bf16.mxu0 %v5675_v40  ;;  %v5764_v39 = vld [vmem:[#allocation5 + $0x72c] ss:$24 sps:$4 sm:$0xff]   ;;  %v5759_v40 = vld [vmem:[#allocation5 + $0x428] ss:$24 sps:$4 sm:$0xff]  }
 0x12b   :  { %2124 = vmatprep.subr.bf16.mxu1 %v5678_v41  ;;  %v5762_v41 = vld [vmem:[#allocation5 + $0x728] ss:$24 sps:$4 sm:$0xff]  }
 0x12d   :  { %2084 = vmatpush1.bf16.msra.mxu0 %v5673_v42  ;;  %v5767_v42 = vld [vmem:[#allocation5 + $0x45c] ss:$24 sps:$4 sm:$0xff]  }
 0x12e   :  { %2125 = vmatpush1.bf16.msra.mxu1 %v5676_v43  ;;  %2085 = vmatprep.subr.bf16.mxu0 %v5681_v44  ;;  %v5770_v43 = vld [vmem:[#allocation5 + $0x75c] ss:$24 sps:$4 sm:$0xff]   ;;  %v5765_v44 = vld [vmem:[#allocation5 + $0x458] ss:$24 sps:$4 sm:$0xff]  }
 0x12f   :  { %2126 = vmatprep.subr.bf16.mxu1 %v5684_v45  ;;  %v5768_v45 = vld [vmem:[#allocation5 + $0x758] ss:$24 sps:$4 sm:$0xff]  }
 0x131   :  { %2086 = vmatpush1.bf16.msra.mxu0 %v5679_v46  ;;  %v5773_v46 = vld [vmem:[#allocation5 + $0x48c] ss:$24 sps:$4 sm:$0xff]  }
 0x132   :  { %2127 = vmatpush1.bf16.msra.mxu1 %v5682_v48  ;;  %2087 = vmatprep.subr.bf16.mxu0 %v5687_v49  ;;  %v5776_v48 = vld [vmem:[#allocation5 + $0x78c] ss:$24 sps:$4 sm:$0xff]   ;;  %v5771_v49 = vld [vmem:[#allocation5 + $0x488] ss:$24 sps:$4 sm:$0xff]  }
 0x133   :  { %2128 = vmatprep.subr.bf16.mxu1 %v5690_v50  ;;  %v5774_v50 = vld [vmem:[#allocation5 + $0x788] ss:$24 sps:$4 sm:$0xff]  }
 0x135   :  { %2088 = vmatpush1.bf16.msra.mxu0 %v5685_v52  ;;  %v5779_v52 = vld [vmem:[#allocation5 + $0x4bc] ss:$24 sps:$4 sm:$0xff]  }
 0x136   :  { %2129 = vmatpush1.bf16.msra.mxu1 %v5688_v53  ;;  %2089 = vmatprep.subr.bf16.mxu0 %v5693_v54  ;;  %v5782_v53 = vld [vmem:[#allocation5 + $0x7bc] ss:$24 sps:$4 sm:$0xff]   ;;  %v5777_v54 = vld [vmem:[#allocation5 + $0x4b8] ss:$24 sps:$4 sm:$0xff]  }
 0x137   :  { %2130 = vmatprep.subr.bf16.mxu1 %v5696_v55  ;;  %v5780_v55 = vld [vmem:[#allocation5 + $0x7b8] ss:$24 sps:$4 sm:$0xff]  }
 0x139   :  { %2090 = vmatpush1.bf16.msra.mxu0 %v5691_v56  ;;  %v5785_v56 = vld [vmem:[#allocation5 + $0x4ec] ss:$24 sps:$4 sm:$0xff]  }
 0x13a   :  { %2131 = vmatpush1.bf16.msra.mxu1 %v5694_v57  ;;  %2091 = vmatprep.subr.bf16.mxu0 %v5699_v58  ;;  %v5788_v57 = vld [vmem:[#allocation5 + $0x7ec] ss:$24 sps:$4 sm:$0xff]   ;;  %v5783_v58 = vld [vmem:[#allocation5 + $0x4e8] ss:$24 sps:$4 sm:$0xff]  }
 0x13b   :  { %2132 = vmatprep.subr.bf16.mxu1 %v5702_v59  ;;  %v5786_v59 = vld [vmem:[#allocation5 + $0x7e8] ss:$24 sps:$4 sm:$0xff]  }
 0x13d   :  { %2092 = vmatpush1.bf16.msra.mxu0 %v5697_v60  ;;  %v5791_v60 = vld [vmem:[#allocation5 + $0x51c] ss:$24 sps:$4 sm:$0xff]  }
 0x13e   :  { %2133 = vmatpush1.bf16.msra.mxu1 %v5700_v61  ;;  %2093 = vmatprep.subr.bf16.mxu0 %v5705_v62  ;;  %v5794_v61 = vld [vmem:[#allocation5 + $0x81c] ss:$24 sps:$4 sm:$0xff]   ;;  %v5789_v62 = vld [vmem:[#allocation5 + $0x518] ss:$24 sps:$4 sm:$0xff]  }
 0x13f   :  { %2134 = vmatprep.subr.bf16.mxu1 %v5708_v63  ;;  %v5792_v63 = vld [vmem:[#allocation5 + $0x818] ss:$24 sps:$4 sm:$0xff]  }
 0x141   :  { %2094 = vmatpush1.bf16.msra.mxu0 %v5703_v0  ;;  %v5797_v0 = vld [vmem:[#allocation5 + $0x54c] ss:$24 sps:$4 sm:$0xff]  }
 0x142   :  { %2135 = vmatpush1.bf16.msra.mxu1 %v5706_v1  ;;  %2095 = vmatprep.subr.bf16.mxu0 %v5711_v2  ;;  %v5800_v1 = vld [vmem:[#allocation5 + $0x84c] ss:$24 sps:$4 sm:$0xff]   ;;  %v5795_v2 = vld [vmem:[#allocation5 + $0x548] ss:$24 sps:$4 sm:$0xff]  }
 0x143   :  { %2136 = vmatprep.subr.bf16.mxu1 %v5714_v3  ;;  %v5798_v3 = vld [vmem:[#allocation5 + $0x848] ss:$24 sps:$4 sm:$0xff]  }
 0x145   :  { %2096 = vmatpush1.bf16.msra.mxu0 %v5709_v4  ;;  %v5803_v4 = vld [vmem:[#allocation5 + $0x57c] ss:$24 sps:$4 sm:$0xff]  }
 0x146   :  { %2137 = vmatpush1.bf16.msra.mxu1 %v5712_v5  ;;  %2097 = vmatprep.subr.bf16.mxu0 %v5717_v8  ;;  %v5806_v5 = vld [vmem:[#allocation5 + $0x87c] ss:$24 sps:$4 sm:$0xff]   ;;  %v5801_v8 = vld [vmem:[#allocation5 + $0x578] ss:$24 sps:$4 sm:$0xff]  }
 0x147   :  { %2138 = vmatprep.subr.bf16.mxu1 %v5720_v9  ;;  %v5804_v9 = vld [vmem:[#allocation5 + $0x878] ss:$24 sps:$4 sm:$0xff]  }
 0x149   :  { %2098 = vmatpush1.bf16.msra.mxu0 %v5715_v10  ;;  %v5809_v10 = vld [vmem:[#allocation5 + $0x5ac] ss:$24 sps:$4 sm:$0xff]  }
 0x14a   :  { %2139 = vmatpush1.bf16.msra.mxu1 %v5718_v11  ;;  %2149 = vmatprep.subr.bf16.mxu0 %v5725_v12  ;;  %v5812_v11 = vld [vmem:[#allocation5 + $0x8ac] ss:$24 sps:$4 sm:$0xff]   ;;  %v5807_v12 = vld [vmem:[#allocation5 + $0x5a8] ss:$24 sps:$4 sm:$0xff]  }
 0x14b   :  { %2190 = vmatprep.subr.bf16.mxu1 %v5728_v13  ;;  %v5810_v13 = vld [vmem:[#allocation5 + $0x8a8] ss:$24 sps:$4 sm:$0xff]  }
 0x14c   :  { %2100 = vmatmul.mubr.bf16.vlgmr.msra.gmra.mrb[4].mxu0 %v6609_v14 }
 0x14d   :  { %2141 = vmatmul.mubr.bf16.vlgmr.msra.gmra.mrb[4].mxu1 %v6593_v6  ;;  %2150 = vmatpush1.bf16.msra.mxu0 %v5723_v15  ;;  %v5815_v15 = vld [vmem:[#allocation5 + $0x5dc] ss:$24 sps:$4 sm:$0xff]  }
 0x14e   :  { %2191 = vmatpush1.bf16.msra.mxu1 %v5726_v16  ;;  %2151 = vmatprep.subr.bf16.mxu0 %v5731_v17  ;;  %v5818_v16 = vld [vmem:[#allocation5 + $0x8dc] ss:$24 sps:$4 sm:$0xff]   ;;  %v5813_v17 = vld [vmem:[#allocation5 + $0x5d8] ss:$24 sps:$4 sm:$0xff]  }
 0x14f   :  { %2192 = vmatprep.subr.bf16.mxu1 %v5734_v18  ;;  %2181 = vmatprep.mubr.bf16.mxu0 %v6589_v51  ;;  %v5816_v18 = vld [vmem:[#allocation5 + $0x8d8] ss:$24 sps:$4 sm:$0xff]  }
 0x150   :  { %2222 = vmatprep.mubr.bf16.mxu1 %v6604_v34 }
 0x151   :  { %2152 = vmatpush1.bf16.msra.mxu0 %v5729_v19  ;;  %v5821_v19 = vld [vmem:[#allocation5 + $0x14] ss:$24 sps:$4 sm:$0xff]  }
 0x152   :  { %2193 = vmatpush1.bf16.msra.mxu1 %v5732_v20  ;;  %2153 = vmatprep.subr.bf16.mxu0 %v5737_v21  ;;  %v5824_v20 = vld [vmem:[#allocation5 + $0x314] ss:$24 sps:$4 sm:$0xff]   ;;  %v5819_v21 = vld [vmem:[#allocation5 + $0x10] ss:$24 sps:$4 sm:$0xff]  }
 0x153   :  { %2194 = vmatprep.subr.bf16.mxu1 %v5740_v22  ;;  %v5822_v22 = vld [vmem:[#allocation5 + $0x310] ss:$24 sps:$4 sm:$0xff]  }
 0x155   :  { %2154 = vmatpush1.bf16.msra.mxu0 %v5735_v23  ;;  %v5827_v23 = vld [vmem:[#allocation5 + $0x44] ss:$24 sps:$4 sm:$0xff]  }
 0x156   :  { %2195 = vmatpush1.bf16.msra.mxu1 %v5738_v24  ;;  %2155 = vmatprep.subr.bf16.mxu0 %v5743_v25  ;;  %v5830_v24 = vld [vmem:[#allocation5 + $0x344] ss:$24 sps:$4 sm:$0xff]   ;;  %v5825_v25 = vld [vmem:[#allocation5 + $0x40] ss:$24 sps:$4 sm:$0xff]  }
 0x157   :  { %2196 = vmatprep.subr.bf16.mxu1 %v5746_v26  ;;  %v5828_v26 = vld [vmem:[#allocation5 + $0x340] ss:$24 sps:$4 sm:$0xff]  }
 0x159   :  { %2156 = vmatpush1.bf16.msra.mxu0 %v5741_v27  ;;  %v5833_v27 = vld [vmem:[#allocation5 + $0x74] ss:$24 sps:$4 sm:$0xff]  }
 0x15a   :  { %2197 = vmatpush1.bf16.msra.mxu1 %v5744_v28  ;;  %2157 = vmatprep.subr.bf16.mxu0 %v5749_v29  ;;  %v5836_v28 = vld [vmem:[#allocation5 + $0x374] ss:$24 sps:$4 sm:$0xff]   ;;  %v5831_v29 = vld [vmem:[#allocation5 + $0x70] ss:$24 sps:$4 sm:$0xff]  }
 0x15b   :  { %2198 = vmatprep.subr.bf16.mxu1 %v5752_v30  ;;  %v5834_v30 = vld [vmem:[#allocation5 + $0x370] ss:$24 sps:$4 sm:$0xff]  }
 0x15d   :  { %2158 = vmatpush1.bf16.msra.mxu0 %v5747_v31  ;;  %v5839_v31 = vld [vmem:[#allocation5 + $0xa4] ss:$24 sps:$4 sm:$0xff]  }
 0x15e   :  { %2199 = vmatpush1.bf16.msra.mxu1 %v5750_v32  ;;  %2159 = vmatprep.subr.bf16.mxu0 %v5755_v33  ;;  %v5842_v32 = vld [vmem:[#allocation5 + $0x3a4] ss:$24 sps:$4 sm:$0xff]   ;;  %v5837_v33 = vld [vmem:[#allocation5 + $0xa0] ss:$24 sps:$4 sm:$0xff]  }
 0x15f   :  { %2200 = vmatprep.subr.bf16.mxu1 %v5758_v35  ;;  %v5840_v35 = vld [vmem:[#allocation5 + $0x3a0] ss:$24 sps:$4 sm:$0xff]  }
 0x161   :  { %2160 = vmatpush1.bf16.msra.mxu0 %v5753_v36  ;;  %v5845_v36 = vld [vmem:[#allocation5 + $0xd4] ss:$24 sps:$4 sm:$0xff]  }
 0x162   :  { %2201 = vmatpush1.bf16.msra.mxu1 %v5756_v37  ;;  %2161 = vmatprep.subr.bf16.mxu0 %v5761_v38  ;;  %v5848_v37 = vld [vmem:[#allocation5 + $0x3d4] ss:$24 sps:$4 sm:$0xff]   ;;  %v5851_v38 = vld [vmem:[#allocation5 + $0x104] ss:$24 sps:$4 sm:$0xff]  }
 0x163   :  { %2202 = vmatprep.subr.bf16.mxu1 %v5764_v39  ;;  %v5854_v39 = vld [vmem:[#allocation5 + $0x404] ss:$24 sps:$4 sm:$0xff]  }
 0x165   :  { %2162 = vmatpush1.bf16.msra.mxu0 %v5759_v40  ;;  %v5849_v40 = vld [vmem:[#allocation5 + $0x100] ss:$24 sps:$4 sm:$0xff]  }
 0x166   :  { %2203 = vmatpush1.bf16.msra.mxu1 %v5762_v41  ;;  %2163 = vmatprep.subr.bf16.mxu0 %v5767_v42  ;;  %v5852_v41 = vld [vmem:[#allocation5 + $0x400] ss:$24 sps:$4 sm:$0xff]   ;;  %v5857_v42 = vld [vmem:[#allocation5 + $0x134] ss:$24 sps:$4 sm:$0xff]  }
 0x167   :  { %2204 = vmatprep.subr.bf16.mxu1 %v5770_v43  ;;  %v5860_v43 = vld [vmem:[#allocation5 + $0x434] ss:$24 sps:$4 sm:$0xff]  }
 0x169   :  { %2164 = vmatpush1.bf16.msra.mxu0 %v5765_v44  ;;  %v5855_v44 = vld [vmem:[#allocation5 + $0x130] ss:$24 sps:$4 sm:$0xff]  }
 0x16a   :  { %2205 = vmatpush1.bf16.msra.mxu1 %v5768_v45  ;;  %2165 = vmatprep.subr.bf16.mxu0 %v5773_v46  ;;  %v5858_v45 = vld [vmem:[#allocation5 + $0x430] ss:$24 sps:$4 sm:$0xff]   ;;  %v5863_v46 = vld [vmem:[#allocation5 + $0x164] ss:$24 sps:$4 sm:$0xff]  }
 0x16b   :  { %2206 = vmatprep.subr.bf16.mxu1 %v5776_v48  ;;  %v5866_v48 = vld [vmem:[#allocation5 + $0x464] ss:$24 sps:$4 sm:$0xff]  }
 0x16d   :  { %2166 = vmatpush1.bf16.msra.mxu0 %v5771_v49  ;;  %v5861_v49 = vld [vmem:[#allocation5 + $0x160] ss:$24 sps:$4 sm:$0xff]  }
 0x16e   :  { %2207 = vmatpush1.bf16.msra.mxu1 %v5774_v50  ;;  %2167 = vmatprep.subr.bf16.mxu0 %v5779_v52  ;;  %v5864_v50 = vld [vmem:[#allocation5 + $0x460] ss:$24 sps:$4 sm:$0xff]   ;;  %v5869_v52 = vld [vmem:[#allocation5 + $0x194] ss:$24 sps:$4 sm:$0xff]  }
 0x16f   :  { %2208 = vmatprep.subr.bf16.mxu1 %v5782_v53  ;;  %v5872_v53 = vld [vmem:[#allocation5 + $0x494] ss:$24 sps:$4 sm:$0xff]  }
 0x171   :  { %2168 = vmatpush1.bf16.msra.mxu0 %v5777_v54  ;;  %v5867_v54 = vld [vmem:[#allocation5 + $0x190] ss:$24 sps:$4 sm:$0xff]  }
 0x172   :  { %2209 = vmatpush1.bf16.msra.mxu1 %v5780_v55  ;;  %2169 = vmatprep.subr.bf16.mxu0 %v5785_v56  ;;  %v5870_v55 = vld [vmem:[#allocation5 + $0x490] ss:$24 sps:$4 sm:$0xff]   ;;  %v5875_v56 = vld [vmem:[#allocation5 + $0x1c4] ss:$24 sps:$4 sm:$0xff]  }
 0x173   :  { %2210 = vmatprep.subr.bf16.mxu1 %v5788_v57  ;;  %v5878_v57 = vld [vmem:[#allocation5 + $0x4c4] ss:$24 sps:$4 sm:$0xff]  }
 0x175   :  { %2170 = vmatpush1.bf16.msra.mxu0 %v5783_v58  ;;  %v5873_v58 = vld [vmem:[#allocation5 + $0x1c0] ss:$24 sps:$4 sm:$0xff]  }
 0x176   :  { %2211 = vmatpush1.bf16.msra.mxu1 %v5786_v59  ;;  %2171 = vmatprep.subr.bf16.mxu0 %v5791_v60  ;;  %v5876_v59 = vld [vmem:[#allocation5 + $0x4c0] ss:$24 sps:$4 sm:$0xff]   ;;  %v5881_v60 = vld [vmem:[#allocation5 + $0x1f4] ss:$24 sps:$4 sm:$0xff]  }
 0x177   :  { %2212 = vmatprep.subr.bf16.mxu1 %v5794_v61  ;;  %v5884_v61 = vld [vmem:[#allocation5 + $0x4f4] ss:$24 sps:$4 sm:$0xff]  }
 0x179   :  { %2172 = vmatpush1.bf16.msra.mxu0 %v5789_v62  ;;  %v5879_v62 = vld [vmem:[#allocation5 + $0x1f0] ss:$24 sps:$4 sm:$0xff]  }
 0x17a   :  { %2213 = vmatpush1.bf16.msra.mxu1 %v5792_v63  ;;  %2173 = vmatprep.subr.bf16.mxu0 %v5797_v0  ;;  %v5882_v63 = vld [vmem:[#allocation5 + $0x4f0] ss:$24 sps:$4 sm:$0xff]   ;;  %v5887_v0 = vld [vmem:[#allocation5 + $0x224] ss:$24 sps:$4 sm:$0xff]  }
 0x17b   :  { %2214 = vmatprep.subr.bf16.mxu1 %v5800_v1  ;;  %v5890_v1 = vld [vmem:[#allocation5 + $0x524] ss:$24 sps:$4 sm:$0xff]  }
 0x17d   :  { %2174 = vmatpush1.bf16.msra.mxu0 %v5795_v2  ;;  %v5885_v2 = vld [vmem:[#allocation5 + $0x220] ss:$24 sps:$4 sm:$0xff]  }
 0x17e   :  { %2215 = vmatpush1.bf16.msra.mxu1 %v5798_v3  ;;  %2175 = vmatprep.subr.bf16.mxu0 %v5803_v4  ;;  %v5888_v3 = vld [vmem:[#allocation5 + $0x520] ss:$24 sps:$4 sm:$0xff]   ;;  %v5893_v4 = vld [vmem:[#allocation5 + $0x254] ss:$24 sps:$4 sm:$0xff]  }
 0x17f   :  { %2216 = vmatprep.subr.bf16.mxu1 %v5806_v5  ;;  %v5896_v5 = vld [vmem:[#allocation5 + $0x554] ss:$24 sps:$4 sm:$0xff]  }
 0x181   :  { %2176 = vmatpush1.bf16.msra.mxu0 %v5801_v8  ;;  %v5891_v8 = vld [vmem:[#allocation5 + $0x250] ss:$24 sps:$4 sm:$0xff]  }
 0x182   :  { %2217 = vmatpush1.bf16.msra.mxu1 %v5804_v9  ;;  %2177 = vmatprep.subr.bf16.mxu0 %v5809_v10  ;;  %v5894_v9 = vld [vmem:[#allocation5 + $0x550] ss:$24 sps:$4 sm:$0xff]   ;;  %v5899_v10 = vld [vmem:[#allocation5 + $0x284] ss:$24 sps:$4 sm:$0xff]  }
 0x183   :  { %2218 = vmatprep.subr.bf16.mxu1 %v5812_v11  ;;  %v5902_v11 = vld [vmem:[#allocation5 + $0x584] ss:$24 sps:$4 sm:$0xff]  }
 0x185   :  { %2178 = vmatpush1.bf16.msra.mxu0 %v5807_v12  ;;  %v5897_v12 = vld [vmem:[#allocation5 + $0x280] ss:$24 sps:$4 sm:$0xff]  }
 0x186   :  { %2219 = vmatpush1.bf16.msra.mxu1 %v5810_v13  ;;  %2179 = vmatprep.subr.bf16.mxu0 %v5815_v15  ;;  %v5900_v13 = vld [vmem:[#allocation5 + $0x580] ss:$24 sps:$4 sm:$0xff]   ;;  %v5905_v15 = vld [vmem:[#allocation5 + $0x2b4] ss:$24 sps:$4 sm:$0xff]  }
 0x187   :  { %2220 = vmatprep.subr.bf16.mxu1 %v5818_v16  ;;  %v5908_v16 = vld [vmem:[#allocation5 + $0x5b4] ss:$24 sps:$4 sm:$0xff]  }
 0x189   :  { %2180 = vmatpush1.bf16.msra.mxu0 %v5813_v17  ;;  %v5903_v17 = vld [vmem:[#allocation5 + $0x2b0] ss:$24 sps:$4 sm:$0xff]  }
 0x18a   :  { %2221 = vmatpush1.bf16.msra.mxu1 %v5816_v18  ;;  %2231 = vmatprep.subr.bf16.mxu0 %v5821_v19  ;;  %v5906_v18 = vld [vmem:[#allocation5 + $0x5b0] ss:$24 sps:$4 sm:$0xff]   ;;  %v5911_v19 = vld [vmem:[#allocation5 + $0x2e4] ss:$24 sps:$4 sm:$0xff]  }
 0x18b   :  { %2272 = vmatprep.subr.bf16.mxu1 %v5824_v20  ;;  %v5914_v20 = vld [vmem:[#allocation5 + $0x5e4] ss:$24 sps:$4 sm:$0xff]  }
 0x18c   :  { %2182 = vmatmul.mubr.bf16.vlgmr.msra.gmra.mrb[8].mxu0 %v6595_v7 }
 0x18d   :  { %2223 = vmatmul.mubr.bf16.vlgmr.msra.gmra.mrb[8].mxu1 %v6609_v14  ;;  %2232 = vmatpush1.bf16.msra.mxu0 %v5819_v21  ;;  %v5909_v21 = vld [vmem:[#allocation5 + $0x2e0] ss:$24 sps:$4 sm:$0xff]  }
 0x18e   :  { %2273 = vmatpush1.bf16.msra.mxu1 %v5822_v22  ;;  %2233 = vmatprep.subr.bf16.mxu0 %v5827_v23  ;;  %v5912_v22 = vld [vmem:[#allocation5 + $0x5e0] ss:$24 sps:$4 sm:$0xff]   ;;  %v5917_v23 = vld [vmem:[#allocation5 + $0x614] ss:$24 sps:$4 sm:$0xff]  }
 0x18f   :  { %2274 = vmatprep.subr.bf16.mxu1 %v5830_v24  ;;  %2263 = vmatprep.mubr.bf16.mxu0 %v6587_v47  ;;  %v5843_v47 = vld [vmem:[#allocation5 + $0xd0] ss:$24 sps:$4 sm:$0xff]  }
 0x190   :  { %2304 = vmatprep.mubr.bf16.mxu1 %v6589_v51  ;;  %v5846_v51 = vld [vmem:[#allocation5 + $0x3d0] ss:$24 sps:$4 sm:$0xff]  }
 0x191   :  { %2234 = vmatpush1.bf16.msra.mxu0 %v5825_v25  ;;  %v5915_v24 = vld [vmem:[#allocation5 + $0x610] ss:$24 sps:$4 sm:$0xff]   ;;  %v5920_v25 = vld [vmem:[#allocation5 + $0x644] ss:$24 sps:$4 sm:$0xff]  }
 0x192   :  { %2275 = vmatpush1.bf16.msra.mxu1 %v5828_v26  ;;  %2235 = vmatprep.subr.bf16.mxu0 %v5833_v27  ;;  %v5918_v26 = vld [vmem:[#allocation5 + $0x640] ss:$24 sps:$4 sm:$0xff]   ;;  %v5923_v27 = vld [vmem:[#allocation5 + $0x674] ss:$24 sps:$4 sm:$0xff]  }
 0x193   :  { %2276 = vmatprep.subr.bf16.mxu1 %v5836_v28  ;;  %v5921_v28 = vld [vmem:[#allocation5 + $0x670] ss:$24 sps:$4 sm:$0xff]  }
 0x195   :  { %2236 = vmatpush1.bf16.msra.mxu0 %v5831_v29  ;;  %v5926_v29 = vld [vmem:[#allocation5 + $0x6a4] ss:$24 sps:$4 sm:$0xff]  }
 0x196   :  { %2277 = vmatpush1.bf16.msra.mxu1 %v5834_v30  ;;  %2237 = vmatprep.subr.bf16.mxu0 %v5839_v31  ;;  %v5924_v30 = vld [vmem:[#allocation5 + $0x6a0] ss:$24 sps:$4 sm:$0xff]   ;;  %v5929_v31 = vld [vmem:[#allocation5 + $0x6d4] ss:$24 sps:$4 sm:$0xff]  }
 0x197   :  { %2278 = vmatprep.subr.bf16.mxu1 %v5842_v32  ;;  %v5927_v32 = vld [vmem:[#allocation5 + $0x6d0] ss:$24 sps:$4 sm:$0xff]  }
 0x199   :  { %2238 = vmatpush1.bf16.msra.mxu0 %v5837_v33  ;;  %v5935_v33 = vld [vmem:[#allocation5 + $0x734] ss:$24 sps:$4 sm:$0xff]  }
 0x19a   :  { %2279 = vmatpush1.bf16.msra.mxu1 %v5840_v35  ;;  %2239 = vmatprep.subr.bf16.mxu0 %v5845_v36 }
 0x19b   :  { %2280 = vmatprep.subr.bf16.mxu1 %v5848_v37 }
 0x19d   :  { %2240 = vmatpush1.bf16.msra.mxu0 %v5843_v47 }
 0x19e   :  { %2281 = vmatpush1.bf16.msra.mxu1 %v5846_v51  ;;  %2241 = vmatprep.subr.bf16.mxu0 %v5851_v38 }
 0x19f   :  { %2282 = vmatprep.subr.bf16.mxu1 %v5854_v39  ;;  %v5933_v39 = vld [vmem:[#allocation5 + $0x730] ss:$24 sps:$4 sm:$0xff]  }
 0x1a1   :  { %2242 = vmatpush1.bf16.msra.mxu0 %v5849_v40 }
 0x1a2   :  { %2283 = vmatpush1.bf16.msra.mxu1 %v5852_v41  ;;  %2243 = vmatprep.subr.bf16.mxu0 %v5857_v42  ;;  %v5938_v42 = vld [vmem:[#allocation5 + $0x764] ss:$24 sps:$4 sm:$0xff]  }
 0x1a3   :  { %2284 = vmatprep.subr.bf16.mxu1 %v5860_v43 }
 0x1a5   :  { %2244 = vmatpush1.bf16.msra.mxu0 %v5855_v44  ;;  %v5936_v44 = vld [vmem:[#allocation5 + $0x760] ss:$24 sps:$4 sm:$0xff]  }
 0x1a6   :  { %2285 = vmatpush1.bf16.msra.mxu1 %v5858_v45  ;;  %2245 = vmatprep.subr.bf16.mxu0 %v5863_v46  ;;  %v5941_v45 = vld [vmem:[#allocation5 + $0x794] ss:$24 sps:$4 sm:$0xff]   ;;  %v5939_v46 = vld [vmem:[#allocation5 + $0x790] ss:$24 sps:$4 sm:$0xff]  }
 0x1a7   :  { %2286 = vmatprep.subr.bf16.mxu1 %v5866_v48  ;;  %v5944_v48 = vld [vmem:[#allocation5 + $0x7c4] ss:$24 sps:$4 sm:$0xff]  }
 0x1a9   :  { %2246 = vmatpush1.bf16.msra.mxu0 %v5861_v49  ;;  %v5942_v49 = vld [vmem:[#allocation5 + $0x7c0] ss:$24 sps:$4 sm:$0xff]  }
 0x1aa   :  { %2287 = vmatpush1.bf16.msra.mxu1 %v5864_v50  ;;  %2247 = vmatprep.subr.bf16.mxu0 %v5869_v52  ;;  %v5947_v50 = vld [vmem:[#allocation5 + $0x7f4] ss:$24 sps:$4 sm:$0xff]   ;;  %v5945_v52 = vld [vmem:[#allocation5 + $0x7f0] ss:$24 sps:$4 sm:$0xff]  }
 0x1ab   :  { %2288 = vmatprep.subr.bf16.mxu1 %v5872_v53  ;;  %v5950_v53 = vld [vmem:[#allocation5 + $0x824] ss:$24 sps:$4 sm:$0xff]  }
 0x1ad   :  { %2248 = vmatpush1.bf16.msra.mxu0 %v5867_v54  ;;  %v5948_v54 = vld [vmem:[#allocation5 + $0x820] ss:$24 sps:$4 sm:$0xff]  }
 0x1ae   :  { %2289 = vmatpush1.bf16.msra.mxu1 %v5870_v55  ;;  %2249 = vmatprep.subr.bf16.mxu0 %v5875_v56  ;;  %v5953_v55 = vld [vmem:[#allocation5 + $0x854] ss:$24 sps:$4 sm:$0xff]   ;;  %v5951_v56 = vld [vmem:[#allocation5 + $0x850] ss:$24 sps:$4 sm:$0xff]  }
 0x1af   :  { %2290 = vmatprep.subr.bf16.mxu1 %v5878_v57  ;;  %v5956_v57 = vld [vmem:[#allocation5 + $0x884] ss:$24 sps:$4 sm:$0xff]  }
 0x1b1   :  { %2250 = vmatpush1.bf16.msra.mxu0 %v5873_v58  ;;  %v5954_v58 = vld [vmem:[#allocation5 + $0x880] ss:$24 sps:$4 sm:$0xff]  }
 0x1b2   :  { %2291 = vmatpush1.bf16.msra.mxu1 %v5876_v59  ;;  %2251 = vmatprep.subr.bf16.mxu0 %v5881_v60  ;;  %v5959_v59 = vld [vmem:[#allocation5 + $0x8b4] ss:$24 sps:$4 sm:$0xff]   ;;  %v5957_v60 = vld [vmem:[#allocation5 + $0x8b0] ss:$24 sps:$4 sm:$0xff]  }
 0x1b3   :  { %2292 = vmatprep.subr.bf16.mxu1 %v5884_v61  ;;  %v5962_v61 = vld [vmem:[#allocation5 + $0x8e4] ss:$24 sps:$4 sm:$0xff]  }
 0x1b5   :  { %2252 = vmatpush1.bf16.msra.mxu0 %v5879_v62  ;;  %v5960_v62 = vld [vmem:[#allocation5 + $0x8e0] ss:$24 sps:$4 sm:$0xff]  }
 0x1b6   :  { %2293 = vmatpush1.bf16.msra.mxu1 %v5882_v63  ;;  %2253 = vmatprep.subr.bf16.mxu0 %v5887_v0  ;;  %v191_v63 = vlaneseq }
 0x1b7   :  { %2294 = vmatprep.subr.bf16.mxu1 %v5890_v1 }
 0x1b8   :  { %v6624_v0 = vshrl.u32 %v191_v63, 7 }
 0x1b9   :  { %2254 = vmatpush1.bf16.msra.mxu0 %v5885_v2  ;;  %v6627_v2 = vld [vmem:[#allocation7] sm:$0x3f] }
 0x1ba   :  { %2295 = vmatpush1.bf16.msra.mxu1 %v5888_v3  ;;  %2255 = vmatprep.subr.bf16.mxu0 %v5893_v4  ;;  %v193_v1 = vsub.s32 0, %v6624_v0  ;;  %v197_v3 = vsub.s32 1, %v6624_v0 }
 0x1bb   :  { %2296 = vmatprep.subr.bf16.mxu1 %v5896_v5 }
 0x1bc   :  { %v194_v4 = vrot.slane %v6627_v2, %v193_v1 }
 0x1bd   :  { %2256 = vmatpush1.bf16.msra.mxu0 %v5891_v8  ;;  %v198_v8 = vrot.slane %v6627_v2, %v197_v3 }
 0x1be   :  { %2297 = vmatpush1.bf16.msra.mxu1 %v5894_v9  ;;  %2257 = vmatprep.subr.bf16.mxu0 %v5899_v10 }
 0x1bf   :  { %2298 = vmatprep.subr.bf16.mxu1 %v5902_v11 }
 0x1c1   :  { %2258 = vmatpush1.bf16.msra.mxu0 %v5897_v12 }
 0x1c2   :  { %2299 = vmatpush1.bf16.msra.mxu1 %v5900_v13  ;;  %2259 = vmatprep.subr.bf16.mxu0 %v5905_v15 }
 0x1c3   :  { %2300 = vmatprep.subr.bf16.mxu1 %v5908_v16 }
 0x1c5   :  { %2260 = vmatpush1.bf16.msra.mxu0 %v5903_v17 }
 0x1c6   :  { %2301 = vmatpush1.bf16.msra.mxu1 %v5906_v18  ;;  %2261 = vmatprep.subr.bf16.mxu0 %v5911_v19 }
 0x1c7   :  { %2302 = vmatprep.subr.bf16.mxu1 %v5914_v20  ;;  %v201_v20 = vsub.s32 2, %v6624_v0 }
 0x1c9   :  { %2262 = vmatpush1.bf16.msra.mxu0 %v5909_v21  ;;  %v205_v21 = vsub.s32 3, %v6624_v0 }
 0x1ca   :  { %2303 = vmatpush1.bf16.msra.mxu1 %v5912_v22  ;;  %2313 = vmatprep.subr.bf16.mxu0 %v5917_v23 }
 0x1cc   :  { %2264 = vmatmul.mubr.bf16.vlgmr.msra.gmra.mrb[12].mxu0 %v6593_v6  ;;  %v5932_v6 = vld [vmem:[#allocation5 + $0x704] ss:$24 sps:$4 sm:$0xff]  }
 0x1cd   :  { %2305 = vmatmul.mubr.bf16.vlgmr.msra.gmra.mrb[12].mxu1 %v6595_v7  ;;  %2314 = vmatpush1.bf16.msra.mxu0 %v5915_v24  ;;  %v5930_v7 = vld [vmem:[#allocation5 + $0x700] ss:$24 sps:$4 sm:$0xff]  }
 0x1ce   :  { %2345 = vmatprep.mubr.bf16.mxu0 %v6604_v34  ;;  %2315 = vmatprep.subr.bf16.mxu0 %v5920_v25 }
 0x1d1   :  { %2316 = vmatpush1.bf16.msra.mxu0 %v5918_v26  ;;  %v202_v26 = vrot.slane %v6627_v2, %v201_v20 }
 0x1d2   :  { %2317 = vmatprep.subr.bf16.mxu0 %v5923_v27 }
 0x1d5   :  { %2318 = vmatpush1.bf16.msra.mxu0 %v5921_v28 }
 0x1d6   :  { %2319 = vmatprep.subr.bf16.mxu0 %v5926_v29 }
 0x1d9   :  { %2320 = vmatpush1.bf16.msra.mxu0 %v5924_v30  ;;  %v206_v30 = vrot.slane %v6627_v2, %v205_v21 }
 0x1da   :  { %2321 = vmatprep.subr.bf16.mxu0 %v5929_v31 }
 0x1dd   :  { %2322 = vmatpush1.bf16.msra.mxu0 %v5927_v32 }
 0x1de   :  { %2323 = vmatprep.subr.bf16.mxu0 %v5932_v6 }
 0x1df   :  { %v2019_v35 = vpop.f32.mrb[0].mxu0 }
 0x1e0   :  { %v2060_v34 = vpop.f32.mrb[0].mxu1  ;;  %v2021_v37 = vpop.f32.mrb[1].mxu0 }
 0x1e1   :  { %v2061_v36 = vadd.f32 %v2060_v34, %v2019_v35  ;;  %v2062_v47 = vpop.f32.mrb[1].mxu1  ;;  %v2023_v38 = vpop.f32.mrb[2].mxu0  ;;  %2324 = vmatpush1.bf16.msra.mxu0 %v5930_v7  ;;  %v2380_v7 = vld [vmem:[#allocation10 + $0x18] sm:$0xff] }
 0x1e2   :  { %v2063_v51 = vadd.f32 %v2062_v47, %v2021_v37  ;;  %v2064_v40 = vpop.f32.mrb[2].mxu1  ;;  %v2024_v41 = vpop.f32.mrb[3].mxu0  ;;  %2325 = vmatprep.subr.bf16.mxu0 %v5935_v33  ;;  %v2384_v33 = vld [vmem:[#allocation10 + $0x38] sm:$0xff]  ;;  %v2383_v38 = vld [vmem:[#allocation10 + $0x30] sm:$0xff] }
 0x1e3   :  { %v2065_v43 = vpop.f32.mrb[3].mxu1  ;;  %v5111_v47 = vpack.c.bf16 %v2384_v33, %v2380_v7  ;;  %v2392_v40 = vld [vmem:[#allocation10 + $0x78] sm:$0xff]  ;;  %v2443_v7 = vld [vmem:[#allocation10 + $0x210] sm:$0xff] }
 0x1e4   :  { %v2387_v43 = vld [vmem:[#allocation10 + $0x50] sm:$0xff] }
 0x1e5   :  { %2326 = vmatpush1.bf16.msra.mxu0 %v5933_v39  ;;  %v2388_v39 = vld [vmem:[#allocation10 + $0x58] sm:$0xff]  ;;  %v2447_v33 = vld [vmem:[#allocation10 + $0x230] sm:$0xff] }
 0x1e6   :  { %2327 = vmatprep.subr.bf16.mxu0 %v5938_v42  ;;  %v5115_v42 = vpack.c.bf16 %v2392_v40, %v2388_v39  ;;  %v2455_v39 = vld [vmem:[#allocation10 + $0x270] sm:$0xff]  ;;  %v2460_v40 = vld [vmem:[#allocation10 + $0x298] sm:$0xff] }
 0x1e9   :  { %2328 = vmatpush1.bf16.msra.mxu0 %v5936_v44  ;;  %v2391_v44 = vld [vmem:[#allocation10 + $0x70] sm:$0xff] }
 0x1ea   :  { %2329 = vmatprep.subr.bf16.mxu0 %v5941_v45  ;;  %v2396_v45 = vld [vmem:[#allocation10 + $0x98] sm:$0xff] }
 0x1ed   :  { %2330 = vmatpush1.bf16.msra.mxu0 %v5939_v46  ;;  %v2400_v46 = vld [vmem:[#allocation10 + $0xb8] sm:$0xff] }
 0x1ee   :  { %2331 = vmatprep.subr.bf16.mxu0 %v5944_v48  ;;  %v5117_v48 = vpack.c.bf16 %v2391_v44, %v2387_v43  ;;  %v2459_v44 = vld [vmem:[#allocation10 + $0x290] sm:$0xff] }
 0x1f1   :  { %2332 = vmatpush1.bf16.msra.mxu0 %v5942_v49  ;;  %v5119_v49 = vpack.c.bf16 %v2400_v46, %v2396_v45  ;;  %v2463_v45 = vld [vmem:[#allocation10 + $0x2b0] sm:$0xff]  ;;  %v2468_v46 = vld [vmem:[#allocation10 + $0x2d8] sm:$0xff] }
 0x1f2   :  { %2333 = vmatprep.subr.bf16.mxu0 %v5947_v50  ;;  %v2395_v50 = vld [vmem:[#allocation10 + $0x90] sm:$0xff] }
 0x1f5   :  { %2334 = vmatpush1.bf16.msra.mxu0 %v5945_v52  ;;  %v2399_v52 = vld [vmem:[#allocation10 + $0xb0] sm:$0xff] }
 0x1f6   :  { %2335 = vmatprep.subr.bf16.mxu0 %v5950_v53  ;;  %v2404_v53 = vld [vmem:[#allocation10 + $0xd8] sm:$0xff] }
 0x1f9   :  { %2336 = vmatpush1.bf16.msra.mxu0 %v5948_v54  ;;  %v2408_v54 = vld [vmem:[#allocation10 + $0xf8] sm:$0xff] }
 0x1fa   :  { %2337 = vmatprep.subr.bf16.mxu0 %v5953_v55  ;;  %v5121_v55 = vpack.c.bf16 %v2399_v52, %v2395_v50  ;;  %v2467_v52 = vld [vmem:[#allocation10 + $0x2d0] sm:$0xff] }
 0x1fd   :  { %2338 = vmatpush1.bf16.msra.mxu0 %v5951_v56  ;;  %v5123_v56 = vpack.c.bf16 %v2408_v54, %v2404_v53  ;;  %v2471_v53 = vld [vmem:[#allocation10 + $0x2f0] sm:$0xff]  ;;  %v2476_v54 = vld [vmem:[#allocation10 + $0x318] sm:$0xff] }
 0x1fe   :  { %2339 = vmatprep.subr.bf16.mxu0 %v5956_v57  ;;  %v2403_v57 = vld [vmem:[#allocation10 + $0xd0] sm:$0xff] }
 0x201   :  { %2340 = vmatpush1.bf16.msra.mxu0 %v5954_v58  ;;  %v2407_v58 = vld [vmem:[#allocation10 + $0xf0] sm:$0xff] }
 0x202   :  { %2341 = vmatprep.subr.bf16.mxu0 %v5959_v59  ;;  %v2412_v59 = vld [vmem:[#allocation10 + $0x118] sm:$0xff] }
 0x205   :  { %2342 = vmatpush1.bf16.msra.mxu0 %v5957_v60  ;;  %v2416_v60 = vld [vmem:[#allocation10 + $0x138] sm:$0xff] }
 0x206   :  { %2343 = vmatprep.subr.bf16.mxu0 %v5962_v61  ;;  %v5125_v61 = vpack.c.bf16 %v2407_v58, %v2403_v57  ;;  %v2475_v58 = vld [vmem:[#allocation10 + $0x310] sm:$0xff] }
 0x209   :  { %2344 = vmatpush1.bf16.msra.mxu0 %v5960_v62  ;;  %v5127_v62 = vpack.c.bf16 %v2416_v60, %v2412_v59  ;;  %v2479_v59 = vld [vmem:[#allocation10 + $0x330] sm:$0xff]  ;;  %v2484_v60 = vld [vmem:[#allocation10 + $0x358] sm:$0xff] }
 0x20c   :  { %2346 = vmatmul.mubr.bf16.vlgmr.msra.gmra.mrb[16].mxu0 %v6609_v14 }
 0x21f   :  { %v2101_v5 = vpop.f32.mrb[4].mxu0 }
 0x220   :  { %v2142_v14 = vpop.f32.mrb[4].mxu1  ;;  %v2102_v9 = vadd.f32 %v2101_v5, %v2061_v36  ;;  %v2103_v10 = vpop.f32.mrb[5].mxu0  ;;  %v2415_v5 = vld [vmem:[#allocation10 + $0x130] sm:$0xff] }
 0x221   :  { %v2144_v11 = vpop.f32.mrb[5].mxu1  ;;  %v2104_v12 = vadd.f32 %v2103_v10, %v2063_v51  ;;  %v2105_v13 = vpop.f32.mrb[6].mxu0  ;;  %v2379_v51 = vld [vmem:[#allocation10 + $0x10] sm:$0xff] }
 0x222   :  { %v2146_v15 = vpop.f32.mrb[6].mxu1  ;;  %v6636_v16 = vadd.f32 %v2102_v9, %v194_v4  ;;  %v2106_v17 = vpop.f32.mrb[7].mxu0  ;;  %v5113_v41 = vpack.c.bf16 %v2383_v38, %v2379_v51  ;;  %v2411_v4 = vld [vmem:[#allocation10 + $0x110] sm:$0xff]  ;;  %v2428_v13 = vld [vmem:[#allocation10 + $0x198] sm:$0xff] }
 0x223   :  { %v2147_v18 = vpop.f32.mrb[7].mxu1  ;;  %v6638_v19 = vadd.f32 %v2104_v12, %v198_v8  ;;  %v2420_v8 = vld [vmem:[#allocation10 + $0x158] sm:$0xff]  ;;  %v5129_v9 = vpack.c.bf16 %v2415_v5, %v2411_v4  ;;  %v2423_v12 = vld [vmem:[#allocation10 + $0x170] sm:$0xff] }
 0x224   :  { %2360 = vst [vmem:[#allocation20] sm:$0xff] %v6636_v16  ;;  %4313 = vst [vmem:[#allocation23] sm:$0xff] %v6636_v16  ;;  %v2432_v15 = vld [vmem:[#allocation10 + $0x1b8] sm:$0xff]  ;;  %v2451_v38 = vld [vmem:[#allocation10 + $0x250] sm:$0xff] }
 0x225   :  { %2361 = vst [vmem:[#allocation20 + $0x8] sm:$0xff] %v6638_v19  ;;  %2940 = vmatprep.subr.mxu0 %v6638_v19  ;;  %4314 = vst [vmem:[#allocation23 + $0x8] sm:$0xff] %v6638_v19  ;;  %3004 = vmatprep.mubr.f32.mxu0 %v6638_v19  ;;  %v5135_v18 = vpack.c.bf16 %v2432_v15, %v2428_v13  ;;  %v2483_v5 = vld [vmem:[#allocation10 + $0x350] sm:$0xff]  ;;  %v2500_v15 = vld [vmem:[#allocation10 + $0x3d8] sm:$0xff] }
 0x226   :  { %2941 = vmatpush1.xpose.msra.mxu0 %v6636_v16  ;;  %v2495_v13 = vld [vmem:[#allocation10 + $0x3b0] sm:$0xff] }
 0x229   :  { %3005 = vmatmul.mubr.f32.vlgmr.msra.gmra.mrb[20].mxu0 %v6636_v16 }
 0x25f   :  { %v2183_v22 = vpop.f32.mrb[8].mxu0 }
 0x260   :  { %v2224_v23 = vpop.f32.mrb[8].mxu1  ;;  %v2184_v24 = vadd.f32 %v2183_v22, %v2142_v14  ;;  %v2185_v25 = vpop.f32.mrb[9].mxu0  ;;  %v2424_v14 = vld [vmem:[#allocation10 + $0x178] sm:$0xff]  ;;  %v2427_v22 = vld [vmem:[#allocation10 + $0x190] sm:$0xff] }
 0x261   :  { %v2226_v27 = vpop.f32.mrb[9].mxu1  ;;  %v2186_v28 = vadd.f32 %v2185_v25, %v2144_v11  ;;  %v2187_v29 = vpop.f32.mrb[10].mxu0  ;;  %v5131_v10 = vpack.c.bf16 %v2424_v14, %v2420_v8  ;;  %v2419_v11 = vld [vmem:[#allocation10 + $0x150] sm:$0xff]  ;;  %v2440_v25 = vld [vmem:[#allocation10 + $0x1f8] sm:$0xff] }
 0x262   :  { %v2228_v31 = vpop.f32.mrb[10].mxu1  ;;  %v2225_v32 = vadd.f32 %v2224_v23, %v2184_v24  ;;  %v2188_v6 = vpop.f32.mrb[11].mxu0  ;;  %v5133_v17 = vpack.c.bf16 %v2423_v12, %v2419_v11  ;;  %v2431_v23 = vld [vmem:[#allocation10 + $0x1b0] sm:$0xff]  ;;  %v2436_v24 = vld [vmem:[#allocation10 + $0x1d8] sm:$0xff] }
 0x263   :  { %v2229_v35 = vpop.f32.mrb[11].mxu1  ;;  %v2227_v34 = vadd.f32 %v2226_v27, %v2186_v28  ;;  %v5139_v27 = vpack.c.bf16 %v2440_v25, %v2436_v24  ;;  %v2435_v28 = vld [vmem:[#allocation10 + $0x1d0] sm:$0xff]  ;;  %v2448_v31 = vld [vmem:[#allocation10 + $0x238] sm:$0xff] }
 0x264   :  { %v6656_v36 = vadd.f32 %v2225_v32, %v202_v26  ;;  %v5137_v26 = vpack.c.bf16 %v2431_v23, %v2427_v22  ;;  %v2439_v29 = vld [vmem:[#allocation10 + $0x1f0] sm:$0xff]  ;;  %v2452_v35 = vld [vmem:[#allocation10 + $0x258] sm:$0xff] }
 0x265   :  { %v6658_v37 = vadd.f32 %v2227_v34, %v206_v30  ;;  %v2444_v30 = vld [vmem:[#allocation10 + $0x218] sm:$0xff]  ;;  %v5141_v32 = vpack.c.bf16 %v2439_v29, %v2435_v28  ;;  %v2487_v8 = vld [vmem:[#allocation10 + $0x370] sm:$0xff] }
 0x266   :  { %2362 = vst [vmem:[#allocation20 + $0x10] sm:$0xff] %v6656_v36  ;;  %4315 = vst [vmem:[#allocation23 + $0x10] sm:$0xff] %v6656_v36  ;;  %v5143_v6 = vpack.c.bf16 %v2448_v31, %v2444_v30  ;;  %v2456_v34 = vld [vmem:[#allocation10 + $0x278] sm:$0xff]  ;;  %v2491_v12 = vld [vmem:[#allocation10 + $0x390] sm:$0xff] }
 0x267   :  { %2363 = vst [vmem:[#allocation20 + $0x18] sm:$0xff] %v6658_v37  ;;  %3010 = vmatprep.subr.mxu0 %v6658_v37  ;;  %4316 = vst [vmem:[#allocation23 + $0x18] sm:$0xff] %v6658_v37  ;;  %3074 = vmatprep.mubr.f32.mxu0 %v6658_v37  ;;  %v5147_v51 = vpack.c.bf16 %v2456_v34, %v2452_v35  ;;  %v2492_v14 = vld [vmem:[#allocation10 + $0x398] sm:$0xff]  ;;  %v2499_v30 = vld [vmem:[#allocation10 + $0x3d0] sm:$0xff] }
 0x268   :  { %3011 = vmatpush1.xpose.msra.mxu0 %v6656_v36  ;;  %v2503_v31 = vld [vmem:[#allocation10 + $0x3f0] sm:$0xff] }
 0x269   :  { %5112 = vmatprep.subr.bf16.mxu0 %v5111_v47  ;;  %v5145_v47 = vpack.c.bf16 %v2447_v33, %v2443_v7  ;;  %v2508_v7 = vld [vmem:[#allocation10 + $0x418] sm:$0xff]  ;;  %v5173_v34 = vpack.c.bf16 %v2503_v31, %v2499_v30  ;;  %v2563_v30 = vld [vmem:[#allocation10 + $0x5d0] sm:$0xff] }
 0x26a   :  { %v2512_v33 = vld [vmem:[#allocation10 + $0x438] sm:$0xff]  ;;  %v2567_v31 = vld [vmem:[#allocation10 + $0x5f0] sm:$0xff] }
 0x26b   :  { %3075 = vmatmul.mubr.f32.vlgmr.msra.gmra.mrb[20].mxu0 %v6656_v36 }
 0x26c   :  { %5114 = vmatpush1.bf16.msra.mxu0 %v5113_v41  ;;  %3490 = vmatprep.mubr.f32.mxu0 %v6638_v19  ;;  %v2464_v41 = vld [vmem:[#allocation10 + $0x2b8] sm:$0xff] }
 0x26d   :  { %5116 = vmatprep.subr.bf16.mxu0 %v5115_v42  ;;  %v5149_v42 = vpack.c.bf16 %v2455_v39, %v2451_v38  ;;  %v5151_v43 = vpack.c.bf16 %v2464_v41, %v2460_v40  ;;  %v2511_v38 = vld [vmem:[#allocation10 + $0x430] sm:$0xff]  ;;  %v2516_v39 = vld [vmem:[#allocation10 + $0x458] sm:$0xff] }
 0x26e   :  { %v2520_v40 = vld [vmem:[#allocation10 + $0x478] sm:$0xff] }
 0x270   :  { %5118 = vmatpush1.bf16.msra.mxu0 %v5117_v48  ;;  %v2472_v48 = vld [vmem:[#allocation10 + $0x2f8] sm:$0xff] }
 0x271   :  { %5120 = vmatprep.subr.bf16.mxu0 %v5119_v49  ;;  %v5153_v49 = vpack.c.bf16 %v2463_v45, %v2459_v44  ;;  %v5155_v50 = vpack.c.bf16 %v2472_v48, %v2468_v46  ;;  %v2519_v44 = vld [vmem:[#allocation10 + $0x470] sm:$0xff]  ;;  %v2524_v45 = vld [vmem:[#allocation10 + $0x498] sm:$0xff]  ;;  %v6343_v48 = vmov 0  }
 0x272   :  { %v2528_v46 = vld [vmem:[#allocation10 + $0x4b8] sm:$0xff]  ;;  %5524 = vset.pattern.permute.xlu0 %v6343_v48  ;;  %v2591_v48 = vld [vmem:[#allocation10 + $0x6b0] sm:$0xff] }
 0x274   :  { %5122 = vmatpush1.bf16.msra.mxu0 %v5121_v55  ;;  %v2480_v55 = vld [vmem:[#allocation10 + $0x338] sm:$0xff] }
 0x275   :  { %5124 = vmatprep.subr.bf16.mxu0 %v5123_v56  ;;  %v5157_v56 = vpack.c.bf16 %v2471_v53, %v2467_v52  ;;  %v5159_v57 = vpack.c.bf16 %v2480_v55, %v2476_v54  ;;  %v5183_v52 = vpack.c.bf16 %v2528_v46, %v2524_v45  ;;  %v2523_v53 = vld [vmem:[#allocation10 + $0x490] sm:$0xff]  ;;  %v2532_v55 = vld [vmem:[#allocation10 + $0x4d8] sm:$0xff] }
 0x276   :  { %v2527_v54 = vld [vmem:[#allocation10 + $0x4b0] sm:$0xff] }
 0x277   :  { %v2587_v46 = vld [vmem:[#allocation10 + $0x690] sm:$0xff] }
 0x278   :  { %5126 = vmatpush1.bf16.msra.mxu0 %v5125_v61  ;;  %v2488_v61 = vld [vmem:[#allocation10 + $0x378] sm:$0xff] }
 0x279   :  { %5128 = vmatprep.subr.bf16.mxu0 %v5127_v62  ;;  %v5161_v62 = vpack.c.bf16 %v2479_v59, %v2475_v58  ;;  %v5163_v4 = vpack.c.bf16 %v2488_v61, %v2484_v60  ;;  %v2531_v59 = vld [vmem:[#allocation10 + $0x4d0] sm:$0xff]  ;;  %v2540_v61 = vld [vmem:[#allocation10 + $0x518] sm:$0xff] }
 0x27a   :  { %v2535_v60 = vld [vmem:[#allocation10 + $0x4f0] sm:$0xff] }
 0x27c   :  { %5130 = vmatpush1.bf16.msra.mxu0 %v5129_v9  ;;  %v2496_v9 = vld [vmem:[#allocation10 + $0x3b8] sm:$0xff] }
 0x27d   :  { %5132 = vmatprep.subr.bf16.mxu0 %v5131_v10  ;;  %v5165_v10 = vpack.c.bf16 %v2487_v8, %v2483_v5  ;;  %v5167_v11 = vpack.c.bf16 %v2496_v9, %v2492_v14  ;;  %v2543_v5 = vld [vmem:[#allocation10 + $0x530] sm:$0xff]  ;;  %v2548_v8 = vld [vmem:[#allocation10 + $0x558] sm:$0xff] }
 0x27e   :  { %v2552_v14 = vld [vmem:[#allocation10 + $0x578] sm:$0xff] }
 0x280   :  { %5134 = vmatpush1.bf16.msra.mxu0 %v5133_v17  ;;  %v2504_v17 = vld [vmem:[#allocation10 + $0x3f8] sm:$0xff] }
 0x281   :  { %5136 = vmatprep.subr.bf16.mxu0 %v5135_v18  ;;  %v5171_v29 = vpack.c.bf16 %v2504_v17, %v2500_v15  ;;  %v2560_v15 = vld [vmem:[#allocation10 + $0x5b8] sm:$0xff] }
 0x284   :  { %5138 = vmatpush1.bf16.msra.mxu0 %v5137_v26  ;;  %v5169_v26 = vpack.c.bf16 %v2495_v13, %v2491_v12  ;;  %v2551_v12 = vld [vmem:[#allocation10 + $0x570] sm:$0xff]  ;;  %v2556_v13 = vld [vmem:[#allocation10 + $0x598] sm:$0xff] }
 0x285   :  { %5140 = vmatprep.subr.bf16.mxu0 %v5139_v27 }
 0x288   :  { %5142 = vmatpush1.bf16.msra.mxu0 %v5141_v32 }
 0x289   :  { %5144 = vmatprep.subr.bf16.mxu0 %v5143_v6 }
 0x28c   :  { %5146 = vmatpush1.bf16.msra.mxu0 %v5145_v47  ;;  %v5175_v47 = vpack.c.bf16 %v2512_v33, %v2508_v7  ;;  %v5205_v7 = vpack.c.bf16 %v2567_v31, %v2563_v30  ;;  %v2378_v31 = vld [vmem:[#allocation10 + $0x8] sm:$0xff] }
 0x28d   :  { %5148 = vmatprep.subr.bf16.mxu0 %v5147_v51  ;;  %v2507_v51 = vld [vmem:[#allocation10 + $0x410] sm:$0xff] }
 0x28e   :  { %v5177_v41 = vpack.c.bf16 %v2511_v38, %v2507_v51  ;;  %v2584_v51 = vld [vmem:[#allocation10 + $0x678] sm:$0xff] }
 0x290   :  { %5150 = vmatpush1.bf16.msra.mxu0 %v5149_v42  ;;  %v5179_v42 = vpack.c.bf16 %v2520_v40, %v2516_v39  ;;  %v2579_v40 = vld [vmem:[#allocation10 + $0x650] sm:$0xff] }
 0x291   :  { %5152 = vmatprep.subr.bf16.mxu0 %v5151_v43  ;;  %v2515_v43 = vld [vmem:[#allocation10 + $0x450] sm:$0xff] }
 0x294   :  { %5154 = vmatpush1.bf16.msra.mxu0 %v5153_v49  ;;  %v2375_v49 = vld [vmem:[%s6825_s3] sm:$0xff]  ;;  %s6348_s3 = smov [#allocation20]  }
 0x295   :  { %5156 = vmatprep.subr.bf16.mxu0 %v5155_v50  ;;  %3151 = vperm.xlu0 %5524, %v2375_v49   ;;  %v5181_v50 = vpack.c.bf16 %v2519_v44, %v2515_v43  ;;  %v2592_v43 = vld [vmem:[#allocation10 + $0x6b8] sm:$0xff]  ;;  %s4327_s19 = sshll.u32 %s6348_s3, 4  ;;  %s4328_s19 = int_to_ptr.vmem [resolvable:$true] %s4327_s19 }
 0x296   :  { %v2596_v49 = vld [vmem:[#allocation10 + $0x6d8] sm:$0xff]  ;;  %s6220_s18 = scalar_lea.vmem %s4328_s19, 768  ;;  %p6225_p5 = scmp.lt.s32.totalorder %s4328_s19, %s4328_s19 }
 0x297   :  { %p6221_p4 = scmp.ne.s32.totalorder %s4328_s19, %s6220_s18  ;;  %p6226_p6 = scmp.lt.s32.totalorder %s6220_s18, %s6220_s18 }
 0x298   :  { %5158 = vmatpush1.bf16.msra.mxu0 %v5157_v56  ;;  %v2536_v56 = vld [vmem:[#allocation10 + $0x4f8] sm:$0xff] }
 0x299   :  { %5160 = vmatprep.subr.bf16.mxu0 %v5159_v57  ;;  %v5185_v57 = vpack.c.bf16 %v2527_v54, %v2523_v53  ;;  %v5187_v58 = vpack.c.bf16 %v2536_v56, %v2532_v55  ;;  %v2595_v54 = vld [vmem:[#allocation10 + $0x6d0] sm:$0xff]  ;;  %v2604_v56 = vld [vmem:[#allocation10 + $0x718] sm:$0xff]  ;;  %p6227_p7 = por %p6226_p6, %p6225_p5 }
 0x29a   :  { %v2599_v55 = vld [vmem:[#allocation10 + $0x6f0] sm:$0xff] }
 0x29b   :  { %p6228_p8 = pnand %p6227_p7, %p6221_p4 }
 0x29c   :  { %5162 = vmatpush1.bf16.msra.mxu0 %v5161_v62  ;;  %v2544_v62 = vld [vmem:[#allocation10 + $0x538] sm:$0xff] }
 0x29d   :  { %5164 = vmatprep.subr.bf16.mxu0 %v5163_v4  ;;  %v5191_v4 = vpack.c.bf16 %v2544_v62, %v2540_v61  ;;  %v2607_v61 = vld [vmem:[#allocation10 + $0x730] sm:$0xff]  ;;  %v2612_v62 = vld [vmem:[#allocation10 + $0x758] sm:$0xff] }
 0x29f   :  { %v2265_v18 = vpop.f32.mrb[12].mxu0 }
 0x2a0   :  { %v2306_v22 = vpop.f32.mrb[12].mxu1  ;;  %v2267_v24 = vpop.f32.mrb[13].mxu0  ;;  %5166 = vmatpush1.bf16.msra.mxu0 %v5165_v10  ;;  %v5195_v10 = vpack.c.bf16 %v2552_v14, %v2548_v8  ;;  %v2615_v8 = vld [vmem:[#allocation10 + $0x770] sm:$0xff]  ;;  %v209_v14 = vsub.s32 4, %v6624_v0 }
 0x2a1   :  { %v6669_v23 = vadd.f32 %v2306_v22, %v2265_v18  ;;  %v2308_v25 = vpop.f32.mrb[13].mxu1  ;;  %v2269_v28 = vpop.f32.mrb[14].mxu0  ;;  %5168 = vmatprep.subr.bf16.mxu0 %v5167_v11  ;;  %v2547_v11 = vld [vmem:[#allocation10 + $0x550] sm:$0xff]  ;;  %v5199_v18 = vpack.c.bf16 %v2560_v15, %v2556_v13 }
 0x2a2   :  { %v6671_v27 = vadd.f32 %v2308_v25, %v2267_v24  ;;  %v2310_v32 = vpop.f32.mrb[14].mxu1  ;;  %v2270_v6 = vpop.f32.mrb[15].mxu0  ;;  %v5197_v17 = vpack.c.bf16 %v2551_v12, %v2547_v11  ;;  %v2555_v22 = vld [vmem:[#allocation10 + $0x590] sm:$0xff]  ;;  %v2564_v25 = vld [vmem:[#allocation10 + $0x5d8] sm:$0xff]  ;;  %v213_v11 = vsub.s32 5, %v6624_v0 }
 0x2a3   :  { %v2311_v35 = vpop.f32.mrb[15].mxu1  ;;  %v2559_v24 = vld [vmem:[#allocation10 + $0x5b0] sm:$0xff]  ;;  %v2572_v32 = vld [vmem:[#allocation10 + $0x618] sm:$0xff] }
 0x2a4   :  { %5170 = vmatpush1.bf16.msra.mxu0 %v5169_v26  ;;  %v2568_v26 = vld [vmem:[#allocation10 + $0x5f8] sm:$0xff]  ;;  %v5201_v28 = vpack.c.bf16 %v2559_v24, %v2555_v22  ;;  %v2571_v35 = vld [vmem:[#allocation10 + $0x610] sm:$0xff]  ;;  %v214_v24 = vrot.slane %v6627_v2, %v213_v11 }
 0x2a5   :  { %5172 = vmatprep.subr.bf16.mxu0 %v5171_v29  ;;  %v5203_v29 = vpack.c.bf16 %v2568_v26, %v2564_v25  ;;  %v2576_v6 = vld [vmem:[#allocation10 + $0x638] sm:$0xff]  ;;  %v2619_v15 = vld [vmem:[#allocation10 + $0x790] sm:$0xff] }
 0x2a6   :  { %v5207_v33 = vpack.c.bf16 %v2576_v6, %v2572_v32  ;;  %v2628_v25 = vld [vmem:[#allocation10 + $0x7d8] sm:$0xff]  ;;  %v2382_v32 = vld [vmem:[#allocation10 + $0x28] sm:$0xff]  ;;  %v2651_v11 = vld [vmem:[#allocation10 + $0x890] sm:$0xff] }
 0x2a7   :  { %v2632_v26 = vld [vmem:[#allocation10 + $0x7f8] sm:$0xff] }
 0x2a8   :  { %5174 = vmatpush1.bf16.msra.mxu0 %v5173_v34  ;;  %v2575_v34 = vld [vmem:[#allocation10 + $0x630] sm:$0xff] }
 0x2a9   :  { %5176 = vmatprep.subr.bf16.mxu0 %v5175_v47  ;;  %v2580_v47 = vld [vmem:[#allocation10 + $0x658] sm:$0xff]  ;;  %v5209_v38 = vpack.c.bf16 %v2575_v34, %v2571_v35  ;;  %v2631_v35 = vld [vmem:[#allocation10 + $0x7f0] sm:$0xff] }
 0x2aa   :  { %v5211_v39 = vpack.c.bf16 %v2584_v51, %v2580_v47  ;;  %v5235_v51 = vpack.c.bf16 %v2632_v26, %v2628_v25  ;;  %v2414_v25 = vld [vmem:[#allocation10 + $0x128] sm:$0xff] }
 0x2ab   :  { %3491 = vmatmul.mubr.f32.vlgmr.msra.gmra.mrb[22].mxu0 %v6636_v16  ;;  %v5189_v16 = vpack.c.bf16 %v2535_v60, %v2531_v59  ;;  %v2603_v60 = vld [vmem:[#allocation10 + $0x710] sm:$0xff] }
 0x2ac   :  { %5178 = vmatpush1.bf16.msra.mxu0 %v5177_v41  ;;  %3561 = vmatprep.mubr.f32.mxu0 %v6658_v37  ;;  %v2539_v37 = vld [vmem:[#allocation10 + $0x510] sm:$0xff] }
 0x2ad   :  { %5180 = vmatprep.subr.bf16.mxu0 %v5179_v42  ;;  %v5193_v9 = vpack.c.bf16 %v2543_v5, %v2539_v37  ;;  %v2583_v41 = vld [vmem:[#allocation10 + $0x670] sm:$0xff]  ;;  %v2588_v42 = vld [vmem:[#allocation10 + $0x698] sm:$0xff] }
 0x2ae   :  { %v5213_v44 = vpack.c.bf16 %v2583_v41, %v2579_v40  ;;  %v5215_v45 = vpack.c.bf16 %v2592_v43, %v2588_v42  ;;  %v2611_v5 = vld [vmem:[#allocation10 + $0x750] sm:$0xff]  ;;  %v2377_v40 = vld [vmem:[#allocation10] sm:$0xff]  ;;  %v2386_v42 = vld [vmem:[#allocation10 + $0x48] sm:$0xff] }
 0x2af   :  { %v5229_v12 = vpack.c.bf16 %v2615_v8, %v2611_v5  ;;  %v2381_v41 = vld [vmem:[#allocation10 + $0x20] sm:$0xff]  ;;  %v2390_v43 = vld [vmem:[#allocation10 + $0x68] sm:$0xff] }
 0x2b0   :  { %5182 = vmatpush1.bf16.msra.mxu0 %v5181_v50  ;;  %v2600_v50 = vld [vmem:[#allocation10 + $0x6f8] sm:$0xff]  ;;  %v2397_v5 = vld [vmem:[#allocation10 + $0xa0] sm:$0xff] }
 0x2b1   :  { %5184 = vmatprep.subr.bf16.mxu0 %v5183_v52  ;;  %v5217_v52 = vpack.c.bf16 %v2591_v48, %v2587_v46  ;;  %v5219_v53 = vpack.c.bf16 %v2600_v50, %v2596_v49  ;;  %v2639_v46 = vld [vmem:[#allocation10 + $0x830] sm:$0xff]  ;;  %v4921_v48 = vpack.c.bf16 %v2381_v41, %v2377_v40  ;;  %v2644_v49 = vld [vmem:[#allocation10 + $0x858] sm:$0xff] }
 0x2b2   :  { %v2648_v50 = vld [vmem:[#allocation10 + $0x878] sm:$0xff] }
 0x2b3   :  { %v2676_v41 = vld [vmem:[#allocation10 + $0x958] sm:$0xff] }
 0x2b4   :  { %5186 = vmatpush1.bf16.msra.mxu0 %v5185_v57  ;;  %v2608_v57 = vld [vmem:[#allocation10 + $0x738] sm:$0xff] }
 0x2b5   :  { %5188 = vmatprep.subr.bf16.mxu0 %v5187_v58  ;;  %v5221_v58 = vpack.c.bf16 %v2599_v55, %v2595_v54  ;;  %v5223_v59 = vpack.c.bf16 %v2608_v57, %v2604_v56  ;;  %v2389_v54 = vld [vmem:[#allocation10 + $0x60] sm:$0xff]  ;;  %v2394_v56 = vld [vmem:[#allocation10 + $0x88] sm:$0xff] }
 0x2b6   :  { %v2398_v57 = vld [vmem:[#allocation10 + $0xa8] sm:$0xff] }
 0x2b8   :  { %5190 = vmatpush1.bf16.msra.mxu0 %v5189_v16  ;;  %v2616_v16 = vld [vmem:[#allocation10 + $0x778] sm:$0xff] }
 0x2b9   :  { %5192 = vmatprep.subr.bf16.mxu0 %v5191_v4  ;;  %v5225_v4 = vpack.c.bf16 %v2607_v61, %v2603_v60  ;;  %v5227_v37 = vpack.c.bf16 %v2616_v16, %v2612_v62  ;;  %v2647_v60 = vld [vmem:[#allocation10 + $0x870] sm:$0xff]  ;;  %v2652_v62 = vld [vmem:[#allocation10 + $0x898] sm:$0xff] }
 0x2ba   :  { %v2656_v16 = vld [vmem:[#allocation10 + $0x8b8] sm:$0xff] }
 0x2bc   :  { %5194 = vmatpush1.bf16.msra.mxu0 %v5193_v9  ;;  %v2620_v9 = vld [vmem:[#allocation10 + $0x798] sm:$0xff] }
 0x2bd   :  { %5196 = vmatprep.subr.bf16.mxu0 %v5195_v10  ;;  %v2624_v10 = vld [vmem:[#allocation10 + $0x7b8] sm:$0xff] }
 0x2be   :  { %v5231_v13 = vpack.c.bf16 %v2624_v10, %v2620_v9  ;;  %v2406_v9 = vld [vmem:[#allocation10 + $0xe8] sm:$0xff]  ;;  %v5247_v10 = vpack.c.bf16 %v2656_v16, %v2652_v62  ;;  %v2683_v16 = vld [vmem:[#allocation10 + $0x990] sm:$0xff] }
 0x2c0   :  { %5198 = vmatpush1.bf16.msra.mxu0 %v5197_v17  ;;  %v2623_v17 = vld [vmem:[#allocation10 + $0x7b0] sm:$0xff] }
 0x2c1   :  { %5200 = vmatprep.subr.bf16.mxu0 %v5199_v18  ;;  %v210_v18 = vrot.slane %v6627_v2, %v209_v14  ;;  %v5233_v30 = vpack.c.bf16 %v2623_v17, %v2619_v15  ;;  %v2636_v2 = vld [vmem:[#allocation10 + $0x818] sm:$0xff]  ;;  %v2402_v14 = vld [vmem:[#allocation10 + $0xc8] sm:$0xff]  ;;  %v2401_v17 = vld [vmem:[#allocation10 + $0xc0] sm:$0xff] }
 0x2c2   :  { %v2664_v15 = vld [vmem:[#allocation10 + $0x8f8] sm:$0xff] }
 0x2c4   :  { %5202 = vmatpush1.bf16.msra.mxu0 %v5201_v28 }
 0x2c5   :  { %5204 = vmatprep.subr.bf16.mxu0 %v5203_v29 }
 0x2c8   :  { %5206 = vmatpush1.bf16.msra.mxu0 %v5205_v7 }
 0x2c9   :  { %5208 = vmatprep.subr.bf16.mxu0 %v5207_v33  ;;  %v2627_v33 = vld [vmem:[#allocation10 + $0x7d0] sm:$0xff] }
 0x2cc   :  { %5210 = vmatpush1.bf16.msra.mxu0 %v5209_v38  ;;  %v2640_v38 = vld [vmem:[#allocation10 + $0x838] sm:$0xff] }
 0x2cd   :  { %5212 = vmatprep.subr.bf16.mxu0 %v5211_v39 }
 0x2d0   :  { %5214 = vmatpush1.bf16.msra.mxu0 %v5213_v44  ;;  %v5239_v44 = vpack.c.bf16 %v2640_v38, %v2636_v2  ;;  %v2667_v38 = vld [vmem:[#allocation10 + $0x910] sm:$0xff] }
 0x2d1   :  { %5216 = vmatprep.subr.bf16.mxu0 %v5215_v45  ;;  %v2635_v45 = vld [vmem:[#allocation10 + $0x810] sm:$0xff] }
 0x2d2   :  { %v5241_v55 = vpack.c.bf16 %v2639_v46, %v2635_v45  ;;  %v2426_v46 = vld [vmem:[#allocation10 + $0x188] sm:$0xff] }
 0x2d4   :  { %5218 = vmatpush1.bf16.msra.mxu0 %v5217_v52  ;;  %v4923_v52 = vpack.c.bf16 %v2390_v43, %v2386_v42  ;;  %v2417_v43 = vld [vmem:[#allocation10 + $0x140] sm:$0xff] }
 0x2d5   :  { %5220 = vmatprep.subr.bf16.mxu0 %v5219_v53  ;;  %v2385_v53 = vld [vmem:[#allocation10 + $0x40] sm:$0xff] }
 0x2d6   :  { %v4925_v61 = vpack.c.bf16 %v2389_v54, %v2385_v53  ;;  %v2684_v54 = vld [vmem:[#allocation10 + $0x998] sm:$0xff] }
 0x2d8   :  { %5222 = vmatpush1.bf16.msra.mxu0 %v5221_v58  ;;  %v5243_v58 = vpack.c.bf16 %v2648_v50, %v2644_v49  ;;  %v2675_v50 = vld [vmem:[#allocation10 + $0x950] sm:$0xff] }
 0x2d9   :  { %5224 = vmatprep.subr.bf16.mxu0 %v5223_v59  ;;  %v2643_v59 = vld [vmem:[#allocation10 + $0x850] sm:$0xff] }
 0x2da   :  { %v5245_v8 = vpack.c.bf16 %v2647_v60, %v2643_v59  ;;  %v2434_v60 = vld [vmem:[#allocation10 + $0x1c8] sm:$0xff] }
 0x2dc   :  { %5226 = vmatpush1.bf16.msra.mxu0 %v5225_v4  ;;  %v4927_v4 = vpack.c.bf16 %v2398_v57, %v2394_v56  ;;  %v2425_v57 = vld [vmem:[#allocation10 + $0x180] sm:$0xff] }
 0x2dd   :  { %5228 = vmatprep.subr.bf16.mxu0 %v5227_v37  ;;  %v2393_v37 = vld [vmem:[#allocation10 + $0x80] sm:$0xff] }
 0x2df   :  { %v2347_v22 = vpop.f32.mrb[16].mxu0 }
 0x2e0   :  { %v2348_v28 = vadd.f32 %v2347_v22, %v6669_v23  ;;  %v2349_v29 = vpop.f32.mrb[17].mxu0  ;;  %5230 = vmatpush1.bf16.msra.mxu0 %v5229_v12  ;;  %v4919_v23 = vpack.c.bf16 %v2382_v32, %v2378_v31  ;;  %v2655_v12 = vld [vmem:[#allocation10 + $0x8b0] sm:$0xff]  ;;  %v2668_v31 = vld [vmem:[#allocation10 + $0x918] sm:$0xff] }
 0x2e1   :  { %v2350_v6 = vadd.f32 %v2349_v29, %v6671_v27  ;;  %v2351_v7 = vpop.f32.mrb[18].mxu0  ;;  %5232 = vmatprep.subr.bf16.mxu0 %v5231_v13  ;;  %v5237_v27 = vpack.c.bf16 %v2631_v35, %v2627_v33  ;;  %v2660_v13 = vld [vmem:[#allocation10 + $0x8d8] sm:$0xff]  ;;  %v5249_v22 = vpack.c.bf16 %v2655_v12, %v2651_v11  ;;  %v2663_v29 = vld [vmem:[#allocation10 + $0x8f0] sm:$0xff]  ;;  %v2413_v33 = vld [vmem:[#allocation10 + $0x120] sm:$0xff] }
 0x2e2   :  { %v6684_v34 = vadd.f32 %v2348_v28, %v210_v18  ;;  %v2352_v47 = vpop.f32.mrb[19].mxu0  ;;  %v2405_v18 = vld [vmem:[#allocation10 + $0xe0] sm:$0xff]  ;;  %v5251_v26 = vpack.c.bf16 %v2664_v15, %v2660_v13  ;;  %v2659_v28 = vld [vmem:[#allocation10 + $0x8d0] sm:$0xff]  ;;  %v2672_v32 = vld [vmem:[#allocation10 + $0x938] sm:$0xff] }
 0x2e3   :  { %v6686_v39 = vadd.f32 %v2350_v6, %v214_v24  ;;  %v2410_v24 = vld [vmem:[#allocation10 + $0x108] sm:$0xff]  ;;  %v2409_v7 = vld [vmem:[#allocation10 + $0x100] sm:$0xff]  ;;  %v5253_v35 = vpack.c.bf16 %v2663_v29, %v2659_v28  ;;  %v5255_v2 = vpack.c.bf16 %v2672_v32, %v2668_v31  ;;  %v2691_v15 = vld [vmem:[#allocation10 + $0x9d0] sm:$0xff] }
 0x2e4   :  { %2364 = vst [vmem:[#allocation20 + $0x20] sm:$0xff] %v6684_v34  ;;  %5234 = vmatpush1.bf16.msra.mxu0 %v5233_v30  ;;  %4317 = vst [vmem:[#allocation23 + $0x20] sm:$0xff] %v6684_v34  ;;  %v4933_v30 = vpack.c.bf16 %v2405_v18, %v2401_v17  ;;  %v4935_v6 = vpack.c.bf16 %v2414_v25, %v2410_v24  ;;  %v2418_v47 = vld [vmem:[#allocation10 + $0x148] sm:$0xff]  ;;  %v4937_v40 = vpack.c.bf16 %v2413_v33, %v2409_v7  ;;  %v2700_v18 = vld [vmem:[#allocation10 + $0xa18] sm:$0xff] }
 0x2e5   :  { %2365 = vst [vmem:[#allocation20 + $0x28] sm:$0xff] %v6686_v39  ;;  %3080 = vmatprep.subr.mxu1 %v6686_v39  ;;  %4318 = vst [vmem:[#allocation23 + $0x28] sm:$0xff] %v6686_v39  ;;  %3144 = vmatprep.mubr.f32.mxu1 %v6686_v39  ;;  %v2442_v12 = vld [vmem:[#allocation10 + $0x208] sm:$0xff]  ;;  %v2441_v25 = vld [vmem:[#allocation10 + $0x200] sm:$0xff] }
 0x2e6   :  { %3081 = vmatpush1.xpose.msra.mxu1 %v6684_v34  ;;  %5236 = vmatprep.subr.bf16.mxu0 %v5235_v51  ;;  %v2422_v51 = vld [vmem:[#allocation10 + $0x168] sm:$0xff]  ;;  %v2699_v32 = vld [vmem:[#allocation10 + $0xa10] sm:$0xff]  ;;  %v2708_v33 = vld [vmem:[#allocation10 + $0xa58] sm:$0xff] }
 0x2e7   :  { %4920 = vmatprep.subr.bf16.mxu1 %v4919_v23  ;;  %v2671_v23 = vld [vmem:[#allocation10 + $0x930] sm:$0xff]  ;;  %v4939_v42 = vpack.c.bf16 %v2422_v51, %v2418_v47  ;;  %v2450_v29 = vld [vmem:[#allocation10 + $0x248] sm:$0xff]  ;;  %v2449_v51 = vld [vmem:[#allocation10 + $0x240] sm:$0xff] }
 0x2e8   :  { %5238 = vmatpush1.bf16.msra.mxu0 %v5237_v27  ;;  %v2680_v27 = vld [vmem:[#allocation10 + $0x978] sm:$0xff]  ;;  %v5257_v45 = vpack.c.bf16 %v2671_v23, %v2667_v38  ;;  %v2458_v23 = vld [vmem:[#allocation10 + $0x288] sm:$0xff] }
 0x2e9   :  { %3145 = vmatmul.mubr.f32.vlgmr.msra.gmra.mrb[16].mxu1 %v6684_v34  ;;  %5240 = vmatprep.subr.bf16.mxu0 %v5239_v44  ;;  %v2421_v44 = vld [vmem:[#allocation10 + $0x160] sm:$0xff]  ;;  %v5259_v49 = vpack.c.bf16 %v2680_v27, %v2676_v41  ;;  %v2707_v27 = vld [vmem:[#allocation10 + $0xa50] sm:$0xff] }
 0x2ea   :  { %4922 = vmatpush1.bf16.msra.mxu1 %v4921_v48  ;;  %3277 = vmatprep.mubr.f32.mxu1 %v6638_v19  ;;  %v4929_v19 = vpack.c.bf16 %v2397_v5, %v2393_v37  ;;  %v2430_v48 = vld [vmem:[#allocation10 + $0x1a8] sm:$0xff]  ;;  %v4941_v53 = vpack.c.bf16 %v2421_v44, %v2417_v43  ;;  %v2692_v5 = vld [vmem:[#allocation10 + $0x9d8] sm:$0xff] }
 0x2eb   :  { %3562 = vmatmul.mubr.f32.vlgmr.msra.gmra.mrb[22].mxu0 %v6656_v36  ;;  %4924 = vmatprep.subr.bf16.mxu1 %v4923_v52  ;;  %v4931_v36 = vpack.c.bf16 %v2406_v9, %v2402_v14  ;;  %v2679_v52 = vld [vmem:[#allocation10 + $0x970] sm:$0xff]  ;;  %v4943_v56 = vpack.c.bf16 %v2430_v48, %v2426_v46  ;;  %v2433_v9 = vld [vmem:[#allocation10 + $0x1c0] sm:$0xff]  ;;  %v2716_v44 = vld [vmem:[#allocation10 + $0xa98] sm:$0xff] }
 0x2ec   :  { %5242 = vmatpush1.bf16.msra.mxu0 %v5241_v55  ;;  %3632 = vmatprep.mubr.f32.mxu0 %v6686_v39  ;;  %v2688_v55 = vld [vmem:[#allocation10 + $0x9b8] sm:$0xff]  ;;  %v5261_v59 = vpack.c.bf16 %v2679_v52, %v2675_v50  ;;  %v2457_v48 = vld [vmem:[#allocation10 + $0x280] sm:$0xff]  ;;  %v2466_v52 = vld [vmem:[#allocation10 + $0x2c8] sm:$0xff] }
 0x2ed   :  { %5244 = vmatprep.subr.bf16.mxu0 %v5243_v58  ;;  %v2429_v58 = vld [vmem:[#allocation10 + $0x1a0] sm:$0xff]  ;;  %v5263_v62 = vpack.c.bf16 %v2688_v55, %v2684_v54  ;;  %v2715_v55 = vld [vmem:[#allocation10 + $0xa90] sm:$0xff] }
 0x2ee   :  { %4926 = vmatpush1.bf16.msra.mxu1 %v4925_v61  ;;  %v2438_v61 = vld [vmem:[#allocation10 + $0x1e8] sm:$0xff]  ;;  %v4945_v37 = vpack.c.bf16 %v2429_v58, %v2425_v57  ;;  %v2724_v58 = vld [vmem:[#allocation10 + $0xad8] sm:$0xff] }
 0x2ef   :  { %4928 = vmatprep.subr.bf16.mxu1 %v4927_v4  ;;  %v2687_v4 = vld [vmem:[#allocation10 + $0x9b0] sm:$0xff]  ;;  %v4947_v14 = vpack.c.bf16 %v2438_v61, %v2434_v60  ;;  %v2465_v61 = vld [vmem:[#allocation10 + $0x2c0] sm:$0xff] }
 0x2f0   :  { %5246 = vmatpush1.bf16.msra.mxu0 %v5245_v8  ;;  %v2696_v8 = vld [vmem:[#allocation10 + $0x9f8] sm:$0xff]  ;;  %v5265_v11 = vpack.c.bf16 %v2687_v4, %v2683_v16  ;;  %v2474_v4 = vld [vmem:[#allocation10 + $0x308] sm:$0xff] }
 0x2f1   :  { %5248 = vmatprep.subr.bf16.mxu0 %v5247_v10  ;;  %v2437_v10 = vld [vmem:[#allocation10 + $0x1e0] sm:$0xff]  ;;  %v5267_v13 = vpack.c.bf16 %v2696_v8, %v2692_v5  ;;  %v2723_v8 = vld [vmem:[#allocation10 + $0xad0] sm:$0xff] }
 0x2f2   :  { %4930 = vmatpush1.bf16.msra.mxu1 %v4929_v19  ;;  %v2446_v19 = vld [vmem:[#allocation10 + $0x228] sm:$0xff]  ;;  %v4949_v17 = vpack.c.bf16 %v2437_v10, %v2433_v9  ;;  %v2732_v10 = vld [vmem:[#allocation10 + $0xb18] sm:$0xff] }
 0x2f3   :  { %4932 = vmatprep.subr.bf16.mxu1 %v4931_v36  ;;  %v2695_v36 = vld [vmem:[#allocation10 + $0x9f0] sm:$0xff]  ;;  %v4951_v24 = vpack.c.bf16 %v2446_v19, %v2442_v12  ;;  %v2473_v19 = vld [vmem:[#allocation10 + $0x300] sm:$0xff] }
 0x2f4   :  { %5250 = vmatpush1.bf16.msra.mxu0 %v5249_v22  ;;  %v2704_v22 = vld [vmem:[#allocation10 + $0xa38] sm:$0xff]  ;;  %v5269_v28 = vpack.c.bf16 %v2695_v36, %v2691_v15  ;;  %v2482_v36 = vld [vmem:[#allocation10 + $0x348] sm:$0xff] }
 0x2f5   :  { %5252 = vmatprep.subr.bf16.mxu0 %v5251_v26  ;;  %v2445_v26 = vld [vmem:[#allocation10 + $0x220] sm:$0xff]  ;;  %v5271_v31 = vpack.c.bf16 %v2704_v22, %v2700_v18  ;;  %v2731_v22 = vld [vmem:[#allocation10 + $0xb10] sm:$0xff] }
 0x2f6   :  { %4934 = vmatpush1.bf16.msra.mxu1 %v4933_v30  ;;  %v2454_v30 = vld [vmem:[#allocation10 + $0x268] sm:$0xff]  ;;  %v4953_v7 = vpack.c.bf16 %v2445_v26, %v2441_v25  ;;  %v2740_v26 = vld [vmem:[#allocation10 + $0xb58] sm:$0xff] }
 0x2f7   :  { %4936 = vmatprep.subr.bf16.mxu1 %v4935_v6  ;;  %v2703_v6 = vld [vmem:[#allocation10 + $0xa30] sm:$0xff]  ;;  %v4955_v47 = vpack.c.bf16 %v2454_v30, %v2450_v29  ;;  %v2481_v30 = vld [vmem:[#allocation10 + $0x340] sm:$0xff] }
 0x2f8   :  { %5254 = vmatpush1.bf16.msra.mxu0 %v5253_v35  ;;  %v2712_v35 = vld [vmem:[#allocation10 + $0xa78] sm:$0xff]  ;;  %v5273_v38 = vpack.c.bf16 %v2703_v6, %v2699_v32  ;;  %v2490_v6 = vld [vmem:[#allocation10 + $0x388] sm:$0xff] }
 0x2f9   :  { %5256 = vmatprep.subr.bf16.mxu0 %v5255_v2  ;;  %v2453_v2 = vld [vmem:[#allocation10 + $0x260] sm:$0xff]  ;;  %v5275_v41 = vpack.c.bf16 %v2712_v35, %v2708_v33  ;;  %v2739_v35 = vld [vmem:[#allocation10 + $0xb50] sm:$0xff] }
 0x2fa   :  { %4938 = vmatpush1.bf16.msra.mxu1 %v4937_v40  ;;  %v2462_v40 = vld [vmem:[#allocation10 + $0x2a8] sm:$0xff]  ;;  %v4957_v43 = vpack.c.bf16 %v2453_v2, %v2449_v51  ;;  %v2748_v2 = vld [vmem:[#allocation10 + $0xb98] sm:$0xff] }
 0x2fb   :  { %4940 = vmatprep.subr.bf16.mxu1 %v4939_v42  ;;  %v2711_v42 = vld [vmem:[#allocation10 + $0xa70] sm:$0xff]  ;;  %v4959_v46 = vpack.c.bf16 %v2462_v40, %v2458_v23  ;;  %v2489_v40 = vld [vmem:[#allocation10 + $0x380] sm:$0xff] }
 0x2fc   :  { %5258 = vmatpush1.bf16.msra.mxu0 %v5257_v45  ;;  %v2720_v45 = vld [vmem:[#allocation10 + $0xab8] sm:$0xff]  ;;  %v5277_v50 = vpack.c.bf16 %v2711_v42, %v2707_v27  ;;  %v2498_v42 = vld [vmem:[#allocation10 + $0x3c8] sm:$0xff] }
 0x2fd   :  { %5260 = vmatprep.subr.bf16.mxu0 %v5259_v49  ;;  %v2461_v49 = vld [vmem:[#allocation10 + $0x2a0] sm:$0xff]  ;;  %v5279_v54 = vpack.c.bf16 %v2720_v45, %v2716_v44  ;;  %v2747_v45 = vld [vmem:[#allocation10 + $0xb90] sm:$0xff] }
 0x2fe   :  { %4942 = vmatpush1.bf16.msra.mxu1 %v4941_v53  ;;  %v2470_v53 = vld [vmem:[#allocation10 + $0x2e8] sm:$0xff]  ;;  %v4961_v57 = vpack.c.bf16 %v2461_v49, %v2457_v48  ;;  %v2756_v49 = vld [vmem:[#allocation10 + $0xbd8] sm:$0xff] }
 0x2ff   :  { %4944 = vmatprep.subr.bf16.mxu1 %v4943_v56  ;;  %v2719_v56 = vld [vmem:[#allocation10 + $0xab0] sm:$0xff]  ;;  %v4963_v60 = vpack.c.bf16 %v2470_v53, %v2466_v52  ;;  %v2497_v53 = vld [vmem:[#allocation10 + $0x3c0] sm:$0xff] }
 0x300   :  { %5262 = vmatpush1.bf16.msra.mxu0 %v5261_v59  ;;  %v2728_v59 = vld [vmem:[#allocation10 + $0xaf8] sm:$0xff]  ;;  %v5281_v16 = vpack.c.bf16 %v2719_v56, %v2715_v55  ;;  %v2506_v56 = vld [vmem:[#allocation10 + $0x408] sm:$0xff] }
 0x301   :  { %5264 = vmatprep.subr.bf16.mxu0 %v5263_v62  ;;  %v2469_v62 = vld [vmem:[#allocation10 + $0x2e0] sm:$0xff]  ;;  %v5283_v5 = vpack.c.bf16 %v2728_v59, %v2724_v58  ;;  %v2755_v59 = vld [vmem:[#allocation10 + $0xbd0] sm:$0xff] }
 0x302   :  { %4946 = vmatpush1.bf16.msra.mxu1 %v4945_v37  ;;  %v2478_v37 = vld [vmem:[#allocation10 + $0x328] sm:$0xff]  ;;  %v4965_v9 = vpack.c.bf16 %v2469_v62, %v2465_v61 }
 0x303   :  { %4948 = vmatprep.subr.bf16.mxu1 %v4947_v14  ;;  %v2727_v14 = vld [vmem:[#allocation10 + $0xaf0] sm:$0xff]  ;;  %v4967_v12 = vpack.c.bf16 %v2478_v37, %v2474_v4  ;;  %v2509_v4 = vld [vmem:[#allocation10 + $0x420] sm:$0xff] }
 0x304   :  { %5266 = vmatpush1.bf16.msra.mxu0 %v5265_v11  ;;  %v2736_v11 = vld [vmem:[#allocation10 + $0xb38] sm:$0xff]  ;;  %v5285_v15 = vpack.c.bf16 %v2727_v14, %v2723_v8  ;;  %v2518_v8 = vld [vmem:[#allocation10 + $0x468] sm:$0xff] }
 0x305   :  { %5268 = vmatprep.subr.bf16.mxu0 %v5267_v13  ;;  %v2477_v13 = vld [vmem:[#allocation10 + $0x320] sm:$0xff]  ;;  %v5287_v18 = vpack.c.bf16 %v2736_v11, %v2732_v10 }
 0x306   :  { %4950 = vmatpush1.bf16.msra.mxu1 %v4949_v17  ;;  %v2486_v17 = vld [vmem:[#allocation10 + $0x368] sm:$0xff]  ;;  %v4969_v25 = vpack.c.bf16 %v2477_v13, %v2473_v19  ;;  %v2513_v10 = vld [vmem:[#allocation10 + $0x440] sm:$0xff] }
 0x307   :  { %4952 = vmatprep.subr.bf16.mxu1 %v4951_v24  ;;  %v2735_v24 = vld [vmem:[#allocation10 + $0xb30] sm:$0xff]  ;;  %v4971_v29 = vpack.c.bf16 %v2486_v17, %v2482_v36  ;;  %v2517_v11 = vld [vmem:[#allocation10 + $0x460] sm:$0xff]  ;;  %v2526_v19 = vld [vmem:[#allocation10 + $0x4a8] sm:$0xff]  ;;  %v6700_v36 = vand.u32 127, %v191_v63  ;;  %v6345_v63 = vmov 0.0  }
 0x308   :  { %5270 = vmatpush1.bf16.msra.mxu0 %v5269_v28  ;;  %v2744_v28 = vld [vmem:[#allocation10 + $0xb78] sm:$0xff]  ;;  %v5289_v32 = vpack.c.bf16 %v2735_v24, %v2731_v22  ;;  %v5969_v13 = vld [vmem:[#allocation20] sm:$0xff]  ;;  %v5970_v17 = vld [vmem:[#allocation20 + $0x18] sm:$0xff] }
 0x309   :  { %5272 = vmatprep.subr.bf16.mxu0 %v5271_v31  ;;  %v2485_v31 = vld [vmem:[#allocation10 + $0x360] sm:$0xff]  ;;  %v5291_v33 = vpack.c.bf16 %v2744_v28, %v2740_v26  ;;  %vm3190_vm0 = vcmp.eq.s32.totalorder %v6624_v0, %v6700_v36  ;;  %v2530_v28 = vld [vmem:[#allocation10 + $0x4c8] sm:$0xff] }
 0x30a   :  { %4954 = vmatpush1.bf16.msra.mxu1 %v4953_v7  ;;  %v2494_v7 = vld [vmem:[#allocation10 + $0x3a8] sm:$0xff]  ;;  %v4973_v51 = vpack.c.bf16 %v2485_v31, %v2481_v30  ;;  %v2525_v26 = vld [vmem:[#allocation10 + $0x4a0] sm:$0xff]  ;;  %vm3191_vm3 = vmxor %vm3190_vm0, %vm6344_vm2 }
 0x30b   :  { %4956 = vmatprep.subr.bf16.mxu1 %v4955_v47  ;;  %v2743_v47 = vld [vmem:[#allocation10 + $0xb70] sm:$0xff]  ;;  %v4975_v23 = vpack.c.bf16 %v2494_v7, %v2490_v6  ;;  %v2529_v6 = vld [vmem:[#allocation10 + $0x4c0] sm:$0xff] }
 0x30c   :  { %5274 = vmatpush1.bf16.msra.mxu0 %v5273_v38  ;;  %v2752_v38 = vld [vmem:[#allocation10 + $0xbb8] sm:$0xff]  ;;  %v5293_v27 = vpack.c.bf16 %v2743_v47, %v2739_v35  ;;  %v2533_v7 = vld [vmem:[#allocation10 + $0x4e0] sm:$0xff]  ;;  %v2538_v35 = vld [vmem:[#allocation10 + $0x508] sm:$0xff] }
 0x30d   :  { %5276 = vmatprep.subr.bf16.mxu0 %v5275_v41  ;;  %v2493_v41 = vld [vmem:[#allocation10 + $0x3a0] sm:$0xff]  ;;  %v5295_v44 = vpack.c.bf16 %v2752_v38, %v2748_v2  ;;  %v2542_v47 = vld [vmem:[#allocation10 + $0x528] sm:$0xff] }
 0x30e   :  { %4958 = vmatpush1.bf16.msra.mxu1 %v4957_v43  ;;  %v2502_v43 = vld [vmem:[#allocation10 + $0x3e8] sm:$0xff]  ;;  %v4977_v48 = vpack.c.bf16 %v2493_v41, %v2489_v40  ;;  %v4999_v2 = vpack.c.bf16 %v2542_v47, %v2538_v35  ;;  %v2537_v38 = vld [vmem:[#allocation10 + $0x500] sm:$0xff] }
 0x30f   :  { %4960 = vmatprep.subr.bf16.mxu1 %v4959_v46  ;;  %v2751_v46 = vld [vmem:[#allocation10 + $0xbb0] sm:$0xff]  ;;  %v4979_v52 = vpack.c.bf16 %v2502_v43, %v2498_v42  ;;  %v2546_v40 = vld [vmem:[#allocation10 + $0x548] sm:$0xff]  ;;  %v2545_v43 = vld [vmem:[#allocation10 + $0x540] sm:$0xff] }
 0x310   :  { %5278 = vmatpush1.bf16.msra.mxu0 %v5277_v50  ;;  %v2760_v50 = vld [vmem:[#allocation10 + $0xbf8] sm:$0xff]  ;;  %v5297_v55 = vpack.c.bf16 %v2751_v46, %v2747_v45  ;;  %v2550_v41 = vld [vmem:[#allocation10 + $0x568] sm:$0xff]  ;;  %v2601_v35 = vld [vmem:[#allocation10 + $0x700] sm:$0xff] }
 0x311   :  { %5280 = vmatprep.subr.bf16.mxu0 %v5279_v54  ;;  %v2501_v54 = vld [vmem:[#allocation10 + $0x3e0] sm:$0xff]  ;;  %v5299_v58 = vpack.c.bf16 %v2760_v50, %v2756_v49  ;;  %v5003_v42 = vpack.c.bf16 %v2550_v41, %v2546_v40  ;;  %v2554_v45 = vld [vmem:[#allocation10 + $0x588] sm:$0xff] }
 0x312   :  { %4962 = vmatpush1.bf16.msra.mxu1 %v4961_v57  ;;  %v2510_v57 = vld [vmem:[#allocation10 + $0x428] sm:$0xff]  ;;  %v4981_v61 = vpack.c.bf16 %v2501_v54, %v2497_v53  ;;  %v2553_v50 = vld [vmem:[#allocation10 + $0x580] sm:$0xff] }
 0x313   :  { %4964 = vmatprep.subr.bf16.mxu1 %v4963_v60  ;;  %v2759_v60 = vld [vmem:[#allocation10 + $0xbf0] sm:$0xff]  ;;  %v4983_v62 = vpack.c.bf16 %v2510_v57, %v2506_v56  ;;  %v2558_v46 = vld [vmem:[#allocation10 + $0x5a8] sm:$0xff]  ;;  %v2605_v47 = vld [vmem:[#allocation10 + $0x720] sm:$0xff] }
 0x314   :  { %5282 = vmatpush1.bf16.msra.mxu0 %v5281_v16  ;;  %v2505_v16 = vld [vmem:[#allocation10 + $0x400] sm:$0xff]  ;;  %v5301_v37 = vpack.c.bf16 %v2759_v60, %v2755_v59  ;;  %v3152_v22 = vpop.permute.xlu0 %3151  ;;  %v5007_v49 = vpack.c.bf16 %v2558_v46, %v2554_v45  ;;  %v2562_v53 = vld [vmem:[#allocation10 + $0x5c8] sm:$0xff] }
 0x315   :  { %5284 = vmatprep.subr.bf16.mxu0 %v5283_v5  ;;  %v2514_v5 = vld [vmem:[#allocation10 + $0x448] sm:$0xff]  ;;  %v4985_v14 = vpack.c.bf16 %v2509_v4, %v2505_v16  ;;  %v2561_v59 = vld [vmem:[#allocation10 + $0x5c0] sm:$0xff] }
 0x316   :  { %4966 = vmatpush1.bf16.msra.mxu1 %v4965_v9  ;;  %v4987_v9 = vpack.c.bf16 %v2518_v8, %v2514_v5  ;;  %v2566_v54 = vld [vmem:[#allocation10 + $0x5e8] sm:$0xff]  ;;  %v2565_v60 = vld [vmem:[#allocation10 + $0x5e0] sm:$0xff] }
 0x317   :  { %4968 = vmatprep.subr.bf16.mxu1 %v4967_v12  ;;  %v2522_v12 = vld [vmem:[#allocation10 + $0x488] sm:$0xff]  ;;  %v5013_v16 = vpack.c.bf16 %v2565_v60, %v2561_v59  ;;  %v2573_v5 = vld [vmem:[#allocation10 + $0x620] sm:$0xff] }
 0x318   :  { %5286 = vmatpush1.bf16.msra.mxu0 %v5285_v15  ;;  %v4676_v15 = vld [vmem:[#allocation8] ss:$0 sm:$0xff]  ;;  %v4991_v24 = vpack.c.bf16 %v2526_v19, %v2522_v12  ;;  %v2578_v8 = vld [vmem:[#allocation10 + $0x648] sm:$0xff]  ;;  %v2581_v12 = vld [vmem:[#allocation10 + $0x660] sm:$0xff] }
 0x319   :  { %5288 = vmatprep.subr.bf16.mxu0 %v5287_v18  ;;  %v4989_v18 = vpack.c.bf16 %v2517_v11, %v2513_v10  ;;  %vm3157_vm1 = vcmp.eq.s32.totalorder %v3152_v22, %v4676_v15  ;;  %v2577_v11 = vld [vmem:[#allocation10 + $0x640] sm:$0xff]  ;;  %v2586_v19 = vld [vmem:[#allocation10 + $0x688] sm:$0xff] }
 0x31a   :  { %4970 = vmatpush1.bf16.msra.mxu1 %v4969_v25  ;;  %v2521_v25 = vld [vmem:[#allocation10 + $0x480] sm:$0xff]  ;;  %vm3158_vm5 = vmxor %vm3157_vm1, %vm6344_vm2  ;;  %v5021_v15 = vpack.c.bf16 %v2581_v12, %v2577_v11 }
 0x31b   :  { %4972 = vmatprep.subr.bf16.mxu1 %v4971_v29  ;;  %v2534_v29 = vld [vmem:[#allocation10 + $0x4e8] sm:$0xff]  ;;  %vm6709_vm6 = vmand %vm3157_vm1, %vm3191_vm3  ;;  %v6714_v31 = vsel %vm3158_vm5, 1.0, %v6345_v63  ;;  %v2589_v22 = vld [vmem:[#allocation10 + $0x6a0] sm:$0xff] }
 0x31c   :  { %5290 = vmatpush1.bf16.msra.mxu0 %v5289_v32  ;;  %v4995_v32 = vpack.c.bf16 %v2534_v29, %v2530_v28  ;;  %v2593_v29 = vld [vmem:[#allocation10 + $0x6c0] sm:$0xff] }
 0x31d   :  { %5292 = vmatprep.subr.bf16.mxu0 %v5291_v33  ;;  %v3172_v33 = vsel %vm3162_vm4, %v6714_v31, 0.0  ;;  %v2609_v40 = vld [vmem:[#allocation10 + $0x740] sm:$0xff] }
 0x31e   :  { %4974 = vmatpush1.bf16.msra.mxu1 %v4973_v51  ;;  %3173 = vadd.xlane.f32.xlu0 %v3172_v33  ;;  %v4997_v51 = vpack.c.bf16 %v2533_v7, %v2529_v6  ;;  %v2606_v6 = vld [vmem:[#allocation10 + $0x728] sm:$0xff]  ;;  %v2613_v41 = vld [vmem:[#allocation10 + $0x760] sm:$0xff] }
 0x31f   :  { %4976 = vmatprep.subr.bf16.mxu1 %v4975_v23  ;;  %v2541_v23 = vld [vmem:[#allocation10 + $0x520] sm:$0xff] }
 0x320   :  { %5294 = vmatpush1.bf16.msra.mxu0 %v5293_v27  ;;  %v5001_v27 = vpack.c.bf16 %v2541_v23, %v2537_v38  ;;  %v5033_v38 = vpack.c.bf16 %v2605_v47, %v2601_v35  ;;  %v2617_v45 = vld [vmem:[#allocation10 + $0x780] sm:$0xff] }
 0x321   :  { %5296 = vmatprep.subr.bf16.mxu0 %v5295_v44  ;;  %v2549_v44 = vld [vmem:[#allocation10 + $0x560] sm:$0xff] }
 0x322   :  { %4978 = vmatpush1.bf16.msra.mxu1 %v4977_v48  ;;  %v5005_v48 = vpack.c.bf16 %v2549_v44, %v2545_v43  ;;  %v5037_v43 = vpack.c.bf16 %v2613_v41, %v2609_v40  ;;  %v2621_v46 = vld [vmem:[#allocation10 + $0x7a0] sm:$0xff] }
 0x323   :  { %4980 = vmatprep.subr.bf16.mxu1 %v4979_v52  ;;  %v2557_v52 = vld [vmem:[#allocation10 + $0x5a0] sm:$0xff] }
 0x324   :  { %5298 = vmatpush1.bf16.msra.mxu0 %v5297_v55  ;;  %v5009_v56 = vpack.c.bf16 %v2557_v52, %v2553_v50  ;;  %v5041_v50 = vpack.c.bf16 %v2621_v46, %v2617_v45  ;;  %v2633_v60 = vld [vmem:[#allocation10 + $0x800] sm:$0xff] }
 0x325   :  { %5300 = vmatprep.subr.bf16.mxu0 %v5299_v58  ;;  %v5011_v58 = vpack.c.bf16 %v2566_v54, %v2562_v53  ;;  %v2625_v53 = vld [vmem:[#allocation10 + $0x7c0] sm:$0xff] }
 0x326   :  { %4982 = vmatpush1.bf16.msra.mxu1 %v4981_v61  ;;  %v2570_v61 = vld [vmem:[#allocation10 + $0x608] sm:$0xff]  ;;  %v2629_v54 = vld [vmem:[#allocation10 + $0x7e0] sm:$0xff] }
 0x327   :  { %4984 = vmatprep.subr.bf16.mxu1 %v4983_v62  ;;  %v2574_v62 = vld [vmem:[#allocation10 + $0x628] sm:$0xff]  ;;  %v2673_v47 = vld [vmem:[#allocation10 + $0x940] sm:$0xff] }
 0x328   :  { %5302 = vmatpush1.bf16.msra.mxu0 %v5301_v37  ;;  %v5015_v4 = vpack.c.bf16 %v2574_v62, %v2570_v61  ;;  %v2569_v37 = vld [vmem:[#allocation10 + $0x600] sm:$0xff]  ;;  %v2642_v62 = vld [vmem:[#allocation10 + $0x848] sm:$0xff] }
 0x329   :  { %3278 = vmatmul.mubr.f32.vlgmr.msra.gmra.mrb[18].mxu1 %v5969_v13  ;;  %4879 = vmatprep.subr.mxu0 %v6345_v63  ;;  %v2590_v13 = vld [vmem:[#allocation10 + $0x6a8] sm:$0xff]  ;;  %v2637_v61 = vld [vmem:[#allocation10 + $0x820] sm:$0xff] }
 0x32a   :  { %4986 = vmatpush1.bf16.msra.mxu1 %v4985_v14  ;;  %3348 = vmatprep.mubr.f32.mxu1 %v5970_v17  ;;  %v2582_v14 = vld [vmem:[#allocation10 + $0x668] sm:$0xff]  ;;  %v5023_v17 = vpack.c.bf16 %v2590_v13, %v2586_v19  ;;  %v2649_v19 = vld [vmem:[#allocation10 + $0x880] sm:$0xff] }
 0x32b   :  { %3633 = vmatmul.mubr.f32.vlgmr.msra.gmra.mrb[22].mxu0 %v6684_v34  ;;  %4988 = vmatprep.subr.bf16.mxu1 %v4987_v9  ;;  %v4993_v34 = vpack.c.bf16 %v2525_v26, %v2521_v25  ;;  %v5017_v9 = vpack.c.bf16 %v2573_v5, %v2569_v37  ;;  %v5019_v10 = vpack.c.bf16 %v2582_v14, %v2578_v8  ;;  %v2598_v25 = vld [vmem:[#allocation10 + $0x6e8] sm:$0xff]  ;;  %v2641_v5 = vld [vmem:[#allocation10 + $0x840] sm:$0xff] }
 0x32c   :  { %v2645_v8 = vld [vmem:[#allocation10 + $0x860] sm:$0xff]  ;;  %v2650_v14 = vld [vmem:[#allocation10 + $0x888] sm:$0xff]  ;;  %4881 = vmatprep.mubr.msk.f32.mxu0 %vm6346_vm10, %v6345_v63 }
 0x32d   :  { %v5053_v11 = vpack.c.bf16 %v2645_v8, %v2641_v5  ;;  %v2653_v13 = vld [vmem:[#allocation10 + $0x8a0] sm:$0xff] }
 0x32e   :  { %4990 = vmatpush1.bf16.msra.mxu1 %v4989_v18  ;;  %v2585_v18 = vld [vmem:[#allocation10 + $0x680] sm:$0xff] }
 0x32f   :  { %4992 = vmatprep.subr.bf16.mxu1 %v4991_v24  ;;  %v2594_v24 = vld [vmem:[#allocation10 + $0x6c8] sm:$0xff]  ;;  %v5025_v26 = vpack.c.bf16 %v2589_v22, %v2585_v18  ;;  %v5057_v18 = vpack.c.bf16 %v2653_v13, %v2649_v19  ;;  %v2681_v41 = vld [vmem:[#allocation10 + $0x980] sm:$0xff] }
 0x330   :  { %v5027_v28 = vpack.c.bf16 %v2598_v25, %v2594_v24  ;;  %v2657_v24 = vld [vmem:[#allocation10 + $0x8c0] sm:$0xff] }
 0x331   :  { %v2661_v25 = vld [vmem:[#allocation10 + $0x8e0] sm:$0xff] }
 0x332   :  { %4994 = vmatpush1.bf16.msra.mxu1 %v4993_v34  ;;  %v2597_v34 = vld [vmem:[#allocation10 + $0x6e0] sm:$0xff] }
 0x333   :  { %4996 = vmatprep.subr.bf16.mxu1 %v4995_v32  ;;  %v2602_v32 = vld [vmem:[#allocation10 + $0x708] sm:$0xff]  ;;  %v5029_v7 = vpack.c.bf16 %v2597_v34, %v2593_v29  ;;  %v5061_v29 = vpack.c.bf16 %v2661_v25, %v2657_v24  ;;  %v2689_v46 = vld [vmem:[#allocation10 + $0x9c0] sm:$0xff] }
 0x334   :  { %v5031_v33 = vpack.c.bf16 %v2606_v6, %v2602_v32  ;;  %v2669_v32 = vld [vmem:[#allocation10 + $0x920] sm:$0xff]  ;;  %v2674_v6 = vld [vmem:[#allocation10 + $0x948] sm:$0xff] }
 0x335   :  { %v2713_v8 = vld [vmem:[#allocation10 + $0xa80] sm:$0xff] }
 0x336   :  { %4998 = vmatpush1.bf16.msra.mxu1 %v4997_v51  ;;  %v2610_v51 = vld [vmem:[#allocation10 + $0x748] sm:$0xff]  ;;  %v2721_v19 = vld [vmem:[#allocation10 + $0xac0] sm:$0xff] }
 0x337   :  { %5000 = vmatprep.subr.bf16.mxu1 %v4999_v2  ;;  %v2614_v2 = vld [vmem:[#allocation10 + $0x768] sm:$0xff]  ;;  %v2725_v13 = vld [vmem:[#allocation10 + $0xae0] sm:$0xff] }
 0x338   :  { %v5035_v23 = vpack.c.bf16 %v2614_v2, %v2610_v51  ;;  %v2677_v51 = vld [vmem:[#allocation10 + $0x960] sm:$0xff]  ;;  %v2682_v2 = vld [vmem:[#allocation10 + $0x988] sm:$0xff] }
 0x339   :  { %v2729_v24 = vld [vmem:[#allocation10 + $0xb00] sm:$0xff] }
 0x33a   :  { %5002 = vmatpush1.bf16.msra.mxu1 %v5001_v27  ;;  %v2618_v27 = vld [vmem:[#allocation10 + $0x788] sm:$0xff]  ;;  %v2733_v25 = vld [vmem:[#allocation10 + $0xb20] sm:$0xff] }
 0x33b   :  { %5004 = vmatprep.subr.bf16.mxu1 %v5003_v42  ;;  %v2622_v42 = vld [vmem:[#allocation10 + $0x7a8] sm:$0xff] }
 0x33c   :  { %v5039_v44 = vpack.c.bf16 %v2622_v42, %v2618_v27  ;;  %v2685_v27 = vld [vmem:[#allocation10 + $0x9a0] sm:$0xff]  ;;  %v2690_v42 = vld [vmem:[#allocation10 + $0x9c8] sm:$0xff] }
 0x33e   :  { %v6718_v55 = vpop.f32.mrb[20].mxu0  ;;  %5006 = vmatpush1.bf16.msra.mxu1 %v5005_v48  ;;  %v2626_v48 = vld [vmem:[#allocation10 + $0x7c8] sm:$0xff] }
 0x33f   :  { %v3078_v57 = vpop.f32.mrb[21].mxu0  ;;  %5008 = vmatprep.subr.bf16.mxu1 %v5007_v49  ;;  %v2630_v49 = vld [vmem:[#allocation10 + $0x7e8] sm:$0xff] }
 0x340   :  { %v5043_v52 = vpack.c.bf16 %v2630_v49, %v2626_v48  ;;  %v2638_v57 = vld [vmem:[#allocation10 + $0x828] sm:$0xff]  ;;  %v2693_v48 = vld [vmem:[#allocation10 + $0x9e0] sm:$0xff] }
 0x341   :  { %v2698_v49 = vld [vmem:[#allocation10 + $0xa08] sm:$0xff] }
 0x342   :  { %5010 = vmatpush1.bf16.msra.mxu1 %v5009_v56  ;;  %v2634_v56 = vld [vmem:[#allocation10 + $0x808] sm:$0xff] }
 0x343   :  { %5012 = vmatprep.subr.bf16.mxu1 %v5011_v58  ;;  %v5045_v58 = vpack.c.bf16 %v2629_v54, %v2625_v53  ;;  %v5047_v59 = vpack.c.bf16 %v2638_v57, %v2634_v56  ;;  %v2697_v54 = vld [vmem:[#allocation10 + $0xa00] sm:$0xff]  ;;  %v2706_v57 = vld [vmem:[#allocation10 + $0xa48] sm:$0xff] }
 0x344   :  { %v2701_v56 = vld [vmem:[#allocation10 + $0xa20] sm:$0xff] }
 0x346   :  { %5014 = vmatpush1.bf16.msra.mxu1 %v5013_v16  ;;  %v2646_v16 = vld [vmem:[#allocation10 + $0x868] sm:$0xff] }
 0x347   :  { %5016 = vmatprep.subr.bf16.mxu1 %v5015_v4  ;;  %v5049_v4 = vpack.c.bf16 %v2637_v61, %v2633_v60  ;;  %v5051_v37 = vpack.c.bf16 %v2646_v16, %v2642_v62  ;;  %v2705_v61 = vld [vmem:[#allocation10 + $0xa40] sm:$0xff]  ;;  %v2714_v16 = vld [vmem:[#allocation10 + $0xa88] sm:$0xff] }
 0x348   :  { %v2709_v62 = vld [vmem:[#allocation10 + $0xa60] sm:$0xff] }
 0x34a   :  { %5018 = vmatpush1.bf16.msra.mxu1 %v5017_v9  ;;  %v2654_v9 = vld [vmem:[#allocation10 + $0x8a8] sm:$0xff] }
 0x34b   :  { %5020 = vmatprep.subr.bf16.mxu1 %v5019_v10  ;;  %v5971_v10 = vld [vmem:[#allocation20 + $0x10] sm:$0xff]  ;;  %v5055_v12 = vpack.c.bf16 %v2654_v9, %v2650_v14  ;;  %v2717_v14 = vld [vmem:[#allocation10 + $0xaa0] sm:$0xff]  ;;  %v2722_v9 = vld [vmem:[#allocation10 + $0xac8] sm:$0xff] }
 0x34e   :  { %5022 = vmatpush1.bf16.msra.mxu1 %v5021_v15  ;;  %v2658_v15 = vld [vmem:[#allocation10 + $0x8c8] sm:$0xff] }
 0x34f   :  { %5024 = vmatprep.subr.bf16.mxu1 %v5023_v17  ;;  %v2662_v17 = vld [vmem:[#allocation10 + $0x8e8] sm:$0xff] }
 0x350   :  { %v5059_v22 = vpack.c.bf16 %v2662_v17, %v2658_v15  ;;  %v2730_v15 = vld [vmem:[#allocation10 + $0xb08] sm:$0xff] }
 0x351   :  { %v2734_v17 = vld [vmem:[#allocation10 + $0xb28] sm:$0xff] }
 0x352   :  { %5026 = vmatpush1.bf16.msra.mxu1 %v5025_v26  ;;  %v2666_v26 = vld [vmem:[#allocation10 + $0x908] sm:$0xff] }
 0x353   :  { %5028 = vmatprep.subr.bf16.mxu1 %v5027_v28  ;;  %v2670_v28 = vld [vmem:[#allocation10 + $0x928] sm:$0xff] }
 0x354   :  { %v5063_v34 = vpack.c.bf16 %v2670_v28, %v2666_v26  ;;  %v2738_v26 = vld [vmem:[#allocation10 + $0xb48] sm:$0xff] }
 0x355   :  { %v2742_v28 = vld [vmem:[#allocation10 + $0xb68] sm:$0xff] }
 0x356   :  { %5030 = vmatpush1.bf16.msra.mxu1 %v5029_v7  ;;  %v2678_v7 = vld [vmem:[#allocation10 + $0x968] sm:$0xff] }
 0x357   :  { %5032 = vmatprep.subr.bf16.mxu1 %v5031_v33  ;;  %v5067_v35 = vpack.c.bf16 %v2678_v7, %v2674_v6  ;;  %v2746_v6 = vld [vmem:[#allocation10 + $0xb88] sm:$0xff] }
 0x358   :  { %v2750_v7 = vld [vmem:[#allocation10 + $0xba8] sm:$0xff] }
 0x35a   :  { %5034 = vmatpush1.bf16.msra.mxu1 %v5033_v38  ;;  %v2686_v38 = vld [vmem:[#allocation10 + $0x9a8] sm:$0xff] }
 0x35b   :  { %5036 = vmatprep.subr.bf16.mxu1 %v5035_v23  ;;  %v5069_v23 = vpack.c.bf16 %v2677_v51, %v2673_v47  ;;  %v5071_v40 = vpack.c.bf16 %v2686_v38, %v2682_v2  ;;  %v2745_v47 = vld [vmem:[#allocation10 + $0xb80] sm:$0xff]  ;;  %v2754_v2 = vld [vmem:[#allocation10 + $0xbc8] sm:$0xff] }
 0x35c   :  { %v2749_v51 = vld [vmem:[#allocation10 + $0xba0] sm:$0xff]  ;;  %v2758_v38 = vld [vmem:[#allocation10 + $0xbe8] sm:$0xff] }
 0x35e   :  { %5038 = vmatpush1.bf16.msra.mxu1 %v5037_v43  ;;  %v2694_v43 = vld [vmem:[#allocation10 + $0x9e8] sm:$0xff] }
 0x35f   :  { %5040 = vmatprep.subr.bf16.mxu1 %v5039_v44  ;;  %v5073_v44 = vpack.c.bf16 %v2685_v27, %v2681_v41  ;;  %v5075_v45 = vpack.c.bf16 %v2694_v43, %v2690_v42  ;;  %v2753_v41 = vld [vmem:[#allocation10 + $0xbc0] sm:$0xff]  ;;  %v6721_v43 = vld [vmem:[#allocation20 + $0x20] sm:$0xff] }
 0x360   :  { %v2757_v27 = vld [vmem:[#allocation10 + $0xbe0] sm:$0xff] }
 0x361   :  { %v5109_v42 = vpack.c.bf16 %v2757_v27, %v2753_v41  ;;  %v2783_v41 = vld [vmem:[#allocation13 + $0xa8] sm:$0xff] }
 0x362   :  { %5042 = vmatpush1.bf16.msra.mxu1 %v5041_v50  ;;  %v2702_v50 = vld [vmem:[#allocation10 + $0xa28] sm:$0xff] }
 0x363   :  { %5044 = vmatprep.subr.bf16.mxu1 %v5043_v52  ;;  %v5077_v52 = vpack.c.bf16 %v2693_v48, %v2689_v46  ;;  %v5079_v53 = vpack.c.bf16 %v2702_v50, %v2698_v49 }
 0x366   :  { %5046 = vmatpush1.bf16.msra.mxu1 %v5045_v58  ;;  %v2710_v58 = vld [vmem:[#allocation10 + $0xa68] sm:$0xff] }
 0x367   :  { %5048 = vmatprep.subr.bf16.mxu1 %v5047_v59  ;;  %v5081_v59 = vpack.c.bf16 %v2701_v56, %v2697_v54  ;;  %v5083_v60 = vpack.c.bf16 %v2710_v58, %v2706_v57 }
 0x369   :  { %3349 = vmatmul.mubr.f32.vlgmr.msra.gmra.mrb[18].mxu1 %v5971_v10  ;;  %v2726_v10 = vld [vmem:[#allocation10 + $0xae8] sm:$0xff] }
 0x36a   :  { %5050 = vmatpush1.bf16.msra.mxu1 %v5049_v4  ;;  %3419 = vmatprep.mubr.f32.mxu1 %v6686_v39  ;;  %v2665_v39 = vld [vmem:[#allocation10 + $0x900] sm:$0xff]  ;;  %v2718_v4 = vld [vmem:[#allocation10 + $0xaa8] sm:$0xff] }
 0x36b   :  { %5052 = vmatprep.subr.bf16.mxu1 %v5051_v37  ;;  %v5065_v33 = vpack.c.bf16 %v2669_v32, %v2665_v39  ;;  %v5085_v37 = vpack.c.bf16 %v2709_v62, %v2705_v61  ;;  %v5087_v5 = vpack.c.bf16 %v2718_v4, %v2714_v16  ;;  %v2737_v39 = vld [vmem:[#allocation10 + $0xb40] sm:$0xff] }
 0x36c   :  { %v2741_v32 = vld [vmem:[#allocation10 + $0xb60] sm:$0xff] }
 0x36e   :  { %5054 = vmatpush1.bf16.msra.mxu1 %v5053_v11  ;;  %v5089_v11 = vpack.c.bf16 %v2717_v14, %v2713_v8 }
 0x36f   :  { %5056 = vmatprep.subr.bf16.mxu1 %v5055_v12  ;;  %v5091_v12 = vpack.c.bf16 %v2726_v10, %v2722_v9  ;;  %v4679_v10 = vsel %vm3190_vm0, 1.0, %v6345_v63 }
 0x372   :  { %5058 = vmatpush1.bf16.msra.mxu1 %v5057_v18  ;;  %v5093_v18 = vpack.c.bf16 %v2725_v13, %v2721_v19 }
 0x373   :  { %5060 = vmatprep.subr.bf16.mxu1 %v5059_v22  ;;  %v5095_v22 = vpack.c.bf16 %v2734_v17, %v2730_v15 }
 0x376   :  { %5062 = vmatpush1.bf16.msra.mxu1 %v5061_v29  ;;  %v5097_v29 = vpack.c.bf16 %v2733_v25, %v2729_v24 }
 0x377   :  { %5064 = vmatprep.subr.bf16.mxu1 %v5063_v34  ;;  %v5099_v34 = vpack.c.bf16 %v2742_v28, %v2738_v26  ;;  %v2778_v28 = vld [vmem:[#allocation13 + $0x80] sm:$0xff] }
 0x37a   :  { %5066 = vmatpush1.bf16.msra.mxu1 %v5065_v33  ;;  %v5101_v33 = vpack.c.bf16 %v2741_v32, %v2737_v39 }
 0x37b   :  { %5068 = vmatprep.subr.bf16.mxu1 %v5067_v35  ;;  %v5103_v35 = vpack.c.bf16 %v2750_v7, %v2746_v6  ;;  %v2762_v7 = vld [vmem:[#allocation13] sm:$0xff] }
 0x37e   :  { %5070 = vmatpush1.bf16.msra.mxu1 %v5069_v23  ;;  %v5105_v23 = vpack.c.bf16 %v2749_v51, %v2745_v47  ;;  %v2781_v47 = vld [vmem:[#allocation13 + $0x98] sm:$0xff] }
 0x37f   :  { %5072 = vmatprep.subr.bf16.mxu1 %v5071_v40  ;;  %v5107_v40 = vpack.c.bf16 %v2758_v38, %v2754_v2  ;;  %v2764_v38 = vld [vmem:[#allocation13 + $0x10] sm:$0xff] }
 0x382   :  { %5074 = vmatpush1.bf16.msra.mxu1 %v5073_v44 }
 0x383   :  { %5076 = vmatprep.subr.bf16.mxu1 %v5075_v45 }
 0x386   :  { %5078 = vmatpush1.bf16.msra.mxu1 %v5077_v52 }
 0x387   :  { %5080 = vmatprep.subr.bf16.mxu1 %v5079_v53 }
 0x38a   :  { %5082 = vmatpush1.bf16.msra.mxu1 %v5081_v59 }
 0x38b   :  { %5084 = vmatprep.subr.bf16.mxu1 %v5083_v60 }
 0x38e   :  { %5086 = vmatpush1.bf16.msra.mxu1 %v5085_v37 }
 0x38f   :  { %5088 = vmatprep.subr.bf16.mxu1 %v5087_v5 }
 0x392   :  { %5090 = vmatpush1.bf16.msra.mxu1 %v5089_v11 }
 0x393   :  { %5092 = vmatprep.subr.bf16.mxu1 %v5091_v12 }
 0x396   :  { %5094 = vmatpush1.bf16.msra.mxu1 %v5093_v18 }
 0x397   :  { %5096 = vmatprep.subr.bf16.mxu1 %v5095_v22 }
 0x39a   :  { %5098 = vmatpush1.bf16.msra.mxu1 %v5097_v29  ;;  %v2779_v29 = vld [vmem:[#allocation13 + $0x88] sm:$0xff] }
 0x39b   :  { %5100 = vmatprep.subr.bf16.mxu1 %v5099_v34  ;;  %v5303_v6 = vpack.c.bf16 %v2779_v29, %v2778_v28 }
 0x39e   :  { %5102 = vmatpush1.bf16.msra.mxu1 %v5101_v33  ;;  %v2763_v33 = vld [vmem:[#allocation13 + $0x8] sm:$0xff] }
 0x39f   :  { %5104 = vmatprep.subr.bf16.mxu1 %v5103_v35  ;;  %v2780_v35 = vld [vmem:[#allocation13 + $0x90] sm:$0xff]  ;;  %v5305_v51 = vpack.c.bf16 %v2763_v33, %v2762_v7 }
 0x3a0   :  { %v5307_v2 = vpack.c.bf16 %v2781_v47, %v2780_v35  ;;  %v2812_v35 = vld [vmem:[#allocation13 + $0x190] sm:$0xff]  ;;  %v2813_v47 = vld [vmem:[#allocation13 + $0x198] sm:$0xff] }
 0x3a2   :  { %5106 = vmatpush1.bf16.msra.mxu1 %v5105_v23  ;;  %v2765_v23 = vld [vmem:[#allocation13 + $0x18] sm:$0xff] }
 0x3a3   :  { %5108 = vmatprep.subr.bf16.mxu1 %v5107_v40  ;;  %v2782_v40 = vld [vmem:[#allocation13 + $0xa0] sm:$0xff]  ;;  %v5309_v27 = vpack.c.bf16 %v2765_v23, %v2764_v38 }
 0x3a6   :  { %5110 = vmatpush1.bf16.msra.mxu1 %v5109_v42  ;;  %v5311_v42 = vpack.c.bf16 %v2783_v41, %v2782_v40  ;;  %v5339_v40 = vpack.c.bf16 %v2813_v47, %v2812_v35  ;;  %v2797_v41 = vld [vmem:[#allocation13 + $0x118] sm:$0xff] }
 0x3a7   :  { %v2830_v47 = vld [vmem:[#allocation16 + $0x18] sm:$0xff] }
 0x3a9   :  { %3420 = vmatmul.mubr.f32.vlgmr.msra.gmra.mrb[18].mxu1 %v6721_v43 }
 0x3aa   :  { %3727 = vmatprep.mubr.f32.mxu1 %v6345_v63 }
 0x3ab   :  { %v3174_v53 = vpop.xlane.xlu0 %3173 }
 0x3ac   :  { %v3175_v54 = vrot.slane %v3174_v53, 4 }
 0x3ae   :  { %v3176_v56 = vadd.f32 %v3175_v54, %v3174_v53  ;;  %v2769_v53 = vld [vmem:[#allocation13 + $0x38] sm:$0xff]  ;;  %v2786_v54 = vld [vmem:[#allocation13 + $0xc0] sm:$0xff] }
 0x3b0   :  { %v3177_v57 = vrot.slane %v3176_v56, 2 }
 0x3b2   :  { %v3178_v58 = vadd.f32 %v3177_v57, %v3176_v56  ;;  %v2787_v56 = vld [vmem:[#allocation13 + $0xc8] sm:$0xff] }
 0x3b4   :  { %v3179_v59 = vrot.slane %v3178_v58, 1 }
 0x3b6   :  { %v3180_v60 = vadd.f32 %v3179_v59, %v3178_v58  ;;  %v5319_v58 = vpack.c.bf16 %v2787_v56, %v2786_v54  ;;  %v2770_v59 = vld [vmem:[#allocation13 + $0x40] sm:$0xff]  ;;  %v2800_v56 = vld [vmem:[#allocation13 + $0x130] sm:$0xff] }
 0x3b8   :  { %v3182_v61 = vmax.f32 %v3180_v60, 1.0  ;;  %vm3181_vm7 = vcmp.gt.f32.partialorder %v3180_v60, 0.0  ;;  %v2771_v60 = vld [vmem:[#allocation13 + $0x48] sm:$0xff] }
 0x3ba   :  { %5963 = vrcp.f32 %v3182_v61  ;;  %v2788_v61 = vld [vmem:[#allocation13 + $0xd0] sm:$0xff] }
 0x3bc   :  { %v3146_v44 = vpop.f32.mrb[16].mxu1 }
 0x3bd   :  { %v5487_v45 = vadd.f32 %v3146_v44, %v6718_v55  ;;  %v3148_v46 = vpop.f32.mrb[17].mxu1  ;;  %v2766_v44 = vld [vmem:[#allocation13 + $0x20] sm:$0xff] }
 0x3be   :  { %v2784_v46 = vld [vmem:[#allocation13 + $0xb0] sm:$0xff] }
 0x3bf   :  { %v3161_v48 = vmul.f32 %v5487_v45, %v6714_v31 }
 0x3c1   :  { %v3163_v49 = vsel %vm3162_vm4, %v3161_v48, 0.0  ;;  %v2785_v48 = vld [vmem:[#allocation13 + $0xb8] sm:$0xff] }
 0x3c2   :  { %3164 = vadd.xlane.f32.xlu1 %v3163_v49 }
 0x3c4   :  { %v5964_v8 = vpop.eup %5963 }
 0x3fe   :  { %v3634_v50 = vpop.f32.mrb[22].mxu0 }
 0x3ff   :  { %v3636_v52 = vpop.f32.mrb[23].mxu0 }
 0x44f   :  { %v3165_v62 = vpop.xlane.xlu1 %3164 }
 0x450   :  { %v3166_v16 = vrot.slane %v3165_v62, 4 }
 0x452   :  { %v3167_v55 = vadd.f32 %v3166_v16, %v3165_v62  ;;  %v2789_v62 = vld [vmem:[#allocation13 + $0xd8] sm:$0xff]  ;;  %v5321_v16 = vpack.c.bf16 %v2771_v60, %v2770_v59  ;;  %v2819_v59 = vld [vmem:[#allocation13 + $0x1c8] sm:$0xff] }
 0x454   :  { %v3168_v4 = vrot.slane %v3167_v55, 2 }
 0x456   :  { %v3169_v37 = vadd.f32 %v3168_v4, %v3167_v55  ;;  %v5323_v55 = vpack.c.bf16 %v2789_v62, %v2788_v61  ;;  %v2772_v4 = vld [vmem:[#allocation13 + $0x50] sm:$0xff]  ;;  %v2802_v62 = vld [vmem:[#allocation13 + $0x140] sm:$0xff] }
 0x458   :  { %v3170_v31 = vrot.slane %v3169_v37, 1 }
 0x45a   :  { %v3171_v5 = vadd.f32 %v3170_v31, %v3169_v37  ;;  %v2773_v37 = vld [vmem:[#allocation13 + $0x58] sm:$0xff]  ;;  %v2790_v31 = vld [vmem:[#allocation13 + $0xe0] sm:$0xff] }
 0x45c   :  { %v3184_v14 = vmul.f32 %v5964_v8, %v3171_v5  ;;  %v2791_v5 = vld [vmem:[#allocation13 + $0xe8] sm:$0xff]  ;;  %v5325_v8 = vpack.c.bf16 %v2773_v37, %v2772_v4  ;;  %v2821_v4 = vld [vmem:[#allocation13 + $0x1d8] sm:$0xff] }
 0x45e   :  { %v3185_v9 = vsel %vm3181_vm7, %v3184_v14, 0.0  ;;  %v5327_v14 = vpack.c.bf16 %v2791_v5, %v2790_v31  ;;  %v2804_v5 = vld [vmem:[#allocation13 + $0x150] sm:$0xff] }
 0x45f   :  { %vm3193_vm8 = vcmp.le.f32.partialorder %v5487_v45, %v3185_v9  ;;  %v2767_v45 = vld [vmem:[#allocation13 + $0x28] sm:$0xff]  ;;  %v2774_v9 = vld [vmem:[#allocation13 + $0x60] sm:$0xff] }
 0x460   :  { %vm3194_vm9 = vmand %vm6709_vm6, %vm3193_vm8  ;;  %v5313_v49 = vpack.c.bf16 %v2767_v45, %v2766_v44  ;;  %v2815_v44 = vld [vmem:[#allocation13 + $0x1a8] sm:$0xff] }
 0x461   :  { %v4678_v11 = vsel %vm3194_vm9, 1.0, %v6345_v63 }
 0x462   :  { %v3199_v12 = vadd.f32 %v4679_v10, %v4678_v11  ;;  %4312 = vst.msk [vmem:[#allocation24] sm:$0xff] %vm3162_vm4, %v4678_v11  ;;  %v2775_v10 = vld [vmem:[#allocation13 + $0x68] sm:$0xff] }
 0x463   :  { %v5329_v11 = vpack.c.bf16 %v2775_v10, %v2774_v9  ;;  %v2823_v9 = vld [vmem:[#allocation13 + $0x1e8] sm:$0xff] }
 0x464   :  { %v3200_v19 = vsel %vm3162_vm4, %v3199_v12, 0.0 }
 0x465   :  { %3201 = vadd.xlane.f32.xlu1 %v3200_v19  ;;  %v3203_v17 = vrot.slane %v3200_v19, 4 }
 0x467   :  { %v3204_v36 = vadd.f32 %v3203_v17, %v3200_v19  ;;  %v2793_v19 = vld [vmem:[#allocation13 + $0xf8] sm:$0xff] }
 0x468   :  { %v2777_v17 = vld [vmem:[#allocation13 + $0x78] sm:$0xff] }
 0x469   :  { %v3205_v18 = vrot.slane %v3204_v36, 2 }
 0x46b   :  { %v3206_v22 = vadd.f32 %v3205_v18, %v3204_v36  ;;  %v2810_v18 = vld [vmem:[#allocation13 + $0x180] sm:$0xff] }
 0x46d   :  { %v3207_v24 = vrot.slane %v3206_v22, 1 }
 0x46f   :  { %v3208_v30 = vadd.f32 %v3207_v24, %v3206_v22  ;;  %v2811_v22 = vld [vmem:[#allocation13 + $0x188] sm:$0xff] }
 0x470   :  { %v5335_v24 = vpack.c.bf16 %v2811_v22, %v2810_v18  ;;  %v2808_v22 = vld [vmem:[#allocation13 + $0x170] sm:$0xff] }
 0x47c   :  { %v3421_v13 = vpop.f32.mrb[18].mxu1 }
 0x47d   :  { %v3423_v15 = vpop.f32.mrb[19].mxu1 }
 0x47e   :  { %3663 = vmatprep.subr.mxu1 %v3423_v15  ;;  %v2776_v15 = vld [vmem:[#allocation13 + $0x70] sm:$0xff] }
 0x47f   :  { %3664 = vmatpush1.msra.mxu1 %v3421_v13  ;;  %v5333_v36 = vpack.c.bf16 %v2777_v17, %v2776_v15  ;;  %v2825_v15 = vld [vmem:[#allocation13 + $0x1f8] sm:$0xff] }
 0x480   :  { %3734 = vmatprep.subr.mxu1 %v3636_v52  ;;  %v2768_v52 = vld [vmem:[#allocation13 + $0x30] sm:$0xff] }
 0x481   :  { %v5317_v57 = vpack.c.bf16 %v2769_v53, %v2768_v52  ;;  %v2817_v52 = vld [vmem:[#allocation13 + $0x1b8] sm:$0xff] }
 0x4f2   :  { %v3202_v25 = vpop.xlane.xlu1 %3201 }
 0x4f3   :  { %5965 = vrsqrt.f32 %v3202_v25 }
 0x4f4   :  { %5967 = vrsqrt.f32 %v3208_v30  ;;  %v6744_v30 = vld [vmem:[#allocation11] sm:$0xf] }
 0x4f5   :  { %v3643_v25 = vrot.slane %v6744_v30, %v193_v1  ;;  %v3655_v33 = vrot.slane %v6744_v30, %v205_v21 }
 0x4fd   :  { %v5966_v26 = vpop.eup %5965 }
 0x4fe   :  { %v3210_v34 = vmul.f32 %v5966_v26, %v3199_v12  ;;  %v5968_v39 = vpop.eup %5967  ;;  %v2792_v12 = vld [vmem:[#allocation13 + $0xf0] sm:$0xff]  ;;  %v3647_v26 = vrot.slane %v6744_v30, %v197_v3 }
 0x4ff   :  { %v5331_v13 = vpack.c.bf16 %v2793_v19, %v2792_v12  ;;  %v2796_v3 = vld [vmem:[#allocation13 + $0x110] sm:$0xff]  ;;  %v2806_v12 = vld [vmem:[#allocation13 + $0x160] sm:$0xff]  ;;  %v2807_v19 = vld [vmem:[#allocation13 + $0x168] sm:$0xff] }
 0x500   :  { %v6737_v32 = vmul.f32 %v5968_v39, %v3210_v34  ;;  %v2794_v39 = vld [vmem:[#allocation13 + $0x100] sm:$0xff]  ;;  %v5361_v17 = vpack.c.bf16 %v2807_v19, %v2806_v12  ;;  %v2908_v12 = vld [vmem:[#allocation16 + $0x288] sm:$0xff] }
 0x502   :  { %4680 = vmatmul.mubr.msk.f32.vlgmr.msra.gmra.mrb[20].mxu1 %vm3162_vm4, %v6737_v32 }
 0x503   :  { %3735 = vmatpush1.msra.mxu1 %v3634_v50  ;;  %3798 = vmatprep.mubr.f32.mxu1 %v6345_v63  ;;  %v5315_v50 = vpack.c.bf16 %v2785_v48, %v2784_v46  ;;  %v5341_v46 = vpack.c.bf16 %v2797_v41, %v2796_v3  ;;  %v2798_v48 = vld [vmem:[#allocation13 + $0x120] sm:$0xff]  ;;  %v2832_v3 = vld [vmem:[#allocation16 + $0x28] sm:$0xff]  ;;  %v2849_v41 = vld [vmem:[#allocation16 + $0xb0] sm:$0xff] }
 0x504   :  { %5304 = vmatprep.subr.bf16.mxu1 %v5303_v6  ;;  %v2795_v6 = vld [vmem:[#allocation13 + $0x108] sm:$0xff] }
 0x505   :  { %v5337_v1 = vpack.c.bf16 %v2795_v6, %v2794_v39  ;;  %v2827_v39 = vld [vmem:[#allocation16] sm:$0xff]  ;;  %v2828_v6 = vld [vmem:[#allocation16 + $0x8] sm:$0xff] }
 0x506   :  { %4681 = vmatmul.mubr.msk.f32.vlgmr.msra.gmra.mrb[22].mxu1 %vm3162_vm4, %v6737_v32  ;;  %v5393_v0 = vpack.c.bf16 %v2828_v6, %v2827_v39  ;;  %v5975_v39 = vld [vmem:[#allocation20 + $0x28] sm:$0xff] }
 0x507   :  { %5306 = vmatpush3.bf16.msra.mxu1 %v5305_v51 }
 0x508   :  { %5308 = vmatprep.subr.bf16.mxu1 %v5307_v2 }
 0x50b   :  { %5310 = vmatpush3.bf16.msra.mxu1 %v5309_v27 }
 0x50c   :  { %5312 = vmatprep.subr.bf16.mxu1 %v5311_v42  ;;  %v2814_v42 = vld [vmem:[#allocation13 + $0x1a0] sm:$0xff] }
 0x50d   :  { %v5343_v21 = vpack.c.bf16 %v2815_v44, %v2814_v42 }
 0x50f   :  { %5314 = vmatpush3.bf16.msra.mxu1 %v5313_v49  ;;  %v2799_v49 = vld [vmem:[#allocation13 + $0x128] sm:$0xff] }
 0x510   :  { %5316 = vmatprep.subr.bf16.mxu1 %v5315_v50  ;;  %v2816_v50 = vld [vmem:[#allocation13 + $0x1b0] sm:$0xff]  ;;  %v5345_v53 = vpack.c.bf16 %v2799_v49, %v2798_v48 }
 0x511   :  { %v5347_v54 = vpack.c.bf16 %v2817_v52, %v2816_v50  ;;  %v2852_v48 = vld [vmem:[#allocation16 + $0xc8] sm:$0xff]  ;;  %v2835_v52 = vld [vmem:[#allocation16 + $0x40] sm:$0xff] }
 0x513   :  { %5318 = vmatpush3.bf16.msra.mxu1 %v5317_v57  ;;  %v2801_v57 = vld [vmem:[#allocation13 + $0x138] sm:$0xff] }
 0x514   :  { %5320 = vmatprep.subr.bf16.mxu1 %v5319_v58  ;;  %v2818_v58 = vld [vmem:[#allocation13 + $0x1c0] sm:$0xff]  ;;  %v5349_v60 = vpack.c.bf16 %v2801_v57, %v2800_v56 }
 0x515   :  { %v5351_v61 = vpack.c.bf16 %v2819_v59, %v2818_v58  ;;  %v2854_v56 = vld [vmem:[#allocation16 + $0xd8] sm:$0xff]  ;;  %v2837_v59 = vld [vmem:[#allocation16 + $0x50] sm:$0xff] }
 0x517   :  { %5322 = vmatpush3.bf16.msra.mxu1 %v5321_v16  ;;  %v2803_v16 = vld [vmem:[#allocation13 + $0x148] sm:$0xff] }
 0x518   :  { %5324 = vmatprep.subr.bf16.mxu1 %v5323_v55  ;;  %v2820_v55 = vld [vmem:[#allocation13 + $0x1d0] sm:$0xff]  ;;  %v5353_v37 = vpack.c.bf16 %v2803_v16, %v2802_v62 }
 0x519   :  { %v5355_v31 = vpack.c.bf16 %v2821_v4, %v2820_v55  ;;  %v2856_v62 = vld [vmem:[#allocation16 + $0xe8] sm:$0xff]  ;;  %v2839_v4 = vld [vmem:[#allocation16 + $0x60] sm:$0xff] }
 0x51b   :  { %5326 = vmatpush3.bf16.msra.mxu1 %v5325_v8  ;;  %v2805_v8 = vld [vmem:[#allocation13 + $0x158] sm:$0xff] }
 0x51c   :  { %5328 = vmatprep.subr.bf16.mxu1 %v5327_v14  ;;  %v2822_v14 = vld [vmem:[#allocation13 + $0x1e0] sm:$0xff]  ;;  %v5357_v10 = vpack.c.bf16 %v2805_v8, %v2804_v5 }
 0x51d   :  { %v2858_v5 = vld [vmem:[#allocation16 + $0xf8] sm:$0xff] }
 0x51f   :  { %5330 = vmatpush3.bf16.msra.mxu1 %v5329_v11  ;;  %v5359_v11 = vpack.c.bf16 %v2823_v9, %v2822_v14  ;;  %v2841_v9 = vld [vmem:[#allocation16 + $0x70] sm:$0xff] }
 0x520   :  { %5332 = vmatprep.subr.bf16.mxu1 %v5331_v13  ;;  %v2824_v13 = vld [vmem:[#allocation13 + $0x1f0] sm:$0xff] }
 0x521   :  { %v5363_v18 = vpack.c.bf16 %v2825_v15, %v2824_v13  ;;  %v2891_v15 = vld [vmem:[#allocation16 + $0x200] sm:$0xff] }
 0x523   :  { %5334 = vmatpush3.bf16.msra.mxu1 %v5333_v36  ;;  %v3651_v36 = vrot.slane %v6744_v30, %v201_v20  ;;  %v2829_v30 = vld [vmem:[#allocation16 + $0x10] sm:$0xff] }
 0x524   :  { %5336 = vmatprep.subr.bf16.mxu1 %v5335_v24  ;;  %v2809_v24 = vld [vmem:[#allocation13 + $0x178] sm:$0xff] }
 0x5d5   :  { %v3729_v28 = vpop.f32.mrb[20].mxu1 }
 0x5d6   :  { %v3730_v29 = vadd.f32 %v3729_v28, %v3643_v25  ;;  %v3731_v34 = vpop.f32.mrb[21].mxu1  ;;  %v2843_v25 = vld [vmem:[#allocation16 + $0x80] sm:$0xff]  ;;  %v5365_v28 = vpack.c.bf16 %v2809_v24, %v2808_v22 }
 0x5d7   :  { %v3732_v7 = vadd.f32 %v3731_v34, %v3647_v26  ;;  %v2844_v26 = vld [vmem:[#allocation16 + $0x88] sm:$0xff] }
 0x5d8   :  { %v3805_v38 = vmax.f32 %v3730_v29, 0.0  ;;  %v5391_v34 = vpack.c.bf16 %v2844_v26, %v2843_v25  ;;  %v2893_v25 = vld [vmem:[#allocation16 + $0x210] sm:$0xff]  ;;  %v2894_v26 = vld [vmem:[#allocation16 + $0x218] sm:$0xff] }
 0x5d9   :  { %v3806_v51 = vmax.f32 %v3732_v7, 0.0  ;;  %v6755_v2 = vpop.f32.mrb[22].mxu1  ;;  %v2845_v7 = vld [vmem:[#allocation16 + $0x90] sm:$0xff]  ;;  %v5461_v6 = vpack.c.bf16 %v2894_v26, %v2893_v25 }
 0x5da   :  { %v3802_v23 = vpop.f32.mrb[23].mxu1  ;;  %v3801_v29 = vadd.f32 %v6755_v2, %v3651_v36  ;;  %v5397_v2 = vpack.c.bf16 %v2830_v47, %v2829_v30  ;;  %v2909_v36 = vld [vmem:[#allocation16 + $0x290] sm:$0xff] }
 0x5db   :  { %v3803_v27 = vadd.f32 %v3802_v23, %v3655_v33  ;;  %3873 = vmatprep.mubr.f32.mxu1 %v3806_v51  ;;  %v2846_v33 = vld [vmem:[#allocation16 + $0x98] sm:$0xff]  ;;  %v2847_v51 = vld [vmem:[#allocation16 + $0xa0] sm:$0xff]  ;;  %v2933_v26 = vld [vmem:[#allocation17 + $0x50] sm:$0xff] }
 0x5dc   :  { %3874 = vmatmul.mubr.f32.vlgmr.msra.gmra.mrb[24].mxu1 %v3805_v38  ;;  %v3807_v35 = vmax.f32 %v3801_v29, 0.0  ;;  %v5395_v20 = vpack.c.bf16 %v2846_v33, %v2845_v7  ;;  %v5973_v38 = vld [vmem:[#allocation20 + $0x8] sm:$0xff]  ;;  %v2895_v33 = vld [vmem:[#allocation16 + $0x220] sm:$0xff] }
 0x5dd   :  { %v3808_v45 = vmax.f32 %v3803_v27, 0.0  ;;  %5338 = vmatpush3.bf16.msra.mxu1 %v5337_v1  ;;  %v2848_v1 = vld [vmem:[#allocation16 + $0xa8] sm:$0xff]  ;;  %v2850_v27 = vld [vmem:[#allocation16 + $0xb8] sm:$0xff] }
 0x5de   :  { %5340 = vmatprep.subr.bf16.mxu1 %v5339_v40  ;;  %v5399_v23 = vpack.c.bf16 %v2848_v1, %v2847_v51  ;;  %v2831_v40 = vld [vmem:[#allocation16 + $0x20] sm:$0xff]  ;;  %v5403_v44 = vpack.c.bf16 %v2850_v27, %v2849_v41  ;;  %v2912_v29 = vld [vmem:[#allocation16 + $0x2a8] sm:$0xff]  ;;  %v2897_v51 = vld [vmem:[#allocation16 + $0x230] sm:$0xff] }
 0x5df   :  { %3943 = vmatprep.mubr.f32.mxu1 %v3808_v45  ;;  %v5401_v42 = vpack.c.bf16 %v2832_v3, %v2831_v40  ;;  %v2833_v45 = vld [vmem:[#allocation16 + $0x30] sm:$0xff]  ;;  %v2898_v1 = vld [vmem:[#allocation16 + $0x238] sm:$0xff]  ;;  %v2899_v3 = vld [vmem:[#allocation16 + $0x240] sm:$0xff] }
 0x5e0   :  { %v2900_v41 = vld [vmem:[#allocation16 + $0x248] sm:$0xff]  ;;  %v2917_v27 = vld [vmem:[#allocation16 + $0x2d0] sm:$0xff] }
 0x5e1   :  { %5342 = vmatpush3.bf16.msra.mxu1 %v5341_v46  ;;  %v2834_v46 = vld [vmem:[#allocation16 + $0x38] sm:$0xff] }
 0x5e2   :  { %5344 = vmatprep.subr.bf16.mxu1 %v5343_v21  ;;  %v2851_v21 = vld [vmem:[#allocation16 + $0xc0] sm:$0xff]  ;;  %v5405_v49 = vpack.c.bf16 %v2834_v46, %v2833_v45  ;;  %v2901_v46 = vld [vmem:[#allocation16 + $0x250] sm:$0xff] }
 0x5e3   :  { %v5407_v50 = vpack.c.bf16 %v2852_v48, %v2851_v21  ;;  %v2902_v21 = vld [vmem:[#allocation16 + $0x258] sm:$0xff]  ;;  %v2919_v48 = vld [vmem:[#allocation16 + $0x2e0] sm:$0xff] }
 0x5e5   :  { %5346 = vmatpush3.bf16.msra.mxu1 %v5345_v53  ;;  %v2836_v53 = vld [vmem:[#allocation16 + $0x48] sm:$0xff] }
 0x5e6   :  { %5348 = vmatprep.subr.bf16.mxu1 %v5347_v54  ;;  %v2853_v54 = vld [vmem:[#allocation16 + $0xd0] sm:$0xff]  ;;  %v5409_v57 = vpack.c.bf16 %v2836_v53, %v2835_v52  ;;  %v2903_v53 = vld [vmem:[#allocation16 + $0x260] sm:$0xff] }
 0x5e7   :  { %v5411_v58 = vpack.c.bf16 %v2854_v56, %v2853_v54  ;;  %v2904_v54 = vld [vmem:[#allocation16 + $0x268] sm:$0xff]  ;;  %v2921_v56 = vld [vmem:[#allocation16 + $0x2f0] sm:$0xff] }
 0x5e9   :  { %5350 = vmatpush3.bf16.msra.mxu1 %v5349_v60  ;;  %v2838_v60 = vld [vmem:[#allocation16 + $0x58] sm:$0xff] }
 0x5ea   :  { %5352 = vmatprep.subr.bf16.mxu1 %v5351_v61  ;;  %v2855_v61 = vld [vmem:[#allocation16 + $0xe0] sm:$0xff]  ;;  %v5413_v16 = vpack.c.bf16 %v2838_v60, %v2837_v59  ;;  %v2905_v60 = vld [vmem:[#allocation16 + $0x270] sm:$0xff] }
 0x5eb   :  { %v5415_v55 = vpack.c.bf16 %v2856_v62, %v2855_v61  ;;  %v2906_v61 = vld [vmem:[#allocation16 + $0x278] sm:$0xff] }
 0x5ec   :  { %v5485_v62 = vpack.c.bf16 %v2906_v61, %v2905_v60  ;;  %v2882_v60 = vld [vmem:[#allocation16 + $0x1b8] sm:$0xff] }
 0x5ed   :  { %5354 = vmatpush3.bf16.msra.mxu1 %v5353_v37  ;;  %v2840_v37 = vld [vmem:[#allocation16 + $0x68] sm:$0xff] }
 0x5ee   :  { %5356 = vmatprep.subr.bf16.mxu1 %v5355_v31  ;;  %v2857_v31 = vld [vmem:[#allocation16 + $0xf0] sm:$0xff]  ;;  %v5417_v8 = vpack.c.bf16 %v2840_v37, %v2839_v4 }
 0x5ef   :  { %v5419_v14 = vpack.c.bf16 %v2858_v5, %v2857_v31  ;;  %v2923_v5 = vld [vmem:[#allocation17] sm:$0xff] }
 0x5f1   :  { %5358 = vmatpush3.bf16.msra.mxu1 %v5357_v10  ;;  %v2842_v10 = vld [vmem:[#allocation16 + $0x78] sm:$0xff] }
 0x5f2   :  { %5360 = vmatprep.subr.bf16.mxu1 %v5359_v11  ;;  %v2907_v11 = vld [vmem:[#allocation16 + $0x280] sm:$0xff]  ;;  %v5421_v19 = vpack.c.bf16 %v2842_v10, %v2841_v9 }
 0x5f3   :  { %v5455_v13 = vpack.c.bf16 %v2908_v12, %v2907_v11  ;;  %v2925_v11 = vld [vmem:[#allocation17 + $0x10] sm:$0xff]  ;;  %v2926_v12 = vld [vmem:[#allocation17 + $0x18] sm:$0xff] }
 0x5f5   :  { %5362 = vmatpush3.bf16.msra.mxu1 %v5361_v17  ;;  %v2892_v17 = vld [vmem:[#allocation16 + $0x208] sm:$0xff] }
 0x5f6   :  { %5364 = vmatprep.subr.bf16.mxu1 %v5363_v18  ;;  %v2910_v18 = vld [vmem:[#allocation16 + $0x298] sm:$0xff]  ;;  %v5457_v22 = vpack.c.bf16 %v2892_v17, %v2891_v15  ;;  %v2928_v15 = vld [vmem:[#allocation17 + $0x28] sm:$0xff] }
 0x5f7   :  { %v5459_v24 = vpack.c.bf16 %v2910_v18, %v2909_v36  ;;  %v2929_v36 = vld [vmem:[#allocation17 + $0x30] sm:$0xff]  ;;  %v2930_v18 = vld [vmem:[#allocation17 + $0x38] sm:$0xff] }
 0x5f9   :  { %5366 = vmatpush3.bf16.msra.mxu1 %v5365_v28  ;;  %v2911_v28 = vld [vmem:[#allocation16 + $0x2a0] sm:$0xff] }
 0x5fa   :  { %5392 = vmatprep.subr.bf16.mxu1 %v5391_v34  ;;  %v5974_v34 = vld [vmem:[#allocation20] sm:$0xff]  ;;  %v5463_v7 = vpack.c.bf16 %v2912_v29, %v2911_v28  ;;  %v2934_v28 = vld [vmem:[#allocation17 + $0x58] sm:$0xff] }
 0x5fb   :  { %v2935_v29 = vld [vmem:[#allocation17 + $0x60] sm:$0xff] }
 0x5fc   :  { %3944 = vmatmul.mubr.f32.vlgmr.msra.gmra.mrb[26].mxu1 %v3807_v35  ;;  %v2913_v35 = vld [vmem:[#allocation16 + $0x2b0] sm:$0xff] }
 0x5fd   :  { %5394 = vmatpush3.bf16.msra.mxu1 %v5393_v0  ;;  %4159 = vmatprep.mubr.f32.mxu1 %v5973_v38  ;;  %v2896_v0 = vld [vmem:[#allocation16 + $0x228] sm:$0xff]  ;;  %v2915_v38 = vld [vmem:[#allocation16 + $0x2c0] sm:$0xff] }
 0x5fe   :  { %5396 = vmatprep.subr.bf16.mxu1 %v5395_v20  ;;  %v2914_v20 = vld [vmem:[#allocation16 + $0x2b8] sm:$0xff]  ;;  %v5465_v30 = vpack.c.bf16 %v2896_v0, %v2895_v33 }
 0x5ff   :  { %v5467_v47 = vpack.c.bf16 %v2914_v20, %v2913_v35 }
 0x601   :  { %5398 = vmatpush3.bf16.msra.mxu1 %v5397_v2  ;;  %v2916_v2 = vld [vmem:[#allocation16 + $0x2c8] sm:$0xff] }
 0x602   :  { %5400 = vmatprep.subr.bf16.mxu1 %v5399_v23  ;;  %v5469_v23 = vpack.c.bf16 %v2898_v1, %v2897_v51  ;;  %v5471_v40 = vpack.c.bf16 %v2916_v2, %v2915_v38  ;;  %v2875_v1 = vld [vmem:[#allocation16 + $0x180] sm:$0xff]  ;;  %v2876_v38 = vld [vmem:[#allocation16 + $0x188] sm:$0xff] }
 0x603   :  { %v5423_v2 = vpack.c.bf16 %v2876_v38, %v2875_v1 }
 0x605   :  { %5402 = vmatpush3.bf16.msra.mxu1 %v5401_v42  ;;  %v2918_v42 = vld [vmem:[#allocation16 + $0x2d8] sm:$0xff] }
 0x606   :  { %5404 = vmatprep.subr.bf16.mxu1 %v5403_v44  ;;  %v5473_v44 = vpack.c.bf16 %v2900_v41, %v2899_v3  ;;  %v5475_v45 = vpack.c.bf16 %v2918_v42, %v2917_v27  ;;  %v4682_v3 = vld [vmem:[#allocation14] ss:$0 sm:$0xff]  ;;  %v2877_v41 = vld [vmem:[#allocation16 + $0x190] sm:$0xff] }
 0x607   :  { %v2878_v27 = vld [vmem:[#allocation16 + $0x198] sm:$0xff] }
 0x609   :  { %5406 = vmatpush3.bf16.msra.mxu1 %v5405_v49  ;;  %v2920_v49 = vld [vmem:[#allocation16 + $0x2e8] sm:$0xff] }
 0x60a   :  { %5408 = vmatprep.subr.bf16.mxu1 %v5407_v50  ;;  %v5477_v50 = vpack.c.bf16 %v2902_v21, %v2901_v46  ;;  %v5479_v52 = vpack.c.bf16 %v2920_v49, %v2919_v48  ;;  %v5427_v21 = vpack.c.bf16 %v2878_v27, %v2877_v41  ;;  %v2861_v48 = vld [vmem:[#allocation16 + $0x110] sm:$0xff]  ;;  %v2862_v49 = vld [vmem:[#allocation16 + $0x118] sm:$0xff] }
 0x60d   :  { %5410 = vmatpush3.bf16.msra.mxu1 %v5409_v57  ;;  %v2922_v57 = vld [vmem:[#allocation16 + $0x2f8] sm:$0xff] }
 0x60e   :  { %5412 = vmatprep.subr.bf16.mxu1 %v5411_v58  ;;  %v5481_v58 = vpack.c.bf16 %v2904_v54, %v2903_v53  ;;  %v5483_v59 = vpack.c.bf16 %v2922_v57, %v2921_v56  ;;  %v5976_v53 = vld [vmem:[#allocation20 + $0x18] sm:$0xff]  ;;  %v5429_v54 = vpack.c.bf16 %v2862_v49, %v2861_v48 }
 0x60f   :  { %v2863_v57 = vld [vmem:[#allocation16 + $0x120] sm:$0xff] }
 0x611   :  { %5414 = vmatpush3.bf16.msra.mxu1 %v5413_v16 }
 0x612   :  { %5416 = vmatprep.subr.bf16.mxu1 %v5415_v55 }
 0x615   :  { %5418 = vmatpush3.bf16.msra.mxu1 %v5417_v8  ;;  %v2924_v8 = vld [vmem:[#allocation17 + $0x8] sm:$0xff] }
 0x616   :  { %5420 = vmatprep.subr.bf16.mxu1 %v5419_v14  ;;  %v5368_v10 = vpack.c.bf16 %v2924_v8, %v2923_v5  ;;  %v2867_v8 = vld [vmem:[#allocation16 + $0x140] sm:$0xff] }
 0x619   :  { %5422 = vmatpush3.bf16.msra.mxu1 %v5421_v19  ;;  %v5371_v19 = vpack.c.bf16 %v2926_v12, %v2925_v11 }
 0x61a   :  { %5456 = vmatprep.subr.bf16.mxu1 %v5455_v13  ;;  %v2927_v13 = vld [vmem:[#allocation17 + $0x20] sm:$0xff] }
 0x61b   :  { %v5374_v17 = vpack.c.bf16 %v2928_v15, %v2927_v13  ;;  %v2887_v13 = vld [vmem:[#allocation16 + $0x1e0] sm:$0xff]  ;;  %v2888_v15 = vld [vmem:[#allocation16 + $0x1e8] sm:$0xff] }
 0x61c   :  { %4160 = vmatmul.mubr.f32.vlgmr.msra.gmra.mrb[28].mxu1 %v5974_v34  ;;  %v2936_v34 = vld [vmem:[#allocation17 + $0x68] sm:$0xff] }
 0x61d   :  { %5458 = vmatpush3.bf16.msra.mxu1 %v5457_v22  ;;  %4299 = vmatprep.mubr.f32.mxu1 %v5975_v39  ;;  %v5377_v22 = vpack.c.bf16 %v2930_v18, %v2929_v36  ;;  %v5386_v39 = vpack.c.bf16 %v2936_v34, %v2935_v29  ;;  %v5447_v36 = vpack.c.bf16 %v2888_v15, %v2887_v13  ;;  %v2871_v18 = vld [vmem:[#allocation16 + $0x160] sm:$0xff]  ;;  %v5977_v34 = vld [vmem:[#allocation20 + $0x10] sm:$0xff] }
 0x61e   :  { %5460 = vmatprep.subr.bf16.mxu1 %v5459_v24  ;;  %v2931_v24 = vld [vmem:[#allocation17 + $0x40] sm:$0xff] }
 0x621   :  { %5462 = vmatpush3.bf16.msra.mxu1 %v5461_v6  ;;  %v2937_v6 = vld [vmem:[#allocation17 + $0x70] sm:$0xff] }
 0x622   :  { %5464 = vmatprep.subr.bf16.mxu1 %v5463_v7  ;;  %v2938_v7 = vld [vmem:[#allocation17 + $0x78] sm:$0xff] }
 0x623   :  { %v5389_v0 = vpack.c.bf16 %v2938_v7, %v2937_v6 }
 0x625   :  { %5466 = vmatpush3.bf16.msra.mxu1 %v5465_v30 }
 0x626   :  { %5468 = vmatprep.subr.bf16.mxu1 %v5467_v47 }
 0x629   :  { %5470 = vmatpush3.bf16.msra.mxu1 %v5469_v23  ;;  %v2859_v23 = vld [vmem:[#allocation16 + $0x100] sm:$0xff] }
 0x62a   :  { %5472 = vmatprep.subr.bf16.mxu1 %v5471_v40  ;;  %v2860_v40 = vld [vmem:[#allocation16 + $0x108] sm:$0xff] }
 0x62d   :  { %5474 = vmatpush3.bf16.msra.mxu1 %v5473_v44  ;;  %v5425_v44 = vpack.c.bf16 %v2860_v40, %v2859_v23 }
 0x62e   :  { %5476 = vmatprep.subr.bf16.mxu1 %v5475_v45 }
 0x631   :  { %5478 = vmatpush3.bf16.msra.mxu1 %v5477_v50  ;;  %v2879_v50 = vld [vmem:[#allocation16 + $0x1a0] sm:$0xff] }
 0x632   :  { %5480 = vmatprep.subr.bf16.mxu1 %v5479_v52  ;;  %v2880_v52 = vld [vmem:[#allocation16 + $0x1a8] sm:$0xff] }
 0x633   :  { %v5431_v56 = vpack.c.bf16 %v2880_v52, %v2879_v50 }
 0x635   :  { %5482 = vmatpush3.bf16.msra.mxu1 %v5481_v58  ;;  %v2864_v58 = vld [vmem:[#allocation16 + $0x128] sm:$0xff] }
 0x636   :  { %5484 = vmatprep.subr.bf16.mxu1 %v5483_v59  ;;  %v2881_v59 = vld [vmem:[#allocation16 + $0x1b0] sm:$0xff]  ;;  %v5433_v61 = vpack.c.bf16 %v2864_v58, %v2863_v57 }
 0x639   :  { %5486 = vmatpush3.bf16.msra.mxu1 %v5485_v62  ;;  %v5435_v62 = vpack.c.bf16 %v2882_v60, %v2881_v59 }
 0x63c   :  { %4300 = vmatmul.mubr.f32.vlgmr.msra.gmra.mrb[30].mxu1 %v6721_v43  ;;  %v6347_v43 = vmov 0.0|0.0  }
 0x6af   :  { %v4717_v16 = vpop.f32.mrb[24].mxu1 }
 0x6b0   :  { %v4718_v55 = vpop.f32.mrb[25].mxu1 }
 0x6b1   :  { %v4719_v4 = vadd.f32 %v4718_v55, %v4717_v16  ;;  %v2865_v16 = vld [vmem:[#allocation16 + $0x130] sm:$0xff]  ;;  %v2866_v55 = vld [vmem:[#allocation16 + $0x138] sm:$0xff] }
 0x6cf   :  { %v4752_v37 = vpop.f32.mrb[26].mxu1 }
 0x6d0   :  { %v4753_v31 = vpop.f32.mrb[27].mxu1 }
 0x6d1   :  { %v4754_v14 = vadd.f32 %v4753_v31, %v4752_v37  ;;  %v2884_v37 = vld [vmem:[#allocation16 + $0x1c8] sm:$0xff]  ;;  %v5437_v31 = vpack.c.bf16 %v2866_v55, %v2865_v16 }
 0x6d3   :  { %v3946_v9 = vadd.f32 %v4754_v14, %v4719_v4  ;;  %v2883_v4 = vld [vmem:[#allocation16 + $0x1c0] sm:$0xff]  ;;  %v2868_v14 = vld [vmem:[#allocation16 + $0x148] sm:$0xff] }
 0x6d4   :  { %v5439_v5 = vpack.c.bf16 %v2884_v37, %v2883_v4  ;;  %v5441_v11 = vpack.c.bf16 %v2868_v14, %v2867_v8 }
 0x6d5   :  { %4880 = vmatpush3.msra.mxu0 %v3946_v9  ;;  %v2885_v9 = vld [vmem:[#allocation16 + $0x1d0] sm:$0xff] }
 0x6d6   :  { %4882 = vmatmul.mubr.msk.f32.vlgmr.msra.gmra.mrb[24].mxu0 %vm3162_vm4, %v6737_v32  ;;  %5367 = vmatprep.subr.bf16.mxu0 %v6347_v43  ;;  %v2932_v32 = vld [vmem:[#allocation17 + $0x48] sm:$0xff] }
 0x6d7   :  { %5369 = vmatpush3.bf16.msra.mxu0 %v5368_v10  ;;  %4916 = vmatprep.mubr.msk.f32.mxu0 %vm6346_vm10, %v6345_v63  ;;  %v5380_v25 = vpack.c.bf16 %v2932_v32, %v2931_v24  ;;  %v5383_v63 = vpack.c.bf16 %v2934_v28, %v2933_v26  ;;  %v2886_v10 = vld [vmem:[#allocation16 + $0x1d8] sm:$0xff]  ;;  %v2889_v24 = vld [vmem:[#allocation16 + $0x1f0] sm:$0xff] }
 0x6d8   :  { %5370 = vmatprep.subr.bf16.mxu0 %v6347_v43  ;;  %v5443_v12 = vpack.c.bf16 %v2886_v10, %v2885_v9  ;;  %v2890_v32 = vld [vmem:[#allocation16 + $0x1f8] sm:$0xff]  ;;  %v2873_v28 = vld [vmem:[#allocation16 + $0x170] sm:$0xff] }
 0x6d9   :  { %v5451_v26 = vpack.c.bf16 %v2890_v32, %v2889_v24 }
 0x6db   :  { %5372 = vmatpush3.bf16.msra.mxu0 %v5371_v19  ;;  %v2870_v19 = vld [vmem:[#allocation16 + $0x158] sm:$0xff] }
 0x6dc   :  { %5373 = vmatprep.subr.bf16.mxu0 %v6347_v43 }
 0x6df   :  { %5375 = vmatpush3.bf16.msra.mxu0 %v5374_v17 }
 0x6e0   :  { %5376 = vmatprep.subr.bf16.mxu0 %v6347_v43 }
 0x6e3   :  { %5378 = vmatpush3.bf16.msra.mxu0 %v5377_v22  ;;  %v2872_v22 = vld [vmem:[#allocation16 + $0x168] sm:$0xff] }
 0x6e4   :  { %5379 = vmatprep.subr.bf16.mxu0 %v6347_v43 }
 0x6e7   :  { %5381 = vmatpush3.bf16.msra.mxu0 %v5380_v25  ;;  %v5449_v25 = vpack.c.bf16 %v2872_v22, %v2871_v18 }
 0x6e8   :  { %5382 = vmatprep.subr.bf16.mxu0 %v6347_v43 }
 0x6eb   :  { %5384 = vmatpush3.bf16.msra.mxu0 %v5383_v63  ;;  %v2874_v63 = vld [vmem:[#allocation16 + $0x178] sm:$0xff] }
 0x6ec   :  { %5385 = vmatprep.subr.bf16.mxu0 %v6347_v43  ;;  %v5453_v29 = vpack.c.bf16 %v2874_v63, %v2873_v28 }
 0x6ef   :  { %v4806_v33 = vpop.f32.mrb[28].mxu1  ;;  %5387 = vmatpush3.bf16.msra.mxu0 %v5386_v39 }
 0x6f0   :  { %v4807_v35 = vpop.f32.mrb[29].mxu1  ;;  %5388 = vmatprep.subr.bf16.mxu0 %v6347_v43  ;;  %v2869_v43 = vld [vmem:[#allocation16 + $0x150] sm:$0xff] }
 0x6f1   :  { %v6768_v20 = vadd.f32 %v4807_v35, %v4806_v33  ;;  %v5445_v17 = vpack.c.bf16 %v2870_v19, %v2869_v43 }
 0x6f3   :  { %5390 = vmatpush3.bf16.msra.mxu0 %v5389_v0 }
 0x6f4   :  { %5424 = vmatprep.subr.bf16.mxu0 %v5423_v2 }
 0x70f   :  { %v4876_v30 = vpop.f32.mrb[30].mxu1 }
 0x710   :  { %v4877_v47 = vpop.f32.mrb[31].mxu1 }
 0x711   :  { %v6770_v51 = vadd.f32 %v4877_v47, %v4876_v30 }
 0x7a9   :  { %v4021_v42 = vpop.f32.mrb[24].mxu0 }
 0x7aa   :  { %v4022_v45 = vadd.f32 %v4682_v3, %v4021_v42  ;;  %v4883_v46 = vpop.f32.mrb[25].mxu0 }
 0x7ac   :  { %4319 = vst [vmem:[#allocation23 + $0x30] sm:$0xff] %v4022_v45  ;;  %4917 = vmatmul.mubr.f32.vlgmr.msra.gmra.mrb[26].mxu0 %v4022_v45 }
 0x7ad   :  { %5426 = vmatpush3.bf16.msra.mxu0 %v5425_v44  ;;  %4229 = vmatprep.mubr.f32.mxu0 %v5976_v53 }
 0x7ae   :  { %5428 = vmatprep.subr.bf16.mxu0 %v5427_v21 }
 0x7b1   :  { %5430 = vmatpush3.bf16.msra.mxu0 %v5429_v54 }
 0x7b2   :  { %5432 = vmatprep.subr.bf16.mxu0 %v5431_v56 }
 0x7b5   :  { %5434 = vmatpush3.bf16.msra.mxu0 %v5433_v61 }
 0x7b6   :  { %5436 = vmatprep.subr.bf16.mxu0 %v5435_v62 }
 0x7b9   :  { %5438 = vmatpush3.bf16.msra.mxu0 %v5437_v31 }
 0x7ba   :  { %5440 = vmatprep.subr.bf16.mxu0 %v5439_v5 }
 0x7bd   :  { %5442 = vmatpush3.bf16.msra.mxu0 %v5441_v11 }
 0x7be   :  { %5444 = vmatprep.subr.bf16.mxu0 %v5443_v12 }
 0x7c1   :  { %5446 = vmatpush3.bf16.msra.mxu0 %v5445_v17 }
 0x7c2   :  { %5448 = vmatprep.subr.bf16.mxu0 %v5447_v36 }
 0x7c5   :  { %5450 = vmatpush3.bf16.msra.mxu0 %v5449_v25 }
 0x7c6   :  { %5452 = vmatprep.subr.bf16.mxu0 %v5451_v26 }
 0x7c9   :  { %5454 = vmatpush3.bf16.msra.mxu0 %v5453_v29 }
 0x7cc   :  { %4230 = vmatmul.mubr.f32.vlgmr.msra.gmra.mrb[28].mxu0 %v5977_v34 }
 0x7cd   :  { %6231 = shalt.err (!%p6228_p8)
}
 0x7ce   :  { %s6232_s25 = scalar_lea.hbm %s6834_s12, 768 }
 0x7cf   :  { %p6233_p9 = scmp.ne.s32.totalorder %s6834_s12, %s6232_s25  ;;  %p6236_p10 = scmp.lt.u32.totalorder %s6232_s25, %s6834_s12 }
 0x7d1   :  { %p6238_p11 = pnand %p6236_p10, %p6233_p9 }
 0x7d3   :  { %6241 = shalt.err (!%p6238_p11)
}
 0x7d4   :  { %4330 = dma.vmem_to_hbm [thread:$0]  %s4328_s19, 768, %s6834_s12, [#allocation4]  }
 0x7d5   :  { %s6349_s30 = smov [#allocation24]  }
 0x7d6   :  { %s4357_s16 = sshll.u32 %s6349_s30, 4  ;;  %s4358_s16 = int_to_ptr.vmem [resolvable:$true] %s4357_s16 }
 0x7d7   :  { %s6242_s14 = scalar_lea.vmem %s4358_s16, 128  ;;  %p6247_p13 = scmp.lt.s32.totalorder %s4358_s16, %s4358_s16 }
 0x7d8   :  { %p6243_p12 = scmp.ne.s32.totalorder %s4358_s16, %s6242_s14  ;;  %p6248_p0 = scmp.lt.s32.totalorder %s6242_s14, %s6242_s14 }
 0x7da   :  { %p6249_p1 = por %p6248_p0, %p6247_p13 }
 0x7dc   :  { %p6250_p2 = pnand %p6249_p1, %p6243_p12 }
 0x7de   :  { %6253 = shalt.err (!%p6250_p2)
}
 0x7df   :  { %s6254_s24 = scalar_lea.hbm %s6837_s15, 128 }
 0x7e0   :  { %p6255_p3 = scmp.ne.s32.totalorder %s6837_s15, %s6254_s24  ;;  %p6258_p4 = scmp.lt.u32.totalorder %s6254_s24, %s6837_s15 }
 0x7e2   :  { %p6260_p5 = pnand %p6258_p4, %p6255_p3 }
 0x7e4   :  { %6263 = shalt.err (!%p6260_p5)
}
 0x7e5   :  { %4360 = dma.vmem_to_hbm [thread:$0]  %s4358_s16, 128, %s6837_s15, [#allocation25]   ;;  %v4684_v47 = vld [vmem:[#allocation19] ss:$0 sm:$0xff] }
 0x7e6   :  { %s6350_s9 = smov [#allocation21]   ;;  %s6351_s29 = smov [#allocation23]  }
 0x7e7   :  { %s4337_s26 = sshll.u32 %s6350_s9, 4  ;;  %s4347_s11 = sshll.u32 %s6351_s29, 4  ;;  %s4338_s26 = int_to_ptr.vmem [resolvable:$true] %s4337_s26  ;;  %s4348_s11 = int_to_ptr.vmem [resolvable:$true] %s4347_s11 }
 0x7e8   :  { %s6264_s15 = scalar_lea.vmem %s4338_s26, 128  ;;  %p6269_p7 = scmp.lt.s32.totalorder %s4338_s26, %s4338_s26 }
 0x7e9   :  { %p6265_p6 = scmp.ne.s32.totalorder %s4338_s26, %s6264_s15  ;;  %p6270_p8 = scmp.lt.s32.totalorder %s6264_s15, %s6264_s15 }
 0x7eb   :  { %p6271_p9 = por %p6270_p8, %p6269_p7 }
 0x7ed   :  { %p6272_p10 = pnand %p6271_p9, %p6265_p6 }
 0x87f   :  { %v4091_v39 = vpop.f32.mrb[26].mxu0 }
 0x880   :  { %v4162_v6 = vadd.f32 %v6768_v20, %v4091_v39  ;;  %v4918_v7 = vpop.f32.mrb[27].mxu0 }
 0x89f   :  { %v4841_v33 = vpop.f32.mrb[28].mxu0 }
 0x8a0   :  { %v4842_v0 = vpop.f32.mrb[29].mxu0 }
 0x8a1   :  { %v4843_v35 = vadd.f32 %v4842_v0, %v4841_v33 }
 0x8a3   :  { %v4232_v30 = vadd.f32 %v4843_v35, %v4162_v6 }
 0x8a5   :  { %v4302_v1 = vadd.f32 %v6770_v51, %v4232_v30 }
 0x8a7   :  { %v4311_v38 = vadd.f32 %v4684_v47, %v4302_v1 }
 0x8a9   :  { %4320 = vst [vmem:[#allocation21] sm:$0xff] %v4311_v38 }
 0x8aa   :  { %6275 = shalt.err (!%p6272_p10)
}
 0x8ab   :  { %s6276_s19 = scalar_lea.hbm %s6835_s13, 128 }
 0x8ac   :  { %p6277_p11 = scmp.ne.s32.totalorder %s6835_s13, %s6276_s19  ;;  %p6280_p12 = scmp.lt.u32.totalorder %s6276_s19, %s6835_s13 }
 0x8ae   :  { %p6282_p13 = pnand %p6280_p12, %p6277_p11 }
 0x8b0   :  { %6285 = shalt.err (!%p6282_p13)
}
 0x8b1   :  { %4340 = dma.vmem_to_hbm [thread:$0]  %s4338_s26, 128, %s6835_s13, [#allocation22]  }
 0x8b2   :  { %s6286_s27 = scalar_lea.vmem %s4348_s11, 896  ;;  %p6291_p1 = scmp.lt.s32.totalorder %s4348_s11, %s4348_s11 }
 0x8b3   :  { %p6287_p0 = scmp.ne.s32.totalorder %s4348_s11, %s6286_s27  ;;  %p6292_p2 = scmp.lt.s32.totalorder %s6286_s27, %s6286_s27 }
 0x8b5   :  { %p6293_p3 = por %p6292_p2, %p6291_p1 }
 0x8b7   :  { %p6294_p4 = pnand %p6293_p3, %p6287_p0 }
 0x8b9   :  { %6297 = shalt.err (!%p6294_p4)
}
 0x8ba   :  { %s6842_s7 = sld [smem:[#allocation35_spill]] }
 0x8c0   :  { %s6298_s30 = scalar_lea.hbm %s6842_s7, 896 }
 0x8c1   :  { %p6299_p5 = scmp.ne.s32.totalorder %s6842_s7, %s6298_s30  ;;  %p6302_p6 = scmp.lt.u32.totalorder %s6298_s30, %s6842_s7 }
 0x8c3   :  { %p6304_p7 = pnand %p6302_p6, %p6299_p5 }
 0x8c5   :  { %6307 = shalt.err (!%p6304_p7)
}
 0x8c6   :  { %4350 = dma.vmem_to_hbm [thread:$0]  %s4348_s11, 896, %s6842_s7, [#allocation22]  }
 0x8c7   :  { %6320 = dma.done.wait [#allocation4], 768  }
 0x8c8   :  { %6321 = vsyncadd [#allocation4], 4294966528 }
 0x8c9   :  { %6322 = dma.done.wait [#allocation22], 1024  }
 0x8ca   :  { %6323 = vsyncadd [#allocation22], 4294966272 }
 0x8cb   :  { %6324 = dma.done.wait [#allocation25], 128  }
 0x8cc   :  { %6325 = vsyncadd [#allocation25], 4294967168 }
 0x8cd   :  { %4373 = vsyncpa [#allocation3], 1 }
 0x8ce   :  { %4374 = vsyncpa [#allocation6], 1 }
 0x8cf   :  { %4375 = vsyncpa [#allocation9], 1 }
 0x8d0   :  { %4376 = vsyncpa [#allocation12], 1 }
 0x8d1   :  { %4377 = vsyncpa [#allocation15], 1 }
 0x8d2   :  { %4378 = vsyncpa [#allocation18], 1 }
 0x8d3   :  { %4379 = vsyncpa [#allocation4], 1 }
 0x8d4   :  { %4380 = vsyncpa [#allocation22], 1 }
 0x8d5   :  { %4381 = vsyncpa [#allocation25], 1 }

</bundles_post_ra>
